<compile_context>
chip_gen: v6e
topology: v6e:2x2x1
jax: 0.10.0
libtpu: 0.0.40
codegen_flags: <defaults>
</compile_context>

<pallas_src>
import functools

import jax
import jax.numpy as jnp
from jax import lax
from jax.experimental import pallas as pl
from jax.experimental.pallas import tpu as pltpu


# ---------------------------------------------------------------------------
# Static architecture description + packed-parameter layout
# ---------------------------------------------------------------------------
_PACK_W = 64  # max(Cout) over all layers -> packed buffer width

# name, kind, kernel_size, stride, Cin, Cout
_LAYERS = (
    ("enc1", "conv", 3, 1, 8, 64),
    ("enc2", "conv", 3, 1, 64, 32),
    ("enc3", "conv", 3, 1, 32, 16),
    ("enc4", "conv", 3, 1, 16, 8),
    ("dec1", "tconv", 2, 2, 8, 8),
    ("dec2", "tconv", 3, 2, 8, 16),
    ("dec3", "tconv", 2, 2, 16, 32),
    ("dec4", "tconv", 2, 2, 32, 64),
    ("out", "conv", 3, 1, 64, 8),
)


def _build_layout():
    """Row offsets (all multiples of 8) for each tap matrix / bias row."""
    layout = {}
    row = 0
    for name, _kind, k, _stride, cin, cout in _LAYERS:
        taps = []
        for _ in range(k):
            taps.append(row)
            row += cin                       # every Cin is a multiple of 8
        bias = row
        row += 8                             # 8-row slot keeps alignment
        layout[name] = (tuple(taps), bias, cin, cout)
    return layout, row


_LAYOUT, _TOTAL_ROWS = _build_layout()


def prepare_params(params):
    """One-time re-layout of PyTorch-layout params into one packed f32 buffer."""
    buf = jnp.zeros((_TOTAL_ROWS, _PACK_W), jnp.float32)
    for name, kind, k, _stride, cin, cout in _LAYERS:
        w, b = params[name]
        taps, boff, _, _ = _LAYOUT[name]
        for j in range(k):
            # Conv1d weight: (Cout, Cin, k) -> tap (Cin, Cout)
            # ConvTranspose1d weight: (Cin, Cout, k) -> tap (Cin, Cout)
            wj = w[:, :, j].T if kind == "conv" else w[:, :, j]
            buf = buf.at[taps[j]:taps[j] + cin, :cout].set(wj.astype(jnp.float32))
        buf = buf.at[boff, :cout].set(b.astype(jnp.float32))
    return buf


# ---------------------------------------------------------------------------
# In-kernel helpers (2-D f32 values on the row-stacked batch)
# ---------------------------------------------------------------------------
def _tap(w_ref, taps, j, cin, cout):
    off = taps[j]
    return w_ref[off:off + cin, :cout]


def _bias(w_ref, boff, cout):
    return w_ref[boff:boff + 1, :cout]


def _shift_matrix(l_total, l_per, d):
    """G[r, c] = 1 iff c == r + d and r, c lie in the same sample block.

    (G @ x)[r] = x[r + d] with zero fill at per-sample boundaries, i.e. the
    zero-padding behaviour of Conv1d(padding=1) on the row-stacked batch.
    Built from iota/compare only (data independent)."""
    r = lax.broadcasted_iota(jnp.int32, (l_total, l_total), 0)
    c = lax.broadcasted_iota(jnp.int32, (l_total, l_total), 1)
    m = c == r + d
    for s in range(1, l_total // l_per):               # static seam constraints
        m = m & ((r < s * l_per) == (c < s * l_per))
    return m.astype(jnp.float32)


def _pool_matrices(l_total):
    half = l_total // 2
    r = lax.broadcasted_iota(jnp.int32, (half, l_total), 0)
    c = lax.broadcasted_iota(jnp.int32, (half, l_total), 1)
    return (c == 2 * r).astype(jnp.float32), (c == 2 * r + 1).astype(jnp.float32)


def _enc_stage(x, w_ref, name, l_per):
    """Conv1d(k=3, pad=1) + bias, fused MaxPool1d(2,2), ReLU (relu∘max == max∘relu)."""
    taps, boff, cin, cout = _LAYOUT[name]
    lt = x.shape[0]
    acc = jnp.dot(x, _tap(w_ref, taps, 1, cin, cout),
                  preferred_element_type=jnp.float32)
    xm1 = jnp.dot(_shift_matrix(lt, l_per, -1), x,
                  preferred_element_type=jnp.float32)
    acc = acc + jnp.dot(xm1, _tap(w_ref, taps, 0, cin, cout),
                        preferred_element_type=jnp.float32)
    xp1 = jnp.dot(_shift_matrix(lt, l_per, +1), x,
                  preferred_element_type=jnp.float32)
    acc = acc + jnp.dot(xp1, _tap(w_ref, taps, 2, cin, cout),
                        preferred_element_type=jnp.float32)
    y = acc + _bias(w_ref, boff, cout)
    # Per-sample lengths are even, so the global even/odd split never crosses
    # the sample seam.
    even, odd = _pool_matrices(lt)
    pooled = jnp.maximum(jnp.dot(even, y, preferred_element_type=jnp.float32),
                         jnp.dot(odd, y, preferred_element_type=jnp.float32))
    return jnp.maximum(pooled, 0.0)


def _dec_stage(x, w_ref, name, k, stride, l_per_in):
    """ConvTranspose1d(stride=2, padding=0) + bias + ReLU on the stacked batch."""
    taps, boff, cin, cout = _LAYOUT[name]
    lt_in = x.shape[0]
    n = lt_in // l_per_in
    l_per_out = (l_per_in - 1) * stride + k
    lt_out = n * l_per_out
    delta = k - stride                                   # 0 except for dec2
    r = lax.broadcasted_iota(jnp.int32, (lt_out, lt_in), 0)
    c = lax.broadcasted_iota(jnp.int32, (lt_out, lt_in), 1)
    target = stride * c
    if delta != 0:
        for s in range(1, n):                            # per-sample output offset
            target = target + delta * (c >= s * l_per_in).astype(jnp.int32)
    acc = None
    for j in range(k):
        yj = jnp.dot(x, _tap(w_ref, taps, j, cin, cout),
                     preferred_element_type=jnp.float32)
        sj = (r == target + j).astype(jnp.float32)       # block-diag scatter
        term = jnp.dot(sj, yj, preferred_element_type=jnp.float32)
        acc = term if acc is None else acc + term
    return jnp.maximum(acc + _bias(w_ref, boff, cout), 0.0)


def _head_stage(x, w_ref):
    """Conv1d(k=3, pad=0) + sigmoid, computed at full stacked length.

    Only the first (L-2) rows of each sample are valid; invalid rows are never
    written to the output, so no boundary masks are needed here."""
    taps, boff, cin, cout = _LAYOUT["out"]
    lt = x.shape[0]
    r = lax.broadcasted_iota(jnp.int32, (lt, lt), 0)
    c = lax.broadcasted_iota(jnp.int32, (lt, lt), 1)
    acc = jnp.dot(x, _tap(w_ref, taps, 0, cin, cout),
                  preferred_element_type=jnp.float32)
    for j in (1, 2):
        xs = jnp.dot((c == r + j).astype(jnp.float32), x,
                     preferred_element_type=jnp.float32)
        acc = acc + jnp.dot(xs, _tap(w_ref, taps, j, cin, cout),
                            preferred_element_type=jnp.float32)
    return jax.nn.sigmoid(acc + _bias(w_ref, boff, cout))


# ---------------------------------------------------------------------------
# Fused forward kernel: the whole network, all samples, in one program
# ---------------------------------------------------------------------------
def _autoencoder_kernel(x_ref, w_ref, o_ref, *, n_samples, l_in):
    x = x_ref[...].astype(jnp.float32)            # (n_samples * l_in, 8)
    l = l_in
    for name in ("enc1", "enc2", "enc3", "enc4"):
        x = _enc_stage(x, w_ref, name, l)
        l //= 2
    for name, k in (("dec1", 2), ("dec2", 3), ("dec3", 2), ("dec4", 2)):
        x = _dec_stage(x, w_ref, name, k, 2, l)
        l = (l - 1) * 2 + k
    z = _head_stage(x, w_ref)                     # (n_samples * l, 8)
    l_out = l - 2
    for s in range(n_samples):                    # static per-sample writes
        o_ref[s] = z[s * l:s * l + l_out, :].astype(o_ref.dtype)


# ---------------------------------------------------------------------------
# Wrapper
# ---------------------------------------------------------------------------
def _out_length(l):
    for _ in range(4):          # enc convs keep length (pad=1, k=3); pools halve
        l //= 2
    for k in (2, 3, 2, 2):      # transposed convs, stride 2, padding 0
        l = (l - 1) * 2 + k
    return l - 2                # final conv k=3, pad=0


@jax.jit
def autoencoder_forward(packed_w, x_ncl):
    n, c_in, l_in = x_ncl.shape
    l_out = _out_length(l_in)
    c_out = _LAYOUT["out"][3]

    # Only XLA ops around the single pallas_call: tiny input/output transposes.
    x_stacked = jnp.transpose(x_ncl, (0, 2, 1)).reshape(n * l_in, c_in)
    x_stacked = x_stacked.astype(jnp.float32)

    kernel = functools.partial(_autoencoder_kernel, n_samples=n, l_in=l_in)
    y_nlc = pl.pallas_call(
        kernel,
        out_shape=jax.ShapeDtypeStruct((n, l_out, c_out), jnp.float32),
        grid=(1,),
        in_specs=[
            pl.BlockSpec((n * l_in, c_in), lambda i: (0, 0)),
            pl.BlockSpec((_TOTAL_ROWS, _PACK_W), lambda i: (0, 0)),
        ],
        out_specs=pl.BlockSpec((n, l_out, c_out), lambda i: (0, 0, 0)),
        compiler_params=pltpu.CompilerParams(
            dimension_semantics=("arbitrary",)),
    )(x_stacked, packed_w)

    return jnp.transpose(y_nlc, (0, 2, 1))        # back to (N, C, L)


# ---------------------------------------------------------------------------
# Parameters (deterministic synthetic init, PyTorch layouts)
# ---------------------------------------------------------------------------
def init_params(key):
    specs = {
        "enc1": ((64, 8, 3), 64),
        "enc2": ((32, 64, 3), 32),
        "enc3": ((16, 32, 3), 16),
        "enc4": ((8, 16, 3), 8),
        "dec1": ((8, 8, 2), 8),      # ConvTranspose1d: (Cin, Cout, k)
        "dec2": ((8, 16, 3), 16),
        "dec3": ((16, 32, 2), 32),
        "dec4": ((32, 64, 2), 64),
        "out":  ((8, 64, 3), 8),
    }
    params = {}
    for i, (name, (wshape, blen)) in enumerate(specs.items()):
        kw, kb = jax.random.split(jax.random.fold_in(key, i))
        params[name] = (
            0.1 * jax.random.normal(kw, wshape, jnp.float32),
            0.1 * jax.random.normal(kb, (blen,), jnp.float32),
        )
    return params


# ---------------------------------------------------------------------------
# Pure-JAX reference (PyTorch semantics) for runtime validation only
# ---------------------------------------------------------------------------
@jax.jit
def _reference_forward(params, x_ncl):
    x = jnp.transpose(x_ncl, (0, 2, 1)).astype(jnp.float32)   # (N, L, C)

    def conv(x_nlc, w, b, pad):
        cout, cin, k = w.shape
        n, l, _ = x_nlc.shape
        xp = jnp.pad(x_nlc, ((0, 0), (pad, pad), (0, 0)))
        lout = l + 2 * pad - (k - 1)
        out = jnp.zeros((n, lout, cout), jnp.float32)
        for j in range(k):
            out = out + jnp.einsum("nlc,oc->nlo", xp[:, j:j + lout, :], w[:, :, j])
        return out + b

    def tconv(x_nlc, w, b, stride):
        cin, cout, k = w.shape
        n, l, _ = x_nlc.shape
        lout = (l - 1) * stride + k
        out = jnp.zeros((n, lout, cout), jnp.float32)
        for j in range(k):
            y = jnp.einsum("nlc,co->nlo", x_nlc, w[:, :, j])
            out = out.at[:, j:j + stride * l:stride, :].add(y)
        return out + b

    def pool(x_nlc):
        return jnp.maximum(x_nlc[:, 0::2, :], x_nlc[:, 1::2, :])

    for name in ("enc1", "enc2", "enc3", "enc4"):
        w, b = params[name]
        x = pool(jax.nn.relu(conv(x, w, b, pad=1)))
    for name in ("dec1", "dec2", "dec3", "dec4"):
        w, b = params[name]
        x = jax.nn.relu(tconv(x, w, b, stride=2))
    w, b = params["out"]
    x = jax.nn.sigmoid(conv(x, w, b, pad=0))
    return jnp.transpose(x, (0, 2, 1))


if __name__ == "__main__":
    key = jax.random.PRNGKey(0)
    pkey, xkey = jax.random.split(key)
    params = init_params(pkey)
    packed_w = prepare_params(params)        # one-time re-layout, outside the hot path

    # input consistent with Conv1d(in_channels=8, ...): (batch=2, channels=8, length=32)
    x = jax.random.normal(xkey, (2, 8, 32), jnp.float32)

    y = jax.block_until_ready(autoencoder_forward(packed_w, x))

    assert y.shape == (2, 8, 34), y.shape               # L + 2 for L = 32
    assert bool(jnp.all(jnp.isfinite(y)))
    assert bool(jnp.all((y >= 0.0) & (y <= 1.0)))       # sigmoid output range

    y_ref = jax.block_until_ready(_reference_forward(params, x))
    err = float(jnp.max(jnp.abs(y - y_ref)))
    assert err < 1e-4, f"max abs err vs reference = {err}"

    print("KERNEL_OK")
</pallas_src>

<mosaic_0001>
module attributes {stable_mosaic.version = 11 : i64} {
  func.func @_autoencoder_kernel(%arg0: i32, %arg1: memref<64x8xf32, #tpu.memory_space<vmem>>, %arg2: memref<760x64xf32, #tpu.memory_space<vmem>>, %arg3: memref<2x34x8xf32, #tpu.memory_space<vmem>>) attributes {dimension_semantics = [#tpu.dimension_semantics<arbitrary>], iteration_bounds = array<i64: 1>, scalar_prefetch = 0 : i64, scratch_operands = 0 : i64, tpu.core_type = #tpu.core_type<tc>, window_params = [{pipeline_mode = #tpu.pipeline_mode<synchronous>, transform_indices = @transform_0, window_bounds = array<i64: 64, 8>}, {pipeline_mode = #tpu.pipeline_mode<synchronous>, transform_indices = @transform_1, window_bounds = array<i64: 760, 64>}, {pipeline_mode = #tpu.pipeline_mode<synchronous>, transform_indices = @transform_2, window_bounds = array<i64: 2, 34, 8>}]} {
    %c0 = arith.constant 0 : index
    %c0_0 = arith.constant 0 : index
    %0 = vector.load %arg1[%c0, %c0_0] : memref<64x8xf32, #tpu.memory_space<vmem>>, vector<64x8xf32>
    %c8 = arith.constant 8 : index
    %c0_1 = arith.constant 0 : index
    %1 = vector.load %arg2[%c8, %c0_1] : memref<760x64xf32, #tpu.memory_space<vmem>>, vector<8x64xf32>
    %cst = arith.constant dense<0.000000e+00> : vector<64x64xf32>
    %2 = tpu.matmul %0, %1, %cst {dimension_numbers = #tpu.dot_dimension_numbers<[1], [0], [0], [1], [0, 0, 1, 1], [], []>} : vector<64x8xf32>, vector<8x64xf32>, vector<64x64xf32> -> vector<64x64xf32>
    %3 = tpu.iota {dimensions = array<i32: 0>} : vector<64x64xi32>
    %4 = tpu.iota {dimensions = array<i32: 1>} : vector<64x64xi32>
    %c-1_i32 = arith.constant -1 : i32
    %5 = vector.broadcast %c-1_i32 : i32 to vector<64x64xi32>
    %6 = arith.addi %3, %5 : vector<64x64xi32>
    %7 = arith.cmpi eq, %4, %6 : vector<64x64xi32>
    %c32_i32 = arith.constant 32 : i32
    %8 = vector.broadcast %c32_i32 : i32 to vector<64x64xi32>
    %9 = arith.cmpi slt, %3, %8 : vector<64x64xi32>
    %c32_i32_2 = arith.constant 32 : i32
    %10 = vector.broadcast %c32_i32_2 : i32 to vector<64x64xi32>
    %11 = arith.cmpi slt, %4, %10 : vector<64x64xi32>
    %12 = arith.xori %9, %11 : vector<64x64xi1>
    %cst_3 = arith.constant dense<true> : vector<64x64xi1>
    %13 = arith.xori %12, %cst_3 : vector<64x64xi1>
    %14 = arith.andi %7, %13 : vector<64x64xi1>
    %15 = arith.extui %14 : vector<64x64xi1> to vector<64x64xi32>
    %16 = arith.sitofp %15 : vector<64x64xi32> to vector<64x64xf32>
    %cst_4 = arith.constant dense<0.000000e+00> : vector<64x8xf32>
    %17 = tpu.matmul %16, %0, %cst_4 {dimension_numbers = #tpu.dot_dimension_numbers<[1], [0], [0], [1], [0, 0, 1, 1], [], []>} : vector<64x64xf32>, vector<64x8xf32>, vector<64x8xf32> -> vector<64x8xf32>
    %c0_5 = arith.constant 0 : index
    %c0_6 = arith.constant 0 : index
    %18 = vector.load %arg2[%c0_5, %c0_6] : memref<760x64xf32, #tpu.memory_space<vmem>>, vector<8x64xf32>
    %cst_7 = arith.constant dense<0.000000e+00> : vector<64x64xf32>
    %19 = tpu.matmul %17, %18, %cst_7 {dimension_numbers = #tpu.dot_dimension_numbers<[1], [0], [0], [1], [0, 0, 1, 1], [], []>} : vector<64x8xf32>, vector<8x64xf32>, vector<64x64xf32> -> vector<64x64xf32>
    %20 = arith.addf %2, %19 : vector<64x64xf32>
    %21 = tpu.iota {dimensions = array<i32: 0>} : vector<64x64xi32>
    %22 = tpu.iota {dimensions = array<i32: 1>} : vector<64x64xi32>
    %c1_i32 = arith.constant 1 : i32
    %23 = vector.broadcast %c1_i32 : i32 to vector<64x64xi32>
    %24 = arith.addi %21, %23 : vector<64x64xi32>
    %25 = arith.cmpi eq, %22, %24 : vector<64x64xi32>
    %c32_i32_8 = arith.constant 32 : i32
    %26 = vector.broadcast %c32_i32_8 : i32 to vector<64x64xi32>
    %27 = arith.cmpi slt, %21, %26 : vector<64x64xi32>
    %c32_i32_9 = arith.constant 32 : i32
    %28 = vector.broadcast %c32_i32_9 : i32 to vector<64x64xi32>
    %29 = arith.cmpi slt, %22, %28 : vector<64x64xi32>
    %30 = arith.xori %27, %29 : vector<64x64xi1>
    %cst_10 = arith.constant dense<true> : vector<64x64xi1>
    %31 = arith.xori %30, %cst_10 : vector<64x64xi1>
    %32 = arith.andi %25, %31 : vector<64x64xi1>
    %33 = arith.extui %32 : vector<64x64xi1> to vector<64x64xi32>
    %34 = arith.sitofp %33 : vector<64x64xi32> to vector<64x64xf32>
    %cst_11 = arith.constant dense<0.000000e+00> : vector<64x8xf32>
    %35 = tpu.matmul %34, %0, %cst_11 {dimension_numbers = #tpu.dot_dimension_numbers<[1], [0], [0], [1], [0, 0, 1, 1], [], []>} : vector<64x64xf32>, vector<64x8xf32>, vector<64x8xf32> -> vector<64x8xf32>
    %c16 = arith.constant 16 : index
    %c0_12 = arith.constant 0 : index
    %36 = vector.load %arg2[%c16, %c0_12] : memref<760x64xf32, #tpu.memory_space<vmem>>, vector<8x64xf32>
    %cst_13 = arith.constant dense<0.000000e+00> : vector<64x64xf32>
    %37 = tpu.matmul %35, %36, %cst_13 {dimension_numbers = #tpu.dot_dimension_numbers<[1], [0], [0], [1], [0, 0, 1, 1], [], []>} : vector<64x8xf32>, vector<8x64xf32>, vector<64x64xf32> -> vector<64x64xf32>
    %38 = arith.addf %20, %37 : vector<64x64xf32>
    %c24 = arith.constant 24 : index
    %c0_14 = arith.constant 0 : index
    %39 = vector.load %arg2[%c24, %c0_14] : memref<760x64xf32, #tpu.memory_space<vmem>>, vector<1x64xf32>
    %40 = vector.broadcast %39 : vector<1x64xf32> to vector<64x64xf32>
    %41 = arith.addf %38, %40 : vector<64x64xf32>
    %42 = tpu.iota {dimensions = array<i32: 0>} : vector<32x64xi32>
    %43 = tpu.iota {dimensions = array<i32: 1>} : vector<32x64xi32>
    %c2_i32 = arith.constant 2 : i32
    %44 = vector.broadcast %c2_i32 : i32 to vector<32x64xi32>
    %45 = arith.muli %44, %42 : vector<32x64xi32>
    %46 = arith.cmpi eq, %43, %45 : vector<32x64xi32>
    %47 = arith.extui %46 : vector<32x64xi1> to vector<32x64xi32>
    %48 = arith.sitofp %47 : vector<32x64xi32> to vector<32x64xf32>
    %c2_i32_15 = arith.constant 2 : i32
    %49 = vector.broadcast %c2_i32_15 : i32 to vector<32x64xi32>
    %50 = arith.muli %49, %42 : vector<32x64xi32>
    %c1_i32_16 = arith.constant 1 : i32
    %51 = vector.broadcast %c1_i32_16 : i32 to vector<32x64xi32>
    %52 = arith.addi %50, %51 : vector<32x64xi32>
    %53 = arith.cmpi eq, %43, %52 : vector<32x64xi32>
    %54 = arith.extui %53 : vector<32x64xi1> to vector<32x64xi32>
    %55 = arith.sitofp %54 : vector<32x64xi32> to vector<32x64xf32>
    %cst_17 = arith.constant dense<0.000000e+00> : vector<32x64xf32>
    %56 = tpu.matmul %48, %41, %cst_17 {dimension_numbers = #tpu.dot_dimension_numbers<[1], [0], [0], [1], [0, 0, 1, 1], [], []>} : vector<32x64xf32>, vector<64x64xf32>, vector<32x64xf32> -> vector<32x64xf32>
    %cst_18 = arith.constant dense<0.000000e+00> : vector<32x64xf32>
    %57 = tpu.matmul %55, %41, %cst_18 {dimension_numbers = #tpu.dot_dimension_numbers<[1], [0], [0], [1], [0, 0, 1, 1], [], []>} : vector<32x64xf32>, vector<64x64xf32>, vector<32x64xf32> -> vector<32x64xf32>
    %58 = arith.maximumf %56, %57 : vector<32x64xf32>
    %cst_19 = arith.constant 0.000000e+00 : f32
    %59 = vector.broadcast %cst_19 : f32 to vector<32x64xf32>
    %60 = arith.maximumf %58, %59 : vector<32x64xf32>
    %c96 = arith.constant 96 : index
    %c0_20 = arith.constant 0 : index
    %61 = vector.load %arg2[%c96, %c0_20] : memref<760x64xf32, #tpu.memory_space<vmem>>, vector<64x32xf32>
    %cst_21 = arith.constant dense<0.000000e+00> : vector<32x32xf32>
    %62 = tpu.matmul %60, %61, %cst_21 {dimension_numbers = #tpu.dot_dimension_numbers<[1], [0], [0], [1], [0, 0, 1, 1], [], []>} : vector<32x64xf32>, vector<64x32xf32>, vector<32x32xf32> -> vector<32x32xf32>
    %63 = tpu.iota {dimensions = array<i32: 0>} : vector<32x32xi32>
    %64 = tpu.iota {dimensions = array<i32: 1>} : vector<32x32xi32>
    %c-1_i32_22 = arith.constant -1 : i32
    %65 = vector.broadcast %c-1_i32_22 : i32 to vector<32x32xi32>
    %66 = arith.addi %63, %65 : vector<32x32xi32>
    %67 = arith.cmpi eq, %64, %66 : vector<32x32xi32>
    %c16_i32 = arith.constant 16 : i32
    %68 = vector.broadcast %c16_i32 : i32 to vector<32x32xi32>
    %69 = arith.cmpi slt, %63, %68 : vector<32x32xi32>
    %c16_i32_23 = arith.constant 16 : i32
    %70 = vector.broadcast %c16_i32_23 : i32 to vector<32x32xi32>
    %71 = arith.cmpi slt, %64, %70 : vector<32x32xi32>
    %72 = arith.xori %69, %71 : vector<32x32xi1>
    %cst_24 = arith.constant dense<true> : vector<32x32xi1>
    %73 = arith.xori %72, %cst_24 : vector<32x32xi1>
    %74 = arith.andi %67, %73 : vector<32x32xi1>
    %75 = arith.extui %74 : vector<32x32xi1> to vector<32x32xi32>
    %76 = arith.sitofp %75 : vector<32x32xi32> to vector<32x32xf32>
    %cst_25 = arith.constant dense<0.000000e+00> : vector<32x64xf32>
    %77 = tpu.matmul %76, %60, %cst_25 {dimension_numbers = #tpu.dot_dimension_numbers<[1], [0], [0], [1], [0, 0, 1, 1], [], []>} : vector<32x32xf32>, vector<32x64xf32>, vector<32x64xf32> -> vector<32x64xf32>
    %c32 = arith.constant 32 : index
    %c0_26 = arith.constant 0 : index
    %78 = vector.load %arg2[%c32, %c0_26] : memref<760x64xf32, #tpu.memory_space<vmem>>, vector<64x32xf32>
    %cst_27 = arith.constant dense<0.000000e+00> : vector<32x32xf32>
    %79 = tpu.matmul %77, %78, %cst_27 {dimension_numbers = #tpu.dot_dimension_numbers<[1], [0], [0], [1], [0, 0, 1, 1], [], []>} : vector<32x64xf32>, vector<64x32xf32>, vector<32x32xf32> -> vector<32x32xf32>
    %80 = arith.addf %62, %79 : vector<32x32xf32>
    %81 = tpu.iota {dimensions = array<i32: 0>} : vector<32x32xi32>
    %82 = tpu.iota {dimensions = array<i32: 1>} : vector<32x32xi32>
    %c1_i32_28 = arith.constant 1 : i32
    %83 = vector.broadcast %c1_i32_28 : i32 to vector<32x32xi32>
    %84 = arith.addi %81, %83 : vector<32x32xi32>
    %85 = arith.cmpi eq, %82, %84 : vector<32x32xi32>
    %c16_i32_29 = arith.constant 16 : i32
    %86 = vector.broadcast %c16_i32_29 : i32 to vector<32x32xi32>
    %87 = arith.cmpi slt, %81, %86 : vector<32x32xi32>
    %c16_i32_30 = arith.constant 16 : i32
    %88 = vector.broadcast %c16_i32_30 : i32 to vector<32x32xi32>
    %89 = arith.cmpi slt, %82, %88 : vector<32x32xi32>
    %90 = arith.xori %87, %89 : vector<32x32xi1>
    %cst_31 = arith.constant dense<true> : vector<32x32xi1>
    %91 = arith.xori %90, %cst_31 : vector<32x32xi1>
    %92 = arith.andi %85, %91 : vector<32x32xi1>
    %93 = arith.extui %92 : vector<32x32xi1> to vector<32x32xi32>
    %94 = arith.sitofp %93 : vector<32x32xi32> to vector<32x32xf32>
    %cst_32 = arith.constant dense<0.000000e+00> : vector<32x64xf32>
    %95 = tpu.matmul %94, %60, %cst_32 {dimension_numbers = #tpu.dot_dimension_numbers<[1], [0], [0], [1], [0, 0, 1, 1], [], []>} : vector<32x32xf32>, vector<32x64xf32>, vector<32x64xf32> -> vector<32x64xf32>
    %c160 = arith.constant 160 : index
    %c0_33 = arith.constant 0 : index
    %96 = vector.load %arg2[%c160, %c0_33] : memref<760x64xf32, #tpu.memory_space<vmem>>, vector<64x32xf32>
    %cst_34 = arith.constant dense<0.000000e+00> : vector<32x32xf32>
    %97 = tpu.matmul %95, %96, %cst_34 {dimension_numbers = #tpu.dot_dimension_numbers<[1], [0], [0], [1], [0, 0, 1, 1], [], []>} : vector<32x64xf32>, vector<64x32xf32>, vector<32x32xf32> -> vector<32x32xf32>
    %98 = arith.addf %80, %97 : vector<32x32xf32>
    %c224 = arith.constant 224 : index
    %c0_35 = arith.constant 0 : index
    %99 = vector.load %arg2[%c224, %c0_35] : memref<760x64xf32, #tpu.memory_space<vmem>>, vector<1x32xf32>
    %100 = vector.broadcast %99 : vector<1x32xf32> to vector<32x32xf32>
    %101 = arith.addf %98, %100 : vector<32x32xf32>
    %102 = tpu.iota {dimensions = array<i32: 0>} : vector<16x32xi32>
    %103 = tpu.iota {dimensions = array<i32: 1>} : vector<16x32xi32>
    %c2_i32_36 = arith.constant 2 : i32
    %104 = vector.broadcast %c2_i32_36 : i32 to vector<16x32xi32>
    %105 = arith.muli %104, %102 : vector<16x32xi32>
    %106 = arith.cmpi eq, %103, %105 : vector<16x32xi32>
    %107 = arith.extui %106 : vector<16x32xi1> to vector<16x32xi32>
    %108 = arith.sitofp %107 : vector<16x32xi32> to vector<16x32xf32>
    %c2_i32_37 = arith.constant 2 : i32
    %109 = vector.broadcast %c2_i32_37 : i32 to vector<16x32xi32>
    %110 = arith.muli %109, %102 : vector<16x32xi32>
    %c1_i32_38 = arith.constant 1 : i32
    %111 = vector.broadcast %c1_i32_38 : i32 to vector<16x32xi32>
    %112 = arith.addi %110, %111 : vector<16x32xi32>
    %113 = arith.cmpi eq, %103, %112 : vector<16x32xi32>
    %114 = arith.extui %113 : vector<16x32xi1> to vector<16x32xi32>
    %115 = arith.sitofp %114 : vector<16x32xi32> to vector<16x32xf32>
    %cst_39 = arith.constant dense<0.000000e+00> : vector<16x32xf32>
    %116 = tpu.matmul %108, %101, %cst_39 {dimension_numbers = #tpu.dot_dimension_numbers<[1], [0], [0], [1], [0, 0, 1, 1], [], []>} : vector<16x32xf32>, vector<32x32xf32>, vector<16x32xf32> -> vector<16x32xf32>
    %cst_40 = arith.constant dense<0.000000e+00> : vector<16x32xf32>
    %117 = tpu.matmul %115, %101, %cst_40 {dimension_numbers = #tpu.dot_dimension_numbers<[1], [0], [0], [1], [0, 0, 1, 1], [], []>} : vector<16x32xf32>, vector<32x32xf32>, vector<16x32xf32> -> vector<16x32xf32>
    %118 = arith.maximumf %116, %117 : vector<16x32xf32>
    %cst_41 = arith.constant 0.000000e+00 : f32
    %119 = vector.broadcast %cst_41 : f32 to vector<16x32xf32>
    %120 = arith.maximumf %118, %119 : vector<16x32xf32>
    %c264 = arith.constant 264 : index
    %c0_42 = arith.constant 0 : index
    %121 = vector.load %arg2[%c264, %c0_42] : memref<760x64xf32, #tpu.memory_space<vmem>>, vector<32x16xf32>
    %cst_43 = arith.constant dense<0.000000e+00> : vector<16x16xf32>
    %122 = tpu.matmul %120, %121, %cst_43 {dimension_numbers = #tpu.dot_dimension_numbers<[1], [0], [0], [1], [0, 0, 1, 1], [], []>} : vector<16x32xf32>, vector<32x16xf32>, vector<16x16xf32> -> vector<16x16xf32>
    %123 = tpu.iota {dimensions = array<i32: 0>} : vector<16x16xi32>
    %124 = tpu.iota {dimensions = array<i32: 1>} : vector<16x16xi32>
    %c-1_i32_44 = arith.constant -1 : i32
    %125 = vector.broadcast %c-1_i32_44 : i32 to vector<16x16xi32>
    %126 = arith.addi %123, %125 : vector<16x16xi32>
    %127 = arith.cmpi eq, %124, %126 : vector<16x16xi32>
    %c8_i32 = arith.constant 8 : i32
    %128 = vector.broadcast %c8_i32 : i32 to vector<16x16xi32>
    %129 = arith.cmpi slt, %123, %128 : vector<16x16xi32>
    %c8_i32_45 = arith.constant 8 : i32
    %130 = vector.broadcast %c8_i32_45 : i32 to vector<16x16xi32>
    %131 = arith.cmpi slt, %124, %130 : vector<16x16xi32>
    %132 = arith.xori %129, %131 : vector<16x16xi1>
    %cst_46 = arith.constant dense<true> : vector<16x16xi1>
    %133 = arith.xori %132, %cst_46 : vector<16x16xi1>
    %134 = arith.andi %127, %133 : vector<16x16xi1>
    %135 = arith.extui %134 : vector<16x16xi1> to vector<16x16xi32>
    %136 = arith.sitofp %135 : vector<16x16xi32> to vector<16x16xf32>
    %cst_47 = arith.constant dense<0.000000e+00> : vector<16x32xf32>
    %137 = tpu.matmul %136, %120, %cst_47 {dimension_numbers = #tpu.dot_dimension_numbers<[1], [0], [0], [1], [0, 0, 1, 1], [], []>} : vector<16x16xf32>, vector<16x32xf32>, vector<16x32xf32> -> vector<16x32xf32>
    %c232 = arith.constant 232 : index
    %c0_48 = arith.constant 0 : index
    %138 = vector.load %arg2[%c232, %c0_48] : memref<760x64xf32, #tpu.memory_space<vmem>>, vector<32x16xf32>
    %cst_49 = arith.constant dense<0.000000e+00> : vector<16x16xf32>
    %139 = tpu.matmul %137, %138, %cst_49 {dimension_numbers = #tpu.dot_dimension_numbers<[1], [0], [0], [1], [0, 0, 1, 1], [], []>} : vector<16x32xf32>, vector<32x16xf32>, vector<16x16xf32> -> vector<16x16xf32>
    %140 = arith.addf %122, %139 : vector<16x16xf32>
    %141 = tpu.iota {dimensions = array<i32: 0>} : vector<16x16xi32>
    %142 = tpu.iota {dimensions = array<i32: 1>} : vector<16x16xi32>
    %c1_i32_50 = arith.constant 1 : i32
    %143 = vector.broadcast %c1_i32_50 : i32 to vector<16x16xi32>
    %144 = arith.addi %141, %143 : vector<16x16xi32>
    %145 = arith.cmpi eq, %142, %144 : vector<16x16xi32>
    %c8_i32_51 = arith.constant 8 : i32
    %146 = vector.broadcast %c8_i32_51 : i32 to vector<16x16xi32>
    %147 = arith.cmpi slt, %141, %146 : vector<16x16xi32>
    %c8_i32_52 = arith.constant 8 : i32
    %148 = vector.broadcast %c8_i32_52 : i32 to vector<16x16xi32>
    %149 = arith.cmpi slt, %142, %148 : vector<16x16xi32>
    %150 = arith.xori %147, %149 : vector<16x16xi1>
    %cst_53 = arith.constant dense<true> : vector<16x16xi1>
    %151 = arith.xori %150, %cst_53 : vector<16x16xi1>
    %152 = arith.andi %145, %151 : vector<16x16xi1>
    %153 = arith.extui %152 : vector<16x16xi1> to vector<16x16xi32>
    %154 = arith.sitofp %153 : vector<16x16xi32> to vector<16x16xf32>
    %cst_54 = arith.constant dense<0.000000e+00> : vector<16x32xf32>
    %155 = tpu.matmul %154, %120, %cst_54 {dimension_numbers = #tpu.dot_dimension_numbers<[1], [0], [0], [1], [0, 0, 1, 1], [], []>} : vector<16x16xf32>, vector<16x32xf32>, vector<16x32xf32> -> vector<16x32xf32>
    %c296 = arith.constant 296 : index
    %c0_55 = arith.constant 0 : index
    %156 = vector.load %arg2[%c296, %c0_55] : memref<760x64xf32, #tpu.memory_space<vmem>>, vector<32x16xf32>
    %cst_56 = arith.constant dense<0.000000e+00> : vector<16x16xf32>
    %157 = tpu.matmul %155, %156, %cst_56 {dimension_numbers = #tpu.dot_dimension_numbers<[1], [0], [0], [1], [0, 0, 1, 1], [], []>} : vector<16x32xf32>, vector<32x16xf32>, vector<16x16xf32> -> vector<16x16xf32>
    %158 = arith.addf %140, %157 : vector<16x16xf32>
    %c328 = arith.constant 328 : index
    %c0_57 = arith.constant 0 : index
    %159 = vector.load %arg2[%c328, %c0_57] : memref<760x64xf32, #tpu.memory_space<vmem>>, vector<1x16xf32>
    %160 = vector.broadcast %159 : vector<1x16xf32> to vector<16x16xf32>
    %161 = arith.addf %158, %160 : vector<16x16xf32>
    %162 = tpu.iota {dimensions = array<i32: 0>} : vector<8x16xi32>
    %163 = tpu.iota {dimensions = array<i32: 1>} : vector<8x16xi32>
    %c2_i32_58 = arith.constant 2 : i32
    %164 = vector.broadcast %c2_i32_58 : i32 to vector<8x16xi32>
    %165 = arith.muli %164, %162 : vector<8x16xi32>
    %166 = arith.cmpi eq, %163, %165 : vector<8x16xi32>
    %167 = arith.extui %166 : vector<8x16xi1> to vector<8x16xi32>
    %168 = arith.sitofp %167 : vector<8x16xi32> to vector<8x16xf32>
    %c2_i32_59 = arith.constant 2 : i32
    %169 = vector.broadcast %c2_i32_59 : i32 to vector<8x16xi32>
    %170 = arith.muli %169, %162 : vector<8x16xi32>
    %c1_i32_60 = arith.constant 1 : i32
    %171 = vector.broadcast %c1_i32_60 : i32 to vector<8x16xi32>
    %172 = arith.addi %170, %171 : vector<8x16xi32>
    %173 = arith.cmpi eq, %163, %172 : vector<8x16xi32>
    %174 = arith.extui %173 : vector<8x16xi1> to vector<8x16xi32>
    %175 = arith.sitofp %174 : vector<8x16xi32> to vector<8x16xf32>
    %cst_61 = arith.constant dense<0.000000e+00> : vector<8x16xf32>
    %176 = tpu.matmul %168, %161, %cst_61 {dimension_numbers = #tpu.dot_dimension_numbers<[1], [0], [0], [1], [0, 0, 1, 1], [], []>} : vector<8x16xf32>, vector<16x16xf32>, vector<8x16xf32> -> vector<8x16xf32>
    %cst_62 = arith.constant dense<0.000000e+00> : vector<8x16xf32>
    %177 = tpu.matmul %175, %161, %cst_62 {dimension_numbers = #tpu.dot_dimension_numbers<[1], [0], [0], [1], [0, 0, 1, 1], [], []>} : vector<8x16xf32>, vector<16x16xf32>, vector<8x16xf32> -> vector<8x16xf32>
    %178 = arith.maximumf %176, %177 : vector<8x16xf32>
    %cst_63 = arith.constant 0.000000e+00 : f32
    %179 = vector.broadcast %cst_63 : f32 to vector<8x16xf32>
    %180 = arith.maximumf %178, %179 : vector<8x16xf32>
    %c352 = arith.constant 352 : index
    %c0_64 = arith.constant 0 : index
    %181 = vector.load %arg2[%c352, %c0_64] : memref<760x64xf32, #tpu.memory_space<vmem>>, vector<16x8xf32>
    %cst_65 = arith.constant dense<0.000000e+00> : vector<8x8xf32>
    %182 = tpu.matmul %180, %181, %cst_65 {dimension_numbers = #tpu.dot_dimension_numbers<[1], [0], [0], [1], [0, 0, 1, 1], [], []>} : vector<8x16xf32>, vector<16x8xf32>, vector<8x8xf32> -> vector<8x8xf32>
    %183 = tpu.iota {dimensions = array<i32: 0>} : vector<8x8xi32>
    %184 = tpu.iota {dimensions = array<i32: 1>} : vector<8x8xi32>
    %c-1_i32_66 = arith.constant -1 : i32
    %185 = vector.broadcast %c-1_i32_66 : i32 to vector<8x8xi32>
    %186 = arith.addi %183, %185 : vector<8x8xi32>
    %187 = arith.cmpi eq, %184, %186 : vector<8x8xi32>
    %c4_i32 = arith.constant 4 : i32
    %188 = vector.broadcast %c4_i32 : i32 to vector<8x8xi32>
    %189 = arith.cmpi slt, %183, %188 : vector<8x8xi32>
    %c4_i32_67 = arith.constant 4 : i32
    %190 = vector.broadcast %c4_i32_67 : i32 to vector<8x8xi32>
    %191 = arith.cmpi slt, %184, %190 : vector<8x8xi32>
    %192 = arith.xori %189, %191 : vector<8x8xi1>
    %cst_68 = arith.constant dense<true> : vector<8x8xi1>
    %193 = arith.xori %192, %cst_68 : vector<8x8xi1>
    %194 = arith.andi %187, %193 : vector<8x8xi1>
    %195 = arith.extui %194 : vector<8x8xi1> to vector<8x8xi32>
    %196 = arith.sitofp %195 : vector<8x8xi32> to vector<8x8xf32>
    %cst_69 = arith.constant dense<0.000000e+00> : vector<8x16xf32>
    %197 = tpu.matmul %196, %180, %cst_69 {dimension_numbers = #tpu.dot_dimension_numbers<[1], [0], [0], [1], [0, 0, 1, 1], [], []>} : vector<8x8xf32>, vector<8x16xf32>, vector<8x16xf32> -> vector<8x16xf32>
    %c336 = arith.constant 336 : index
    %c0_70 = arith.constant 0 : index
    %198 = vector.load %arg2[%c336, %c0_70] : memref<760x64xf32, #tpu.memory_space<vmem>>, vector<16x8xf32>
    %cst_71 = arith.constant dense<0.000000e+00> : vector<8x8xf32>
    %199 = tpu.matmul %197, %198, %cst_71 {dimension_numbers = #tpu.dot_dimension_numbers<[1], [0], [0], [1], [0, 0, 1, 1], [], []>} : vector<8x16xf32>, vector<16x8xf32>, vector<8x8xf32> -> vector<8x8xf32>
    %200 = arith.addf %182, %199 : vector<8x8xf32>
    %201 = tpu.iota {dimensions = array<i32: 0>} : vector<8x8xi32>
    %202 = tpu.iota {dimensions = array<i32: 1>} : vector<8x8xi32>
    %c1_i32_72 = arith.constant 1 : i32
    %203 = vector.broadcast %c1_i32_72 : i32 to vector<8x8xi32>
    %204 = arith.addi %201, %203 : vector<8x8xi32>
    %205 = arith.cmpi eq, %202, %204 : vector<8x8xi32>
    %c4_i32_73 = arith.constant 4 : i32
    %206 = vector.broadcast %c4_i32_73 : i32 to vector<8x8xi32>
    %207 = arith.cmpi slt, %201, %206 : vector<8x8xi32>
    %c4_i32_74 = arith.constant 4 : i32
    %208 = vector.broadcast %c4_i32_74 : i32 to vector<8x8xi32>
    %209 = arith.cmpi slt, %202, %208 : vector<8x8xi32>
    %210 = arith.xori %207, %209 : vector<8x8xi1>
    %cst_75 = arith.constant dense<true> : vector<8x8xi1>
    %211 = arith.xori %210, %cst_75 : vector<8x8xi1>
    %212 = arith.andi %205, %211 : vector<8x8xi1>
    %213 = arith.extui %212 : vector<8x8xi1> to vector<8x8xi32>
    %214 = arith.sitofp %213 : vector<8x8xi32> to vector<8x8xf32>
    %cst_76 = arith.constant dense<0.000000e+00> : vector<8x16xf32>
    %215 = tpu.matmul %214, %180, %cst_76 {dimension_numbers = #tpu.dot_dimension_numbers<[1], [0], [0], [1], [0, 0, 1, 1], [], []>} : vector<8x8xf32>, vector<8x16xf32>, vector<8x16xf32> -> vector<8x16xf32>
    %c368 = arith.constant 368 : index
    %c0_77 = arith.constant 0 : index
    %216 = vector.load %arg2[%c368, %c0_77] : memref<760x64xf32, #tpu.memory_space<vmem>>, vector<16x8xf32>
    %cst_78 = arith.constant dense<0.000000e+00> : vector<8x8xf32>
    %217 = tpu.matmul %215, %216, %cst_78 {dimension_numbers = #tpu.dot_dimension_numbers<[1], [0], [0], [1], [0, 0, 1, 1], [], []>} : vector<8x16xf32>, vector<16x8xf32>, vector<8x8xf32> -> vector<8x8xf32>
    %218 = arith.addf %200, %217 : vector<8x8xf32>
    %c384 = arith.constant 384 : index
    %c0_79 = arith.constant 0 : index
    %219 = vector.load %arg2[%c384, %c0_79] : memref<760x64xf32, #tpu.memory_space<vmem>>, vector<1x8xf32>
    %220 = vector.broadcast %219 : vector<1x8xf32> to vector<8x8xf32>
    %221 = arith.addf %218, %220 : vector<8x8xf32>
    %222 = tpu.iota {dimensions = array<i32: 0>} : vector<4x8xi32>
    %223 = tpu.iota {dimensions = array<i32: 1>} : vector<4x8xi32>
    %c2_i32_80 = arith.constant 2 : i32
    %224 = vector.broadcast %c2_i32_80 : i32 to vector<4x8xi32>
    %225 = arith.muli %224, %222 : vector<4x8xi32>
    %226 = arith.cmpi eq, %223, %225 : vector<4x8xi32>
    %227 = arith.extui %226 : vector<4x8xi1> to vector<4x8xi32>
    %228 = arith.sitofp %227 : vector<4x8xi32> to vector<4x8xf32>
    %c2_i32_81 = arith.constant 2 : i32
    %229 = vector.broadcast %c2_i32_81 : i32 to vector<4x8xi32>
    %230 = arith.muli %229, %222 : vector<4x8xi32>
    %c1_i32_82 = arith.constant 1 : i32
    %231 = vector.broadcast %c1_i32_82 : i32 to vector<4x8xi32>
    %232 = arith.addi %230, %231 : vector<4x8xi32>
    %233 = arith.cmpi eq, %223, %232 : vector<4x8xi32>
    %234 = arith.extui %233 : vector<4x8xi1> to vector<4x8xi32>
    %235 = arith.sitofp %234 : vector<4x8xi32> to vector<4x8xf32>
    %cst_83 = arith.constant dense<0.000000e+00> : vector<4x8xf32>
    %236 = tpu.matmul %228, %221, %cst_83 {dimension_numbers = #tpu.dot_dimension_numbers<[1], [0], [0], [1], [0, 0, 1, 1], [], []>} : vector<4x8xf32>, vector<8x8xf32>, vector<4x8xf32> -> vector<4x8xf32>
    %cst_84 = arith.constant dense<0.000000e+00> : vector<4x8xf32>
    %237 = tpu.matmul %235, %221, %cst_84 {dimension_numbers = #tpu.dot_dimension_numbers<[1], [0], [0], [1], [0, 0, 1, 1], [], []>} : vector<4x8xf32>, vector<8x8xf32>, vector<4x8xf32> -> vector<4x8xf32>
    %238 = arith.maximumf %236, %237 : vector<4x8xf32>
    %cst_85 = arith.constant 0.000000e+00 : f32
    %239 = vector.broadcast %cst_85 : f32 to vector<4x8xf32>
    %240 = arith.maximumf %238, %239 : vector<4x8xf32>
    %241 = tpu.iota {dimensions = array<i32: 0>} : vector<8x4xi32>
    %242 = tpu.iota {dimensions = array<i32: 1>} : vector<8x4xi32>
    %c2_i32_86 = arith.constant 2 : i32
    %243 = vector.broadcast %c2_i32_86 : i32 to vector<8x4xi32>
    %244 = arith.muli %243, %242 : vector<8x4xi32>
    %c392 = arith.constant 392 : index
    %c0_87 = arith.constant 0 : index
    %245 = vector.load %arg2[%c392, %c0_87] : memref<760x64xf32, #tpu.memory_space<vmem>>, vector<8x8xf32>
    %cst_88 = arith.constant dense<0.000000e+00> : vector<4x8xf32>
    %246 = tpu.matmul %240, %245, %cst_88 {dimension_numbers = #tpu.dot_dimension_numbers<[1], [0], [0], [1], [0, 0, 1, 1], [], []>} : vector<4x8xf32>, vector<8x8xf32>, vector<4x8xf32> -> vector<4x8xf32>
    %c0_i32 = arith.constant 0 : i32
    %247 = vector.broadcast %c0_i32 : i32 to vector<8x4xi32>
    %248 = arith.addi %244, %247 : vector<8x4xi32>
    %249 = arith.cmpi eq, %241, %248 : vector<8x4xi32>
    %250 = arith.extui %249 : vector<8x4xi1> to vector<8x4xi32>
    %251 = arith.sitofp %250 : vector<8x4xi32> to vector<8x4xf32>
    %cst_89 = arith.constant dense<0.000000e+00> : vector<8x8xf32>
    %252 = tpu.matmul %251, %246, %cst_89 {dimension_numbers = #tpu.dot_dimension_numbers<[1], [0], [0], [1], [0, 0, 1, 1], [], []>} : vector<8x4xf32>, vector<4x8xf32>, vector<8x8xf32> -> vector<8x8xf32>
    %c400 = arith.constant 400 : index
    %c0_90 = arith.constant 0 : index
    %253 = vector.load %arg2[%c400, %c0_90] : memref<760x64xf32, #tpu.memory_space<vmem>>, vector<8x8xf32>
    %cst_91 = arith.constant dense<0.000000e+00> : vector<4x8xf32>
    %254 = tpu.matmul %240, %253, %cst_91 {dimension_numbers = #tpu.dot_dimension_numbers<[1], [0], [0], [1], [0, 0, 1, 1], [], []>} : vector<4x8xf32>, vector<8x8xf32>, vector<4x8xf32> -> vector<4x8xf32>
    %c1_i32_92 = arith.constant 1 : i32
    %255 = vector.broadcast %c1_i32_92 : i32 to vector<8x4xi32>
    %256 = arith.addi %244, %255 : vector<8x4xi32>
    %257 = arith.cmpi eq, %241, %256 : vector<8x4xi32>
    %258 = arith.extui %257 : vector<8x4xi1> to vector<8x4xi32>
    %259 = arith.sitofp %258 : vector<8x4xi32> to vector<8x4xf32>
    %cst_93 = arith.constant dense<0.000000e+00> : vector<8x8xf32>
    %260 = tpu.matmul %259, %254, %cst_93 {dimension_numbers = #tpu.dot_dimension_numbers<[1], [0], [0], [1], [0, 0, 1, 1], [], []>} : vector<8x4xf32>, vector<4x8xf32>, vector<8x8xf32> -> vector<8x8xf32>
    %261 = arith.addf %252, %260 : vector<8x8xf32>
    %c408 = arith.constant 408 : index
    %c0_94 = arith.constant 0 : index
    %262 = vector.load %arg2[%c408, %c0_94] : memref<760x64xf32, #tpu.memory_space<vmem>>, vector<1x8xf32>
    %263 = vector.broadcast %262 : vector<1x8xf32> to vector<8x8xf32>
    %264 = arith.addf %261, %263 : vector<8x8xf32>
    %cst_95 = arith.constant 0.000000e+00 : f32
    %265 = vector.broadcast %cst_95 : f32 to vector<8x8xf32>
    %266 = arith.maximumf %264, %265 : vector<8x8xf32>
    %267 = tpu.iota {dimensions = array<i32: 0>} : vector<18x8xi32>
    %268 = tpu.iota {dimensions = array<i32: 1>} : vector<18x8xi32>
    %c2_i32_96 = arith.constant 2 : i32
    %269 = vector.broadcast %c2_i32_96 : i32 to vector<18x8xi32>
    %270 = arith.muli %269, %268 : vector<18x8xi32>
    %c4_i32_97 = arith.constant 4 : i32
    %271 = vector.broadcast %c4_i32_97 : i32 to vector<18x8xi32>
    %272 = arith.cmpi sge, %268, %271 : vector<18x8xi32>
    %273 = arith.extui %272 : vector<18x8xi1> to vector<18x8xi32>
    %c1_i32_98 = arith.constant 1 : i32
    %274 = vector.broadcast %c1_i32_98 : i32 to vector<18x8xi32>
    %275 = arith.muli %274, %273 : vector<18x8xi32>
    %276 = arith.addi %270, %275 : vector<18x8xi32>
    %c416 = arith.constant 416 : index
    %c0_99 = arith.constant 0 : index
    %277 = vector.load %arg2[%c416, %c0_99] : memref<760x64xf32, #tpu.memory_space<vmem>>, vector<8x16xf32>
    %cst_100 = arith.constant dense<0.000000e+00> : vector<8x16xf32>
    %278 = tpu.matmul %266, %277, %cst_100 {dimension_numbers = #tpu.dot_dimension_numbers<[1], [0], [0], [1], [0, 0, 1, 1], [], []>} : vector<8x8xf32>, vector<8x16xf32>, vector<8x16xf32> -> vector<8x16xf32>
    %c0_i32_101 = arith.constant 0 : i32
    %279 = vector.broadcast %c0_i32_101 : i32 to vector<18x8xi32>
    %280 = arith.addi %276, %279 : vector<18x8xi32>
    %281 = arith.cmpi eq, %267, %280 : vector<18x8xi32>
    %282 = arith.extui %281 : vector<18x8xi1> to vector<18x8xi32>
    %283 = arith.sitofp %282 : vector<18x8xi32> to vector<18x8xf32>
    %cst_102 = arith.constant dense<0.000000e+00> : vector<18x16xf32>
    %284 = tpu.matmul %283, %278, %cst_102 {dimension_numbers = #tpu.dot_dimension_numbers<[1], [0], [0], [1], [0, 0, 1, 1], [], []>} : vector<18x8xf32>, vector<8x16xf32>, vector<18x16xf32> -> vector<18x16xf32>
    %c424 = arith.constant 424 : index
    %c0_103 = arith.constant 0 : index
    %285 = vector.load %arg2[%c424, %c0_103] : memref<760x64xf32, #tpu.memory_space<vmem>>, vector<8x16xf32>
    %cst_104 = arith.constant dense<0.000000e+00> : vector<8x16xf32>
    %286 = tpu.matmul %266, %285, %cst_104 {dimension_numbers = #tpu.dot_dimension_numbers<[1], [0], [0], [1], [0, 0, 1, 1], [], []>} : vector<8x8xf32>, vector<8x16xf32>, vector<8x16xf32> -> vector<8x16xf32>
    %c1_i32_105 = arith.constant 1 : i32
    %287 = vector.broadcast %c1_i32_105 : i32 to vector<18x8xi32>
    %288 = arith.addi %276, %287 : vector<18x8xi32>
    %289 = arith.cmpi eq, %267, %288 : vector<18x8xi32>
    %290 = arith.extui %289 : vector<18x8xi1> to vector<18x8xi32>
    %291 = arith.sitofp %290 : vector<18x8xi32> to vector<18x8xf32>
    %cst_106 = arith.constant dense<0.000000e+00> : vector<18x16xf32>
    %292 = tpu.matmul %291, %286, %cst_106 {dimension_numbers = #tpu.dot_dimension_numbers<[1], [0], [0], [1], [0, 0, 1, 1], [], []>} : vector<18x8xf32>, vector<8x16xf32>, vector<18x16xf32> -> vector<18x16xf32>
    %293 = arith.addf %284, %292 : vector<18x16xf32>
    %c432 = arith.constant 432 : index
    %c0_107 = arith.constant 0 : index
    %294 = vector.load %arg2[%c432, %c0_107] : memref<760x64xf32, #tpu.memory_space<vmem>>, vector<8x16xf32>
    %cst_108 = arith.constant dense<0.000000e+00> : vector<8x16xf32>
    %295 = tpu.matmul %266, %294, %cst_108 {dimension_numbers = #tpu.dot_dimension_numbers<[1], [0], [0], [1], [0, 0, 1, 1], [], []>} : vector<8x8xf32>, vector<8x16xf32>, vector<8x16xf32> -> vector<8x16xf32>
    %c2_i32_109 = arith.constant 2 : i32
    %296 = vector.broadcast %c2_i32_109 : i32 to vector<18x8xi32>
    %297 = arith.addi %276, %296 : vector<18x8xi32>
    %298 = arith.cmpi eq, %267, %297 : vector<18x8xi32>
    %299 = arith.extui %298 : vector<18x8xi1> to vector<18x8xi32>
    %300 = arith.sitofp %299 : vector<18x8xi32> to vector<18x8xf32>
    %cst_110 = arith.constant dense<0.000000e+00> : vector<18x16xf32>
    %301 = tpu.matmul %300, %295, %cst_110 {dimension_numbers = #tpu.dot_dimension_numbers<[1], [0], [0], [1], [0, 0, 1, 1], [], []>} : vector<18x8xf32>, vector<8x16xf32>, vector<18x16xf32> -> vector<18x16xf32>
    %302 = arith.addf %293, %301 : vector<18x16xf32>
    %c440 = arith.constant 440 : index
    %c0_111 = arith.constant 0 : index
    %303 = vector.load %arg2[%c440, %c0_111] : memref<760x64xf32, #tpu.memory_space<vmem>>, vector<1x16xf32>
    %304 = vector.broadcast %303 : vector<1x16xf32> to vector<18x16xf32>
    %305 = arith.addf %302, %304 : vector<18x16xf32>
    %cst_112 = arith.constant 0.000000e+00 : f32
    %306 = vector.broadcast %cst_112 : f32 to vector<18x16xf32>
    %307 = arith.maximumf %305, %306 : vector<18x16xf32>
    %308 = tpu.iota {dimensions = array<i32: 0>} : vector<36x18xi32>
    %309 = tpu.iota {dimensions = array<i32: 1>} : vector<36x18xi32>
    %c2_i32_113 = arith.constant 2 : i32
    %310 = vector.broadcast %c2_i32_113 : i32 to vector<36x18xi32>
    %311 = arith.muli %310, %309 : vector<36x18xi32>
    %c448 = arith.constant 448 : index
    %c0_114 = arith.constant 0 : index
    %312 = vector.load %arg2[%c448, %c0_114] : memref<760x64xf32, #tpu.memory_space<vmem>>, vector<16x32xf32>
    %cst_115 = arith.constant dense<0.000000e+00> : vector<18x32xf32>
    %313 = tpu.matmul %307, %312, %cst_115 {dimension_numbers = #tpu.dot_dimension_numbers<[1], [0], [0], [1], [0, 0, 1, 1], [], []>} : vector<18x16xf32>, vector<16x32xf32>, vector<18x32xf32> -> vector<18x32xf32>
    %c0_i32_116 = arith.constant 0 : i32
    %314 = vector.broadcast %c0_i32_116 : i32 to vector<36x18xi32>
    %315 = arith.addi %311, %314 : vector<36x18xi32>
    %316 = arith.cmpi eq, %308, %315 : vector<36x18xi32>
    %317 = arith.extui %316 : vector<36x18xi1> to vector<36x18xi32>
    %318 = arith.sitofp %317 : vector<36x18xi32> to vector<36x18xf32>
    %cst_117 = arith.constant dense<0.000000e+00> : vector<36x32xf32>
    %319 = tpu.matmul %318, %313, %cst_117 {dimension_numbers = #tpu.dot_dimension_numbers<[1], [0], [0], [1], [0, 0, 1, 1], [], []>} : vector<36x18xf32>, vector<18x32xf32>, vector<36x32xf32> -> vector<36x32xf32>
    %c464 = arith.constant 464 : index
    %c0_118 = arith.constant 0 : index
    %320 = vector.load %arg2[%c464, %c0_118] : memref<760x64xf32, #tpu.memory_space<vmem>>, vector<16x32xf32>
    %cst_119 = arith.constant dense<0.000000e+00> : vector<18x32xf32>
    %321 = tpu.matmul %307, %320, %cst_119 {dimension_numbers = #tpu.dot_dimension_numbers<[1], [0], [0], [1], [0, 0, 1, 1], [], []>} : vector<18x16xf32>, vector<16x32xf32>, vector<18x32xf32> -> vector<18x32xf32>
    %c1_i32_120 = arith.constant 1 : i32
    %322 = vector.broadcast %c1_i32_120 : i32 to vector<36x18xi32>
    %323 = arith.addi %311, %322 : vector<36x18xi32>
    %324 = arith.cmpi eq, %308, %323 : vector<36x18xi32>
    %325 = arith.extui %324 : vector<36x18xi1> to vector<36x18xi32>
    %326 = arith.sitofp %325 : vector<36x18xi32> to vector<36x18xf32>
    %cst_121 = arith.constant dense<0.000000e+00> : vector<36x32xf32>
    %327 = tpu.matmul %326, %321, %cst_121 {dimension_numbers = #tpu.dot_dimension_numbers<[1], [0], [0], [1], [0, 0, 1, 1], [], []>} : vector<36x18xf32>, vector<18x32xf32>, vector<36x32xf32> -> vector<36x32xf32>
    %328 = arith.addf %319, %327 : vector<36x32xf32>
    %c480 = arith.constant 480 : index
    %c0_122 = arith.constant 0 : index
    %329 = vector.load %arg2[%c480, %c0_122] : memref<760x64xf32, #tpu.memory_space<vmem>>, vector<1x32xf32>
    %330 = vector.broadcast %329 : vector<1x32xf32> to vector<36x32xf32>
    %331 = arith.addf %328, %330 : vector<36x32xf32>
    %cst_123 = arith.constant 0.000000e+00 : f32
    %332 = vector.broadcast %cst_123 : f32 to vector<36x32xf32>
    %333 = arith.maximumf %331, %332 : vector<36x32xf32>
    %334 = tpu.iota {dimensions = array<i32: 0>} : vector<72x36xi32>
    %335 = tpu.iota {dimensions = array<i32: 1>} : vector<72x36xi32>
    %c2_i32_124 = arith.constant 2 : i32
    %336 = vector.broadcast %c2_i32_124 : i32 to vector<72x36xi32>
    %337 = arith.muli %336, %335 : vector<72x36xi32>
    %c488 = arith.constant 488 : index
    %c0_125 = arith.constant 0 : index
    %338 = vector.load %arg2[%c488, %c0_125] : memref<760x64xf32, #tpu.memory_space<vmem>>, vector<32x64xf32>
    %cst_126 = arith.constant dense<0.000000e+00> : vector<36x64xf32>
    %339 = tpu.matmul %333, %338, %cst_126 {dimension_numbers = #tpu.dot_dimension_numbers<[1], [0], [0], [1], [0, 0, 1, 1], [], []>} : vector<36x32xf32>, vector<32x64xf32>, vector<36x64xf32> -> vector<36x64xf32>
    %c0_i32_127 = arith.constant 0 : i32
    %340 = vector.broadcast %c0_i32_127 : i32 to vector<72x36xi32>
    %341 = arith.addi %337, %340 : vector<72x36xi32>
    %342 = arith.cmpi eq, %334, %341 : vector<72x36xi32>
    %343 = arith.extui %342 : vector<72x36xi1> to vector<72x36xi32>
    %344 = arith.sitofp %343 : vector<72x36xi32> to vector<72x36xf32>
    %cst_128 = arith.constant dense<0.000000e+00> : vector<72x64xf32>
    %345 = tpu.matmul %344, %339, %cst_128 {dimension_numbers = #tpu.dot_dimension_numbers<[1], [0], [0], [1], [0, 0, 1, 1], [], []>} : vector<72x36xf32>, vector<36x64xf32>, vector<72x64xf32> -> vector<72x64xf32>
    %c520 = arith.constant 520 : index
    %c0_129 = arith.constant 0 : index
    %346 = vector.load %arg2[%c520, %c0_129] : memref<760x64xf32, #tpu.memory_space<vmem>>, vector<32x64xf32>
    %cst_130 = arith.constant dense<0.000000e+00> : vector<36x64xf32>
    %347 = tpu.matmul %333, %346, %cst_130 {dimension_numbers = #tpu.dot_dimension_numbers<[1], [0], [0], [1], [0, 0, 1, 1], [], []>} : vector<36x32xf32>, vector<32x64xf32>, vector<36x64xf32> -> vector<36x64xf32>
    %c1_i32_131 = arith.constant 1 : i32
    %348 = vector.broadcast %c1_i32_131 : i32 to vector<72x36xi32>
    %349 = arith.addi %337, %348 : vector<72x36xi32>
    %350 = arith.cmpi eq, %334, %349 : vector<72x36xi32>
    %351 = arith.extui %350 : vector<72x36xi1> to vector<72x36xi32>
    %352 = arith.sitofp %351 : vector<72x36xi32> to vector<72x36xf32>
    %cst_132 = arith.constant dense<0.000000e+00> : vector<72x64xf32>
    %353 = tpu.matmul %352, %347, %cst_132 {dimension_numbers = #tpu.dot_dimension_numbers<[1], [0], [0], [1], [0, 0, 1, 1], [], []>} : vector<72x36xf32>, vector<36x64xf32>, vector<72x64xf32> -> vector<72x64xf32>
    %354 = arith.addf %345, %353 : vector<72x64xf32>
    %c552 = arith.constant 552 : index
    %c0_133 = arith.constant 0 : index
    %355 = vector.load %arg2[%c552, %c0_133] : memref<760x64xf32, #tpu.memory_space<vmem>>, vector<1x64xf32>
    %356 = vector.broadcast %355 : vector<1x64xf32> to vector<72x64xf32>
    %357 = arith.addf %354, %356 : vector<72x64xf32>
    %cst_134 = arith.constant 0.000000e+00 : f32
    %358 = vector.broadcast %cst_134 : f32 to vector<72x64xf32>
    %359 = arith.maximumf %357, %358 : vector<72x64xf32>
    %360 = tpu.iota {dimensions = array<i32: 0>} : vector<72x72xi32>
    %361 = tpu.iota {dimensions = array<i32: 1>} : vector<72x72xi32>
    %c560 = arith.constant 560 : index
    %c0_135 = arith.constant 0 : index
    %362 = vector.load %arg2[%c560, %c0_135] : memref<760x64xf32, #tpu.memory_space<vmem>>, vector<64x8xf32>
    %cst_136 = arith.constant dense<0.000000e+00> : vector<72x8xf32>
    %363 = tpu.matmul %359, %362, %cst_136 {dimension_numbers = #tpu.dot_dimension_numbers<[1], [0], [0], [1], [0, 0, 1, 1], [], []>} : vector<72x64xf32>, vector<64x8xf32>, vector<72x8xf32> -> vector<72x8xf32>
    %c1_i32_137 = arith.constant 1 : i32
    %364 = vector.broadcast %c1_i32_137 : i32 to vector<72x72xi32>
    %365 = arith.addi %360, %364 : vector<72x72xi32>
    %366 = arith.cmpi eq, %361, %365 : vector<72x72xi32>
    %367 = arith.extui %366 : vector<72x72xi1> to vector<72x72xi32>
    %368 = arith.sitofp %367 : vector<72x72xi32> to vector<72x72xf32>
    %cst_138 = arith.constant dense<0.000000e+00> : vector<72x64xf32>
    %369 = tpu.matmul %368, %359, %cst_138 {dimension_numbers = #tpu.dot_dimension_numbers<[1], [0], [0], [1], [0, 0, 1, 1], [], []>} : vector<72x72xf32>, vector<72x64xf32>, vector<72x64xf32> -> vector<72x64xf32>
    %c624 = arith.constant 624 : index
    %c0_139 = arith.constant 0 : index
    %370 = vector.load %arg2[%c624, %c0_139] : memref<760x64xf32, #tpu.memory_space<vmem>>, vector<64x8xf32>
    %cst_140 = arith.constant dense<0.000000e+00> : vector<72x8xf32>
    %371 = tpu.matmul %369, %370, %cst_140 {dimension_numbers = #tpu.dot_dimension_numbers<[1], [0], [0], [1], [0, 0, 1, 1], [], []>} : vector<72x64xf32>, vector<64x8xf32>, vector<72x8xf32> -> vector<72x8xf32>
    %372 = arith.addf %363, %371 : vector<72x8xf32>
    %c2_i32_141 = arith.constant 2 : i32
    %373 = vector.broadcast %c2_i32_141 : i32 to vector<72x72xi32>
    %374 = arith.addi %360, %373 : vector<72x72xi32>
    %375 = arith.cmpi eq, %361, %374 : vector<72x72xi32>
    %376 = arith.extui %375 : vector<72x72xi1> to vector<72x72xi32>
    %377 = arith.sitofp %376 : vector<72x72xi32> to vector<72x72xf32>
    %cst_142 = arith.constant dense<0.000000e+00> : vector<72x64xf32>
    %378 = tpu.matmul %377, %359, %cst_142 {dimension_numbers = #tpu.dot_dimension_numbers<[1], [0], [0], [1], [0, 0, 1, 1], [], []>} : vector<72x72xf32>, vector<72x64xf32>, vector<72x64xf32> -> vector<72x64xf32>
    %c688 = arith.constant 688 : index
    %c0_143 = arith.constant 0 : index
    %379 = vector.load %arg2[%c688, %c0_143] : memref<760x64xf32, #tpu.memory_space<vmem>>, vector<64x8xf32>
    %cst_144 = arith.constant dense<0.000000e+00> : vector<72x8xf32>
    %380 = tpu.matmul %378, %379, %cst_144 {dimension_numbers = #tpu.dot_dimension_numbers<[1], [0], [0], [1], [0, 0, 1, 1], [], []>} : vector<72x64xf32>, vector<64x8xf32>, vector<72x8xf32> -> vector<72x8xf32>
    %381 = arith.addf %372, %380 : vector<72x8xf32>
    %c752 = arith.constant 752 : index
    %c0_145 = arith.constant 0 : index
    %382 = vector.load %arg2[%c752, %c0_145] : memref<760x64xf32, #tpu.memory_space<vmem>>, vector<1x8xf32>
    %383 = vector.broadcast %382 : vector<1x8xf32> to vector<72x8xf32>
    %384 = arith.addf %381, %383 : vector<72x8xf32>
    %385 = arith.negf %384 : vector<72x8xf32>
    %386 = math.exp %385 : vector<72x8xf32>
    %cst_146 = arith.constant 1.000000e+00 : f32
    %387 = vector.broadcast %cst_146 : f32 to vector<72x8xf32>
    %388 = arith.addf %387, %386 : vector<72x8xf32>
    %389 = arith.divf %387, %388 : vector<72x8xf32>
    %390 = vector.extract_strided_slice %389 {offsets = [0, 0], sizes = [34, 8], strides = [1, 1]} : vector<72x8xf32> to vector<34x8xf32>
    %c0_147 = arith.constant 0 : index
    %c0_148 = arith.constant 0 : index
    %c0_149 = arith.constant 0 : index
    %391 = vector.load %arg3[%c0_147, %c0_148, %c0_149] : memref<2x34x8xf32, #tpu.memory_space<vmem>>, vector<1x34x8xf32>
    %392 = vector.shape_cast %391 : vector<1x34x8xf32> to vector<34x8xf32>
    %393 = vector.shape_cast %390 : vector<34x8xf32> to vector<1x34x8xf32>
    tpu.vector_store %arg3[%c0_147, %c0_148, %c0_149], %393 {strides = array<i32>} : memref<2x34x8xf32, #tpu.memory_space<vmem>>, vector<1x34x8xf32>,
    %394 = vector.extract_strided_slice %389 {offsets = [36, 0], sizes = [34, 8], strides = [1, 1]} : vector<72x8xf32> to vector<34x8xf32>
    %c1 = arith.constant 1 : index
    %c0_150 = arith.constant 0 : index
    %c0_151 = arith.constant 0 : index
    %395 = vector.load %arg3[%c1, %c0_150, %c0_151] : memref<2x34x8xf32, #tpu.memory_space<vmem>>, vector<1x34x8xf32>
    %396 = vector.shape_cast %395 : vector<1x34x8xf32> to vector<34x8xf32>
    %397 = vector.shape_cast %394 : vector<34x8xf32> to vector<1x34x8xf32>
    tpu.vector_store %arg3[%c1, %c0_150, %c0_151], %397 {strides = array<i32>} : memref<2x34x8xf32, #tpu.memory_space<vmem>>, vector<1x34x8xf32>,
    return
  }
  func.func @transform_0(%arg0: i32) -> (i32, i32) {
    %c0_i32 = arith.constant 0 : i32
    %c0_i32_0 = arith.constant 0 : i32
    %c0_i32_1 = arith.constant 0 : i32
    return %c0_i32, %c0_i32_0 : i32, i32
  }
  func.func @transform_1(%arg0: i32) -> (i32, i32) {
    %c0_i32 = arith.constant 0 : i32
    %c0_i32_0 = arith.constant 0 : i32
    %c0_i32_1 = arith.constant 0 : i32
    return %c0_i32, %c0_i32_0 : i32, i32
  }
  func.func @transform_2(%arg0: i32) -> (i32, i32, i32) {
    %c0_i32 = arith.constant 0 : i32
    %c0_i32_0 = arith.constant 0 : i32
    %c0_i32_1 = arith.constant 0 : i32
    %c0_i32_2 = arith.constant 0 : i32
    return %c0_i32, %c0_i32_0, %c0_i32_1 : i32, i32, i32
  }
}

</mosaic_0001>

<bundles_post_ra>
// kernel: autoencoder_forward.1
= control target key start
LH: loop header
LB: loop body
LE: loop exit
PB: predicated region body
PF: predicated region fallthrough
CT: control target
= control target key end

     0   :  { %v20_v0 = vlaneseq  ;;  %vm7106_vm1 = vmmov 1   ;;  %vm96_vm3 = vcmask 523264   ;;  %v7107_v16 = vmov 0.0   ;;  %s8723_s0 = inlined_call_operand.vmem [shape: f32[64,8], index: 0, kind: input, shape index: {}]   ;;  %s8724_s1 = inlined_call_operand.vmem [shape: f32[760,64], index: 1, kind: input, shape index: {}]   ;;  %s8725_s2 = inlined_call_operand.vmem [shape: f32[2,34,8], index: 2, kind: output, shape index: {}]  }
   0x1   :  { %v7128_v1 = vld [vmem:[%s8723_s0 + $0x38] sm:$0xff]  ;;  %v7133_v2 = vld [vmem:[%s8723_s0 + $0x30] sm:$0xff]  ;;  %v7144_v5 = vld [vmem:[%s8723_s0 + $0x28] sm:$0xff] }
   0x2   :  { %6231 = vmatprep.subr.mxu0 %v7128_v1  ;;  %v7136_v3 = vshrl.u32 %v20_v0, 7  ;;  %v7138_v4 = vand.u32 127, %v20_v0  ;;  %v7161_v9 = vld [vmem:[%s8723_s0 + $0x20] sm:$0xff]  ;;  %v7190_v15 = vld [vmem:[%s8723_s0 + $0x18] sm:$0xff]  ;;  %v7203_v18 = vld [vmem:[%s8723_s0 + $0x10] sm:$0xff] }
   0x3   :  { %6232 = vmatpush3.msra.mxu0 %v7128_v1  ;;  %v7225_v23 = vld [vmem:[%s8723_s0 + $0x8] sm:$0xff]  ;;  %v7237_v24 = vld [vmem:[%s8723_s0] sm:$0xff]  ;;  %v655_v58 = vld [vmem:[%s8724_s1 + $0x10] sm:$0xff] }
   0x4   :  { %6233 = vmatprep.subr.mxu0 %v7133_v2  ;;  %v7148_v6 = vadd.s32 4294967295, %v7136_v3  ;;  %vm55_vm0 = vcmp.lt.s32.totalorder %v7138_v4, 32  ;;  %v7152_v7 = vadd.s32 8, %v7136_v3  ;;  %v7155_v8 = vadd.s32 16, %v7136_v3  ;;  %v226_v54 = vld [vmem:[%s8724_s1] sm:$0xff]  ;;  %v19_v55 = vld [vmem:[%s8724_s1 + $0x8] sm:$0xff] }
   0x5   :  { %6234 = vmatpush3.msra.mxu0 %v7133_v2  ;;  %vm56_vm2 = vmxor %vm7106_vm1, %vm55_vm0  ;;  %v7167_v10 = vadd.s32 24, %v7136_v3  ;;  %v7184_v14 = vadd.s32 32, %v7136_v3  ;;  %v7212_v20 = vadd.s32 40, %v7136_v3  ;;  %v7219_v22 = vadd.s32 48, %v7136_v3  ;;  %6259 = vmatprep.subr.mxu1 %v226_v54 }
   0x6   :  { %6235 = vmatprep.subr.mxu0 %v7144_v5  ;;  %vm39_vm4 = vcmp.eq.s32.totalorder %v7138_v4, %v7148_v6  ;;  %vm7173_vm5 = vmxor %vm56_vm2, %vm7106_vm1  ;;  %v7178_v12 = vadd.s32 4294967295, %v7152_v7  ;;  %v7181_v13 = vadd.s32 4294967295, %v7155_v8  ;;  %v7248_v26 = vadd.s32 56, %v7136_v3  ;;  %6260 = vmatpush3.msra.mxu1 %v226_v54 }
   0x7   :  { %6236 = vmatpush3.msra.mxu0 %v7144_v5  ;;  %vm72_vm6 = vmand %vm39_vm4, %vm7173_vm5  ;;  %v7209_v19 = vadd.s32 4294967295, %v7167_v10  ;;  %v35_v21 = vadd.s32 4294967295, %v7184_v14  ;;  %v36_v25 = vadd.s32 4294967295, %v7212_v20  ;;  %v37_v28 = vadd.s32 4294967295, %v7219_v22  ;;  %6273 = vmatprep.subr.mxu1 %v19_v55 }
   0x8   :  { %6237 = vmatprep.subr.mxu0 %v7161_v9  ;;  %v5542_v17 = vsel %vm72_vm6, 1.0, %v7107_v16  ;;  %vm40_vm7 = vcmp.eq.s32.totalorder %v7138_v4, %v7178_v12  ;;  %vm41_vm8 = vcmp.eq.s32.totalorder %v7138_v4, %v7181_v13  ;;  %vm7255_vm13 = vmxor %vm55_vm0, %vm7106_vm1  ;;  %v38_v31 = vadd.s32 4294967295, %v7248_v26  ;;  %v1046_v13 = vld [vmem:[%s8724_s1 + $0x90] sm:$0xff] }
   0x9   :  { %6238 = vmatpush3.msra.mxu0 %v7161_v9  ;;  %6247 = vmatprep.mubr.msk.f32.mxu0 %vm96_vm3, %v5542_v17  ;;  %vm73_vm9 = vmand %vm40_vm7, %vm7173_vm5  ;;  %vm42_vm11 = vcmp.eq.s32.totalorder %v7138_v4, %v7209_v19  ;;  %vm43_vm12 = vcmp.eq.s32.totalorder %v7138_v4, %v35_v21  ;;  %vm44_vm0 = vcmp.eq.s32.totalorder %v7138_v4, %v36_v25  ;;  %v486_v32 = vadd.s32 1, %v7136_v3  ;;  %v1044_v19 = vld [vmem:[%s8724_s1 + $0x80] sm:$0xff]  ;;  %v1763_v12 = vld [vmem:[%s8724_s1 + $0x110] sm:$0xff] }
   0xa   :  { %6239 = vmatprep.subr.mxu0 %v7190_v15  ;;  %vm74_vm10 = vmand %vm41_vm8, %vm7173_vm5  ;;  %v5543_v29 = vsel %vm73_vm9, 1.0, %v7107_v16  ;;  %vm45_vm2 = vcmp.eq.s32.totalorder %v7138_v4, %v37_v28  ;;  %v7290_v35 = vadd.s32 1, %v7152_v7  ;;  %v7300_v37 = vadd.s32 1, %v7155_v8 }
   0xb   :  { %6240 = vmatpush3.msra.mxu0 %v7190_v15  ;;  %v5544_v30 = vsel %vm74_vm10, 1.0, %v7107_v16  ;;  %vm75_vm14 = vmand %vm42_vm11, %vm7173_vm5  ;;  %vm46_vm10 = vcmp.eq.s32.totalorder %v7138_v4, %v38_v31  ;;  %v7317_v40 = vadd.s32 1, %v7167_v10  ;;  %v7324_v41 = vadd.s32 1, %v7184_v14 }
   0xc   :  { %6241 = vmatprep.subr.mxu0 %v7203_v18  ;;  %vm76_vm15 = vmand %vm43_vm12, %vm7255_vm13  ;;  %v5545_v33 = vsel %vm75_vm14, 1.0, %v7107_v16  ;;  %vm7295_vm12 = vcmp.eq.s32.totalorder %v7138_v4, %v486_v32  ;;  %v7345_v44 = vadd.s32 1, %v7212_v20  ;;  %v7352_v45 = vadd.s32 1, %v7219_v22 }
   0xd   :  { %6242 = vmatpush3.msra.mxu0 %v7203_v18  ;;  %v5546_v34 = vsel %vm76_vm15, 1.0, %v7107_v16  ;;  %vm77_vm6 = vmand %vm44_vm0, %vm7255_vm13  ;;  %vm495_vm0 = vcmp.eq.s32.totalorder %v7138_v4, %v7290_v35  ;;  %v7373_v48 = vadd.s32 1, %v7248_v26 }
   0xe   :  { %6243 = vmatprep.subr.mxu0 %v7225_v23  ;;  %vm78_vm9 = vmand %vm45_vm2, %vm7255_vm13  ;;  %v5547_v38 = vsel %vm77_vm6, 1.0, %v7107_v16  ;;  %vm8726_vm2 = vcmp.eq.s32.totalorder %v7138_v4, %v7300_v37  ;;  %v5773_v36 = vsel %vm495_vm0, 1.0, %v7107_v16 }
   0xf   :  { %6244 = vmatpush3.msra.mxu0 %v7225_v23  ;;  %v5548_v39 = vsel %vm78_vm9, 1.0, %v7107_v16  ;;  %vm79_vm14 = vmand %vm46_vm10, %vm7255_vm13  ;;  %vm8728_vm10 = vcmp.eq.s32.totalorder %v7138_v4, %v7317_v40 }
  0x10   :  { %6245 = vmatprep.subr.mxu0 %v7237_v24  ;;  %vm502_vm15 = vmand %vm7295_vm12, %vm7173_vm5  ;;  %v5549_v42 = vsel %vm79_vm14, 1.0, %v7107_v16  ;;  %vm8727_vm14 = vcmp.eq.s32.totalorder %v7138_v4, %v7324_v41 }
  0x11   :  { %6246 = vmatpush3.msra.mxu0 %v7237_v24  ;;  %v5574_v43 = vsel %vm502_vm15, 1.0, %v7107_v16  ;;  %vm503_vm6 = vmand %vm495_vm0, %vm7173_vm5 }
  0x12   :  { %6248 = vmatmul.mubr.msk.f32.vlgmr.msra.gmra.mxu0 %vm96_vm3, %v5543_v29  ;;  %6287 = vmatprep.subr.mxu0 %v7128_v1  ;;  %vm504_vm9 = vmand %vm8726_vm2, %vm7173_vm5  ;;  %v5575_v46 = vsel %vm503_vm6, 1.0, %v7107_v16  ;;  %vm499_vm6 = vcmp.eq.s32.totalorder %v7138_v4, %v7345_v44 }
  0x13   :  { %6250 = vmatprep.mubr.msk.f32.mxu0 %vm96_vm3, %v5544_v30  ;;  %6288 = vmatpush3.msra.mxu0 %v7128_v1  ;;  %v5576_v47 = vsel %vm504_vm9, 1.0, %v7107_v16  ;;  %vm505_vm15 = vmand %vm8728_vm10, %vm7173_vm5  ;;  %vm8730_vm9 = vcmp.eq.s32.totalorder %v7138_v4, %v7352_v45  ;;  %vm8729_vm10 = vcmp.eq.s32.totalorder %v7138_v4, %v7373_v48 }
  0x14   :  { %6289 = vmatprep.subr.mxu0 %v7133_v2  ;;  %vm506_vm2 = vmand %vm8727_vm14, %vm7255_vm13  ;;  %v5577_v49 = vsel %vm505_vm15, 1.0, %v7107_v16 }
  0x15   :  { %6290 = vmatpush3.msra.mxu0 %v7133_v2  ;;  %v5578_v50 = vsel %vm506_vm2, 1.0, %v7107_v16  ;;  %vm507_vm5 = vmand %vm499_vm6, %vm7255_vm13 }
  0x16   :  { %6251 = vmatmul.mubr.msk.f32.gmra.mxu0 %vm96_vm3, %v5545_v33  ;;  %6291 = vmatprep.subr.mxu0 %v7144_v5  ;;  %vm508_vm14 = vmand %vm8730_vm9, %vm7255_vm13  ;;  %v5579_v51 = vsel %vm507_vm5, 1.0, %v7107_v16 }
  0x17   :  { %6253 = vmatprep.mubr.msk.f32.mxu0 %vm96_vm3, %v5546_v34  ;;  %6292 = vmatpush3.msra.mxu0 %v7144_v5  ;;  %v5580_v52 = vsel %vm508_vm14, 1.0, %v7107_v16  ;;  %vm509_vm2 = vmand %vm8729_vm10, %vm7255_vm13  ;;  %vm227_vm13 = vcmask 64512  }
  0x18   :  { %6293 = vmatprep.subr.mxu0 %v7161_v9  ;;  %v5581_v53 = vsel %vm509_vm2, 1.0, %v7107_v16 }
  0x19   :  { %6294 = vmatpush3.msra.mxu0 %v7161_v9 }
  0x1a   :  { %6254 = vmatmul.mubr.msk.f32.gmra.mxu0 %vm96_vm3, %v5547_v38  ;;  %6295 = vmatprep.subr.mxu0 %v7190_v15 }
  0x1b   :  { %6256 = vmatprep.mubr.msk.f32.mxu0 %vm96_vm3, %v5548_v39  ;;  %6296 = vmatpush3.msra.mxu0 %v7190_v15 }
  0x1c   :  { %6297 = vmatprep.subr.mxu0 %v7203_v18 }
  0x1d   :  { %6298 = vmatpush3.msra.mxu0 %v7203_v18 }
  0x1e   :  { %6257 = vmatmul.mubr.msk.f32.gmra.mxu0 %vm96_vm3, %v5549_v42  ;;  %6299 = vmatprep.subr.mxu0 %v7225_v23 }
  0x1f   :  { %6300 = vmatpush3.msra.mxu0 %v7225_v23  ;;  %6303 = vmatprep.mubr.msk.f32.mxu0 %vm96_vm3, %v5574_v43 }
  0x20   :  { %6301 = vmatprep.subr.mxu0 %v7237_v24 }
  0x21   :  { %6302 = vmatpush3.msra.mxu0 %v7237_v24 }
  0x22   :  { %6304 = vmatmul.mubr.msk.f32.vlgmr.msra.gmra.mxu0 %vm96_vm3, %v5575_v46 }
  0x23   :  { %6306 = vmatprep.mubr.msk.f32.mxu0 %vm96_vm3, %v5576_v47 }
  0x26   :  { %6307 = vmatmul.mubr.msk.f32.gmra.mxu0 %vm96_vm3, %v5577_v49 }
  0x27   :  { %6309 = vmatprep.mubr.msk.f32.mxu0 %vm96_vm3, %v5578_v50 }
  0x2a   :  { %6310 = vmatmul.mubr.msk.f32.gmra.mxu0 %vm96_vm3, %v5579_v51 }
  0x2b   :  { %6312 = vmatprep.mubr.msk.f32.mxu0 %vm96_vm3, %v5580_v52 }
  0x2e   :  { %6313 = vmatmul.mubr.msk.f32.gmra.mxu0 %vm96_vm3, %v5581_v53 }
  0xd2   :  { %v6249_v56 = vpop.f32.mrf.mxu0 }
  0xd4   :  { %v187_v57 = vpop.f32.mrf.mxu0 }
  0xd5   :  { %6261 = vmatprep.mubr.msk.f32.mxu1 %vm227_vm13, %v187_v57 }
  0xd6   :  { %v6252_v59 = vpop.f32.mrf.mxu0  ;;  %6262 = vmatmul.mubr.msk.f32.vlgmr.msra.gmra.mxu1 %vm227_vm13, %v6249_v56 }
  0xd7   :  { %6274 = vmatpush3.msra.mxu1 %v19_v55 }
  0xd8   :  { %v197_v60 = vpop.f32.mrf.mxu0  ;;  %6315 = vmatprep.subr.mxu1 %v655_v58 }
  0xd9   :  { %6264 = vmatprep.mubr.msk.f32.mxu1 %vm227_vm13, %v197_v60 }
  0xda   :  { %v6255_v61 = vpop.f32.mrf.mxu0  ;;  %6265 = vmatmul.mubr.msk.f32.gmra.mxu1 %vm227_vm13, %v6252_v59 }
  0xdc   :  { %v207_v62 = vpop.f32.mrf.mxu0 }
  0xdd   :  { %6267 = vmatprep.mubr.msk.f32.mxu1 %vm227_vm13, %v207_v62  ;;  %v5598_v62 = vld [vmem:[%s8724_s1 + $0x18] ss:$0 sm:$0xff] }
  0xde   :  { %v6258_v63 = vpop.f32.mrf.mxu0  ;;  %6268 = vmatmul.mubr.msk.f32.gmra.mxu1 %vm227_vm13, %v6255_v61 }
  0xe0   :  { %v217_v0 = vpop.f32.mrf.mxu0 }
  0xe1   :  { %6270 = vmatprep.mubr.msk.f32.mxu1 %vm227_vm13, %v217_v0 }
  0xe2   :  { %6271 = vmatmul.mubr.msk.f32.gmra.mxu1 %vm227_vm13, %v6258_v63  ;;  %v6305_v11 = vpop.f32.mrf.mxu0 }
  0xe3   :  { %6275 = vmatprep.mubr.msk.f32.mxu1 %vm227_vm13, %v7237_v24 }
  0xe4   :  { %v616_v17 = vpop.f32.mrf.mxu0 }
  0xe6   :  { %6276 = vmatmul.mubr.msk.f32.vlgmr.msra.gmra.mxu1 %vm227_vm13, %v7225_v23  ;;  %v6308_v21 = vpop.f32.mrf.mxu0 }
  0xe7   :  { %6278 = vmatprep.mubr.msk.f32.mxu1 %vm227_vm13, %v7203_v18  ;;  %6316 = vmatpush3.msra.mxu1 %v655_v58 }
  0xe8   :  { %v626_v25 = vpop.f32.mrf.mxu0 }
  0xea   :  { %6279 = vmatmul.mubr.msk.f32.gmra.mxu1 %vm227_vm13, %v7190_v15  ;;  %v6311_v24 = vpop.f32.mrf.mxu0 }
  0xeb   :  { %6281 = vmatprep.mubr.msk.f32.mxu1 %vm227_vm13, %v7161_v9 }
  0xec   :  { %v636_v18 = vpop.f32.mrf.mxu0 }
  0xee   :  { %6282 = vmatmul.mubr.msk.f32.gmra.mxu1 %vm227_vm13, %v7144_v5  ;;  %v6314_v15 = vpop.f32.mrf.mxu0 }
  0xef   :  { %6284 = vmatprep.mubr.msk.f32.mxu1 %vm227_vm13, %v7133_v2 }
  0xf0   :  { %v646_v5 = vpop.f32.mrf.mxu0 }
  0xf2   :  { %6285 = vmatmul.mubr.msk.f32.gmra.mxu1 %vm227_vm13, %v7128_v1  ;;  %v806_v1 = vmul.u32 2, %v7136_v3 }
  0xf3   :  { %6317 = vmatprep.mubr.msk.f32.mxu1 %vm227_vm13, %v616_v17 }
  0xf4   :  { %v822_v2 = vadd.s32 1, %v806_v1  ;;  %vm810_vm14 = vcmp.eq.s32.totalorder %v7138_v4, %v806_v1 }
  0xf5   :  { %v7451_v9 = vsel %vm810_vm14, 1.0, %v7107_v16 }
  0xf6   :  { %6318 = vmatmul.mubr.msk.f32.vlgmr.msra.gmra.mxu1 %vm227_vm13, %v6305_v11  ;;  %vm826_vm15 = vcmp.eq.s32.totalorder %v7138_v4, %v822_v2  ;;  %6345 = vmatprep.mubr.msk.f32.mxu0 %vm96_vm3, %v7451_v9 }
  0xf7   :  { %6320 = vmatprep.mubr.msk.f32.mxu1 %vm227_vm13, %v626_v25  ;;  %v7454_v23 = vsel %vm826_vm15, 1.0, %v7107_v16 }
  0xfa   :  { %6321 = vmatmul.mubr.msk.f32.gmra.mxu1 %vm227_vm13, %v6308_v21 }
  0xfb   :  { %6323 = vmatprep.mubr.msk.f32.mxu1 %vm227_vm13, %v636_v18 }
  0xfe   :  { %6324 = vmatmul.mubr.msk.f32.gmra.mxu1 %vm227_vm13, %v6311_v24 }
  0xff   :  { %6326 = vmatprep.mubr.msk.f32.mxu1 %vm227_vm13, %v646_v5 }
 0x102   :  { %6327 = vmatmul.mubr.msk.f32.gmra.mxu1 %vm227_vm13, %v6314_v15  ;;  %v807_v15 = vmul.u32 2, %v7152_v7 }
 0x103   :  { %6367 = vmatprep.mubr.msk.f32.mxu1 %vm96_vm3, %v7454_v23 }
 0x104   :  { %vm811_vm5 = vcmp.eq.s32.totalorder %v7138_v4, %v807_v15 }
 0x196   :  { %v6263_v27 = vpop.f32.mrf.mxu1 }
 0x198   :  { %v318_v28 = vpop.f32.mrf.mxu1 }
 0x19a   :  { %v6266_v29 = vpop.f32.mrf.mxu1 }
 0x19c   :  { %v328_v30 = vpop.f32.mrf.mxu1 }
 0x19e   :  { %v6269_v31 = vpop.f32.mrf.mxu1 }
 0x1a0   :  { %v338_v32 = vpop.f32.mrf.mxu1 }
 0x1a2   :  { %v6272_v33 = vpop.f32.mrf.mxu1 }
 0x1a4   :  { %v348_v34 = vpop.f32.mrf.mxu1 }
 0x1a6   :  { %v6277_v38 = vpop.f32.mrf.mxu1 }
 0x1a8   :  { %v447_v39 = vpop.f32.mrf.mxu1 }
 0x1aa   :  { %v6280_v42 = vpop.f32.mrf.mxu1 }
 0x1ab   :  { %v463_v25 = vadd.f32 %v6280_v42, %v6266_v29  ;;  %v448_v42 = vadd.f32 %v447_v39, %v318_v28  ;;  %v7471_v39 = vsel %vm811_vm5, 1.0, %v7107_v16 }
 0x1ac   :  { %v457_v43 = vpop.f32.mrf.mxu1 }
 0x1ad   :  { %v458_v5 = vadd.f32 %v457_v43, %v328_v30  ;;  %v809_v30 = vmul.u32 2, %v7167_v10 }
 0x1ae   :  { %v6283_v46 = vpop.f32.mrf.mxu1 }
 0x1af   :  { %v473_v59 = vadd.f32 %v6283_v46, %v6269_v31  ;;  %v808_v31 = vmul.u32 2, %v7155_v8  ;;  %v825_v28 = vadd.s32 1, %v809_v30  ;;  %vm813_vm10 = vcmp.eq.s32.totalorder %v7138_v4, %v809_v30 }
 0x1b0   :  { %v467_v47 = vpop.f32.mrf.mxu1 }
 0x1b1   :  { %v468_v0 = vadd.f32 %v467_v47, %v338_v32  ;;  %v453_v32 = vadd.f32 %v6277_v38, %v6263_v27  ;;  %v824_v43 = vadd.s32 1, %v808_v31  ;;  %vm812_vm14 = vcmp.eq.s32.totalorder %v7138_v4, %v808_v31 }
 0x1b2   :  { %v6286_v49 = vpop.f32.mrf.mxu1  ;;  %vm829_vm9 = vcmp.eq.s32.totalorder %v7138_v4, %v825_v28  ;;  %v1043_v28 = vld [vmem:[%s8724_s1 + $0x78] sm:$0xff] }
 0x1b3   :  { %v483_v57 = vadd.f32 %v6286_v49, %v6272_v33  ;;  %vm828_vm15 = vcmp.eq.s32.totalorder %v7138_v4, %v824_v43  ;;  %v1047_v43 = vld [vmem:[%s8724_s1 + $0x98] sm:$0xff] }
 0x1b4   :  { %v477_v50 = vpop.f32.mrf.mxu1 }
 0x1b5   :  { %v478_v60 = vadd.f32 %v477_v50, %v348_v34  ;;  %v823_v34 = vadd.s32 1, %v807_v15 }
 0x1b6   :  { %v6319_v51 = vpop.f32.mrf.mxu1 }
 0x1b7   :  { %v786_v46 = vadd.f32 %v6319_v51, %v453_v32  ;;  %vm827_vm2 = vcmp.eq.s32.totalorder %v7138_v4, %v823_v34 }
 0x1b8   :  { %v746_v52 = vpop.f32.mrf.mxu1  ;;  %v7474_v51 = vsel %vm827_vm2, 1.0, %v7107_v16 }
 0x1b9   :  { %v785_v49 = vadd.f32 %v746_v52, %v448_v42  ;;  %v799_v27 = vadd.f32 %v5598_v62, %v786_v46  ;;  %v5601_v52 = vsel %vm812_vm14, 1.0, %v7107_v16  ;;  %vm1073_vm14 = vcmask 261120  }
 0x1ba   :  { %v6322_v53 = vpop.f32.mrf.mxu1 }
 0x1bb   :  { %v788_v1 = vadd.f32 %v6322_v53, %v463_v25  ;;  %v798_v38 = vadd.f32 %v5598_v62, %v785_v49  ;;  %v5605_v53 = vsel %vm828_vm15, 1.0, %v7107_v16 }
 0x1bc   :  { %v756_v54 = vpop.f32.mrf.mxu1 }
 0x1bd   :  { %v787_v33 = vadd.f32 %v756_v54, %v458_v5  ;;  %v801_v47 = vadd.f32 %v5598_v62, %v788_v1  ;;  %v1178_v54 = vld [vmem:[%s8724_s1 + $0x58] sm:$0xff] }
 0x1be   :  { %v6325_v55 = vpop.f32.mrf.mxu1 }
 0x1bf   :  { %v790_v11 = vadd.f32 %v6325_v55, %v473_v59  ;;  %v800_v50 = vadd.f32 %v5598_v62, %v787_v33  ;;  %v5602_v55 = vsel %vm813_vm10, 1.0, %v7107_v16  ;;  %v1175_v59 = vld [vmem:[%s8724_s1 + $0x40] sm:$0xff]  ;;  %vm1052_vm10 = vcmp.lt.s32.totalorder %v7138_v4, 16 }
 0x1c0   :  { %v766_v56 = vpop.f32.mrf.mxu1  ;;  %vm7539_vm15 = vmxor %vm1052_vm10, %vm7106_vm1 }
 0x1c1   :  { %v789_v24 = vadd.f32 %v766_v56, %v468_v0  ;;  %v803_v2 = vadd.f32 %v5598_v62, %v790_v11  ;;  %v5606_v56 = vsel %vm829_vm9, 1.0, %v7107_v16  ;;  %vm1053_vm9 = vmxor %vm7106_vm1, %vm1052_vm10  ;;  %v1487_v0 = vld [vmem:[%s8724_s1 + $0xc8] sm:$0xff] }
 0x1c2   :  { %v6328_v58 = vpop.f32.mrf.mxu1  ;;  %vm7519_vm5 = vmxor %vm1053_vm9, %vm7106_vm1 }
 0x1c3   :  { %v792_v61 = vadd.f32 %v6328_v58, %v483_v57  ;;  %v802_v29 = vadd.f32 %v5598_v62, %v789_v24  ;;  %v1177_v57 = vld [vmem:[%s8724_s1 + $0x50] sm:$0xff]  ;;  %v1176_v58 = vld [vmem:[%s8724_s1 + $0x48] sm:$0xff]  ;;  %vm1061_vm2 = vmand %vm39_vm4, %vm7519_vm5 }
 0x1c4   :  { %v776_v63 = vpop.f32.mrf.mxu1  ;;  %v5615_v11 = vsel %vm1061_vm2, 1.0, %v7107_v16  ;;  %vm1062_vm9 = vmand %vm40_vm7, %vm7519_vm5 }
 0x1c5   :  { %v805_v17 = vadd.f32 %v5598_v62, %v792_v61  ;;  %v791_v21 = vadd.f32 %v776_v63, %v478_v60  ;;  %v1174_v60 = vld [vmem:[%s8724_s1 + $0x38] sm:$0xff]  ;;  %v1173_v61 = vld [vmem:[%s8724_s1 + $0x30] sm:$0xff]  ;;  %v1171_v63 = vld [vmem:[%s8724_s1 + $0x20] sm:$0xff]  ;;  %v5616_v30 = vsel %vm1062_vm9, 1.0, %v7107_v16  ;;  %vm8741_vm9 = vcmp.eq.s32.totalorder %v7138_v4, %v7300_v37 }
 0x1c6   :  { %vm1063_vm10 = vmand %vm41_vm8, %vm7539_vm15 }
 0x1c7   :  { %v804_v18 = vadd.f32 %v5598_v62, %v791_v21  ;;  %6329 = vmatprep.subr.mxu0 %v805_v17  ;;  %6351 = vmatprep.subr.mxu1 %v805_v17  ;;  %v1172_v62 = vld [vmem:[%s8724_s1 + $0x28] sm:$0xff]  ;;  %v5617_v49 = vsel %vm1063_vm10, 1.0, %v7107_v16  ;;  %vm1064_vm8 = vmand %vm42_vm11, %vm7539_vm15 }
 0x1c8   :  { %6330 = vmatpush3.msra.mxu0 %v805_v17  ;;  %6352 = vmatpush3.msra.mxu1 %v805_v17  ;;  %vm1373_vm11 = vmand %vm7295_vm12, %vm7519_vm5 }
 0x1c9   :  { %6331 = vmatprep.subr.mxu0 %v804_v18  ;;  %6353 = vmatprep.subr.mxu1 %v804_v18  ;;  %vm1374_vm2 = vmand %vm495_vm0, %vm7519_vm5  ;;  %vm8742_vm5 = vcmp.eq.s32.totalorder %v7138_v4, %v7317_v40 }
 0x1ca   :  { %6332 = vmatpush3.msra.mxu0 %v804_v18  ;;  %6354 = vmatpush3.msra.mxu1 %v804_v18  ;;  %vm1375_vm10 = vmand %vm8741_vm9, %vm7539_vm15 }
 0x1cb   :  { %6333 = vmatprep.subr.mxu0 %v803_v2  ;;  %6355 = vmatprep.subr.mxu1 %v803_v2 }
 0x1cc   :  { %6334 = vmatpush3.msra.mxu0 %v803_v2  ;;  %6356 = vmatpush3.msra.mxu1 %v803_v2 }
 0x1cd   :  { %6335 = vmatprep.subr.mxu0 %v802_v29  ;;  %6357 = vmatprep.subr.mxu1 %v802_v29 }
 0x1ce   :  { %6336 = vmatpush3.msra.mxu0 %v802_v29  ;;  %6358 = vmatpush3.msra.mxu1 %v802_v29 }
 0x1cf   :  { %6337 = vmatprep.subr.mxu0 %v801_v47  ;;  %6359 = vmatprep.subr.mxu1 %v801_v47 }
 0x1d0   :  { %6338 = vmatpush3.msra.mxu0 %v801_v47  ;;  %6360 = vmatpush3.msra.mxu1 %v801_v47 }
 0x1d1   :  { %6339 = vmatprep.subr.mxu0 %v800_v50  ;;  %6361 = vmatprep.subr.mxu1 %v800_v50 }
 0x1d2   :  { %6340 = vmatpush3.msra.mxu0 %v800_v50  ;;  %6362 = vmatpush3.msra.mxu1 %v800_v50  ;;  %v5618_v50 = vsel %vm1064_vm8, 1.0, %v7107_v16  ;;  %vm1376_vm8 = vmand %vm8742_vm5, %vm7539_vm15  ;;  %vm1768_vm15 = vcmp.lt.s32.totalorder %v7138_v4, 8 }
 0x1d3   :  { %6341 = vmatprep.subr.mxu0 %v799_v27  ;;  %6363 = vmatprep.subr.mxu1 %v799_v27  ;;  %vm7711_vm5 = vmxor %vm1768_vm15, %vm7106_vm1 }
 0x1d4   :  { %6342 = vmatpush3.msra.mxu0 %v799_v27  ;;  %6364 = vmatpush3.msra.mxu1 %v799_v27  ;;  %v1045_v27 = vld [vmem:[%s8724_s1 + $0x88] sm:$0xff] }
 0x1d5   :  { %6343 = vmatprep.subr.mxu0 %v798_v38  ;;  %6365 = vmatprep.subr.mxu1 %v798_v38 }
 0x1d6   :  { %6344 = vmatpush3.msra.mxu0 %v798_v38  ;;  %6366 = vmatpush3.msra.mxu1 %v798_v38  ;;  %v1042_v38 = vld [vmem:[%s8724_s1 + $0x70] sm:$0xff] }
 0x1d7   :  { %6346 = vmatmul.mubr.msk.f32.vlgmr.msra.gmra.mxu0 %vm96_vm3, %v7471_v39  ;;  %6368 = vmatmul.mubr.msk.f32.vlgmr.msra.gmra.mxu1 %vm96_vm3, %v7474_v51 }
 0x1d8   :  { %6348 = vmatprep.mubr.msk.f32.mxu0 %vm96_vm3, %v5601_v52  ;;  %6370 = vmatprep.mubr.msk.f32.mxu1 %vm96_vm3, %v5605_v53  ;;  %v1041_v52 = vld [vmem:[%s8724_s1 + $0x68] sm:$0xff]  ;;  %v1040_v53 = vld [vmem:[%s8724_s1 + $0x60] sm:$0xff] }
 0x1d9   :  { %6387 = vmatprep.subr.mxu1 %v1178_v54 }
 0x1da   :  { %6388 = vmatpush3.msra.mxu1 %v1178_v54  ;;  %v1489_v54 = vld [vmem:[%s8724_s1 + $0xd8] sm:$0xff] }
 0x1db   :  { %6349 = vmatmul.mubr.msk.f32.gmra.mxu0 %vm96_vm3, %v5602_v55  ;;  %6371 = vmatmul.mubr.msk.f32.gmra.mxu1 %vm96_vm3, %v5606_v56  ;;  %v1488_v55 = vld [vmem:[%s8724_s1 + $0xd0] sm:$0xff] }
 0x1dc   :  { %6389 = vmatprep.subr.mxu1 %v1177_v57  ;;  %6381 = vmatprep.mubr.msk.f32.mxu0 %vm1073_vm14, %v5615_v11  ;;  %v1486_v11 = vld [vmem:[%s8724_s1 + $0xc0] sm:$0xff] }
 0x1dd   :  { %6390 = vmatpush3.msra.mxu1 %v1177_v57 }
 0x1de   :  { %6391 = vmatprep.subr.mxu1 %v1176_v58 }
 0x1df   :  { %6392 = vmatpush3.msra.mxu1 %v1176_v58 }
 0x1e0   :  { %6393 = vmatprep.subr.mxu1 %v1175_v59 }
 0x1e1   :  { %6394 = vmatpush3.msra.mxu1 %v1175_v59 }
 0x1e2   :  { %6395 = vmatprep.subr.mxu1 %v1174_v60 }
 0x1e3   :  { %6396 = vmatpush3.msra.mxu1 %v1174_v60  ;;  %v5631_v60 = vsel %vm1373_vm11, 1.0, %v7107_v16  ;;  %vm1769_vm11 = vmxor %vm7106_vm1, %vm1768_vm15 }
 0x1e4   :  { %6397 = vmatprep.subr.mxu1 %v1173_v61  ;;  %vm2028_vm15 = vmand %vm495_vm0, %vm7711_vm5  ;;  %vm8750_vm0 = vcmp.eq.s32.totalorder %v7138_v4, %v7317_v40 }
 0x1e5   :  { %6398 = vmatpush3.msra.mxu1 %v1173_v61  ;;  %v5632_v61 = vsel %vm1374_vm2, 1.0, %v7107_v16  ;;  %vm7699_vm2 = vmxor %vm1769_vm11, %vm7106_vm1  ;;  %vm7108_vm11 = vmmov 0  }
 0x1e6   :  { %6399 = vmatprep.subr.mxu1 %v1172_v62  ;;  %vm1773_vm9 = vmand %vm39_vm4, %vm7699_vm2 }
 0x1e7   :  { %6400 = vmatpush3.msra.mxu1 %v1172_v62  ;;  %v5633_v62 = vsel %vm1375_vm10, 1.0, %v7107_v16  ;;  %vm1779_vm10 = vcmask 130048  }
 0x1e8   :  { %6401 = vmatprep.subr.mxu1 %v1171_v63 }
 0x1e9   :  { %6402 = vmatpush3.msra.mxu1 %v1171_v63  ;;  %v5634_v63 = vsel %vm1376_vm8, 1.0, %v7107_v16  ;;  %vm1774_vm8 = vmand %vm40_vm7, %vm7711_vm5 }
 0x1ea   :  { %vm2027_vm7 = vmand %vm7295_vm12, %vm7699_vm2  ;;  %vm2356_vm2 = vcmp.lt.s32.totalorder %v7136_v3, 4 }
 0x297   :  { %v6347_v17 = vpop.f32.mrf.mxu0  ;;  %v6369_v21 = vpop.f32.mrf.mxu1 }
 0x298   :  { %v1033_v31 = vmax.f32 %v6347_v17, %v6369_v21  ;;  %v1485_v17 = vld [vmem:[%s8724_s1 + $0xb8] sm:$0xff]  ;;  %v1484_v21 = vld [vmem:[%s8724_s1 + $0xb0] sm:$0xff] }
 0x299   :  { %v916_v25 = vpop.f32.mrf.mxu0  ;;  %v1013_v24 = vpop.f32.mrf.mxu1 }
 0x29a   :  { %v1032_v29 = vmax.f32 %v916_v25, %v1013_v24  ;;  %v7544_v46 = vmax.f32 %v1033_v31, 0.0  ;;  %v1483_v25 = vld [vmem:[%s8724_s1 + $0xa8] sm:$0xff]  ;;  %v1482_v24 = vld [vmem:[%s8724_s1 + $0xa0] sm:$0xff] }
 0x29b   :  { %v6350_v18 = vpop.f32.mrf.mxu0  ;;  %v6372_v15 = vpop.f32.mrf.mxu1 }
 0x29c   :  { %v1035_v5 = vmax.f32 %v6350_v18, %v6372_v15  ;;  %v7558_v47 = vmax.f32 %v1032_v29, 0.0 }
 0x29d   :  { %v926_v1 = vpop.f32.mrf.mxu0  ;;  %v1023_v2 = vpop.f32.mrf.mxu1 }
 0x29e   :  { %v7530_v32 = vmax.f32 %v1035_v5, 0.0  ;;  %v1034_v33 = vmax.f32 %v926_v1, %v1023_v2 }
 0x2a0   :  { %v7532_v34 = vmax.f32 %v1034_v33, 0.0  ;;  %6373 = vmatprep.subr.mxu0 %v7530_v32  ;;  %6431 = vmatprep.subr.mxu1 %v7530_v32 }
 0x2a1   :  { %6374 = vmatpush3.msra.mxu0 %v7530_v32 }
 0x2a2   :  { %6375 = vmatprep.subr.mxu0 %v7532_v34 }
 0x2a3   :  { %6376 = vmatpush3.msra.mxu0 %v7532_v34 }
 0x2a4   :  { %6377 = vmatprep.subr.mxu0 %v7544_v46 }
 0x2a5   :  { %6378 = vmatpush3.msra.mxu0 %v7544_v46 }
 0x2a6   :  { %6379 = vmatprep.subr.mxu0 %v7558_v47 }
 0x2a7   :  { %6380 = vmatpush3.msra.mxu0 %v7558_v47 }
 0x2a8   :  { %6382 = vmatmul.mubr.msk.f32.vlgmr.msra.gmra.mxu0 %vm1073_vm14, %v5616_v30  ;;  %6409 = vmatprep.subr.mxu0 %v1047_v43 }
 0x2a9   :  { %6410 = vmatpush3.msra.mxu0 %v1047_v43  ;;  %6384 = vmatprep.mubr.msk.f32.mxu0 %vm1073_vm14, %v5617_v49 }
 0x2aa   :  { %6411 = vmatprep.subr.mxu0 %v1046_v13 }
 0x2ab   :  { %6412 = vmatpush3.msra.mxu0 %v1046_v13 }
 0x2ac   :  { %6385 = vmatmul.mubr.msk.f32.gmra.mxu0 %vm1073_vm14, %v5618_v50  ;;  %6413 = vmatprep.subr.mxu0 %v1045_v27 }
 0x2ad   :  { %6414 = vmatpush3.msra.mxu0 %v1045_v27  ;;  %6425 = vmatprep.mubr.msk.f32.mxu0 %vm96_vm3, %v7558_v47 }
 0x2ae   :  { %6415 = vmatprep.subr.mxu0 %v1044_v19 }
 0x2af   :  { %6416 = vmatpush3.msra.mxu0 %v1044_v19  ;;  %v5643_v19 = vld [vmem:[%s8724_s1 + $0xe0] ss:$0 sm:$0xff] }
 0x2b0   :  { %6417 = vmatprep.subr.mxu0 %v1043_v28 }
 0x2b1   :  { %6418 = vmatpush3.msra.mxu0 %v1043_v28 }
 0x2b2   :  { %6419 = vmatprep.subr.mxu0 %v1042_v38 }
 0x2b3   :  { %6420 = vmatpush3.msra.mxu0 %v1042_v38 }
 0x2b4   :  { %6421 = vmatprep.subr.mxu0 %v1041_v52 }
 0x2b5   :  { %6422 = vmatpush3.msra.mxu0 %v1041_v52 }
 0x2b6   :  { %6423 = vmatprep.subr.mxu0 %v1040_v53 }
 0x2b7   :  { %6424 = vmatpush3.msra.mxu0 %v1040_v53 }
 0x2b8   :  { %6426 = vmatmul.mubr.msk.f32.vlgmr.msra.gmra.mxu0 %vm96_vm3, %v7544_v46  ;;  %6445 = vmatprep.subr.mxu0 %v1489_v54 }
 0x2b9   :  { %6428 = vmatprep.mubr.msk.f32.mxu0 %vm96_vm3, %v7532_v34  ;;  %6446 = vmatpush3.msra.mxu0 %v1489_v54 }
 0x2ba   :  { %6447 = vmatprep.subr.mxu0 %v1488_v55 }
 0x2bb   :  { %6448 = vmatpush3.msra.mxu0 %v1488_v55 }
 0x2bc   :  { %6429 = vmatmul.mubr.msk.f32.gmra.mxu0 %vm96_vm3, %v7530_v32  ;;  %6449 = vmatprep.subr.mxu0 %v1487_v0 }
 0x2bd   :  { %6450 = vmatpush3.msra.mxu0 %v1487_v0 }
 0x2be   :  { %6451 = vmatprep.subr.mxu0 %v1486_v11 }
 0x2bf   :  { %6452 = vmatpush3.msra.mxu0 %v1486_v11 }
 0x2c0   :  { %6453 = vmatprep.subr.mxu0 %v1485_v17 }
 0x2c1   :  { %6454 = vmatpush3.msra.mxu0 %v1485_v17 }
 0x2c2   :  { %6455 = vmatprep.subr.mxu0 %v1484_v21 }
 0x2c3   :  { %6456 = vmatpush3.msra.mxu0 %v1484_v21 }
 0x2c4   :  { %6457 = vmatprep.subr.mxu0 %v1483_v25 }
 0x2c5   :  { %6458 = vmatpush3.msra.mxu0 %v1483_v25 }
 0x2c6   :  { %6459 = vmatprep.subr.mxu0 %v1482_v24 }
 0x2c7   :  { %6460 = vmatpush3.msra.mxu0 %v1482_v24 }
 0x368   :  { %v6383_v56 = vpop.f32.mrf.mxu0 }
 0x36a   :  { %v1152_v57 = vpop.f32.mrf.mxu0 }
 0x36b   :  { %6403 = vmatprep.mubr.msk.f32.mxu1 %vm96_vm3, %v1152_v57 }
 0x36c   :  { %v6386_v58 = vpop.f32.mrf.mxu0  ;;  %6404 = vmatmul.mubr.msk.f32.vlgmr.msra.gmra.mxu1 %vm96_vm3, %v6383_v56 }
 0x36d   :  { %6432 = vmatpush3.msra.mxu1 %v7530_v32 }
 0x36e   :  { %6433 = vmatprep.subr.mxu1 %v7532_v34  ;;  %v1162_v59 = vpop.f32.mrf.mxu0 }
 0x36f   :  { %6434 = vmatpush3.msra.mxu1 %v7532_v34  ;;  %6406 = vmatprep.mubr.msk.f32.mxu1 %vm96_vm3, %v1162_v59  ;;  %v1864_v59 = vld [vmem:[%s8724_s1 + $0x100] sm:$0xff] }
 0x370   :  { %6435 = vmatprep.subr.mxu1 %v7544_v46  ;;  %6407 = vmatmul.mubr.msk.f32.gmra.mxu1 %vm96_vm3, %v6386_v58 }
 0x371   :  { %6436 = vmatpush3.msra.mxu1 %v7544_v46  ;;  %6439 = vmatprep.mubr.msk.f32.mxu1 %vm1073_vm14, %v5631_v60  ;;  %v1862_v60 = vld [vmem:[%s8724_s1 + $0xf0] sm:$0xff] }
 0x372   :  { %6437 = vmatprep.subr.mxu1 %v7558_v47  ;;  %6496 = vmatprep.subr.mxu0 %v1864_v59 }
 0x373   :  { %6438 = vmatpush3.msra.mxu1 %v7558_v47 }
 0x374   :  { %6440 = vmatmul.mubr.msk.f32.vlgmr.msra.gmra.mxu1 %vm1073_vm14, %v5632_v61 }
 0x375   :  { %6442 = vmatprep.mubr.msk.f32.mxu1 %vm1073_vm14, %v5633_v62  ;;  %v5648_v62 = vsel %vm1773_vm9, 1.0, %v7107_v16  ;;  %vm2357_vm9 = vcmp.lt.s32.totalorder %v7138_v4, 4 }
 0x376   :  { %vm2358_vm5 = vmxor %vm2356_vm2, %vm2357_vm9  ;;  %vm3045_vm2 = vcmask 1043456   ;;  %vm3041_vm9 = vcmask 31744  }
 0x378   :  { %6443 = vmatmul.mubr.msk.f32.gmra.mxu1 %vm1073_vm14, %v5634_v63  ;;  %v6427_v29 = vpop.f32.mrf.mxu0 }
 0x379   :  { %6475 = vmatprep.mubr.msk.f32.mxu1 %vm1073_vm14, %v7451_v9 }
 0x37a   :  { %v1354_v34 = vpop.f32.mrf.mxu0 }
 0x37c   :  { %v6430_v42 = vpop.f32.mrf.mxu0 }
 0x37e   :  { %v1364_v46 = vpop.f32.mrf.mxu0 }
 0x42c   :  { %v6405_v18 = vpop.f32.mrf.mxu1 }
 0x42d   :  { %v1360_v13 = vadd.f32 %v6427_v29, %v6405_v18  ;;  %v5656_v29 = vsel %vm2027_vm7, 1.0, %v7107_v16 }
 0x42e   :  { %v1257_v15 = vpop.f32.mrf.mxu1 }
 0x42f   :  { %v1355_v38 = vadd.f32 %v1354_v34, %v1257_v15  ;;  %v5657_v34 = vsel %vm2028_vm15, 1.0, %v7107_v16 }
 0x430   :  { %v6408_v5 = vpop.f32.mrf.mxu1 }
 0x431   :  { %v1370_v43 = vadd.f32 %v6430_v42, %v6408_v5  ;;  %v5649_v5 = vsel %vm1774_vm8, 1.0, %v7107_v16  ;;  %v2117_v42 = vld [vmem:[%s8724_s1 + $0x140] sm:$0xff]  ;;  %vm7797_vm8 = vmxor %vm2358_vm5, %vm7106_vm1  ;;  %vm3202_vm5 = vcmp.ge.s32.totalorder %v7138_v4, 4 }
 0x432   :  { %v1267_v1 = vpop.f32.mrf.mxu1  ;;  %vm2360_vm7 = vmand %vm39_vm4, %vm7797_vm8 }
 0x433   :  { %v1365_v50 = vadd.f32 %v1364_v46, %v1267_v1  ;;  %v1765_v1 = vld [vmem:[%s8724_s1 + $0x120] sm:$0xff]  ;;  %v2116_v46 = vld [vmem:[%s8724_s1 + $0x138] sm:$0xff]  ;;  %v5665_v17 = vsel %vm2360_vm7, 1.0, %v7107_v16  ;;  %vm2584_vm1 = vmand %vm7295_vm12, %vm7797_vm8 }
 0x434   :  { %v6441_v2 = vpop.f32.mrf.mxu1 }
 0x436   :  { %v1463_v31 = vpop.f32.mrf.mxu1 }
 0x437   :  { %6461 = vmatprep.mubr.msk.f32.mxu0 %vm96_vm3, %v1463_v31  ;;  %v1762_v31 = vld [vmem:[%s8724_s1 + $0x108] sm:$0xff] }
 0x438   :  { %v6444_v32 = vpop.f32.mrf.mxu1  ;;  %6462 = vmatmul.mubr.msk.f32.vlgmr.msra.gmra.mxu0 %vm96_vm3, %v6441_v2  ;;  %v1764_v2 = vld [vmem:[%s8724_s1 + $0x118] sm:$0xff] }
 0x439   :  { %6497 = vmatpush3.msra.mxu0 %v1864_v59  ;;  %v2437_v59 = vld [vmem:[%s8724_s1 + $0x158] sm:$0xff] }
 0x43a   :  { %v1473_v33 = vpop.f32.mrf.mxu1 }
 0x43b   :  { %6464 = vmatprep.mubr.msk.f32.mxu0 %vm96_vm3, %v1473_v33 }
 0x43c   :  { %6465 = vmatmul.mubr.msk.f32.gmra.mxu0 %vm96_vm3, %v6444_v32 }
 0x4f8   :  { %v6463_v47 = vpop.f32.mrf.mxu0 }
 0x4f9   :  { %v1588_v52 = vadd.f32 %v6463_v47, %v1360_v13  ;;  %v2115_v47 = vld [vmem:[%s8724_s1 + $0x130] sm:$0xff] }
 0x4fa   :  { %v1568_v30 = vpop.f32.mrf.mxu0 }
 0x4fb   :  { %v1587_v55 = vadd.f32 %v1568_v30, %v1355_v38  ;;  %v1597_v57 = vadd.f32 %v5643_v19, %v1588_v52  ;;  %v2114_v30 = vld [vmem:[%s8724_s1 + $0x128] sm:$0xff] }
 0x4fc   :  { %v6466_v49 = vpop.f32.mrf.mxu0  ;;  %v5662_v52 = vld [vmem:[%s8724_s1 + $0x148] ss:$0 sm:$0xff] }
 0x4fd   :  { %v1590_v27 = vadd.f32 %v6466_v49, %v1370_v43  ;;  %v1596_v58 = vadd.f32 %v5643_v19, %v1587_v55 }
 0x4fe   :  { %v1578_v28 = vpop.f32.mrf.mxu0 }
 0x4ff   :  { %v1599_v53 = vadd.f32 %v5643_v19, %v1590_v27  ;;  %v1589_v54 = vadd.f32 %v1578_v28, %v1365_v50 }
 0x501   :  { %v1598_v56 = vadd.f32 %v5643_v19, %v1589_v54  ;;  %6467 = vmatprep.subr.mxu1 %v1599_v53 }
 0x502   :  { %6468 = vmatpush3.msra.mxu1 %v1599_v53 }
 0x503   :  { %6469 = vmatprep.subr.mxu1 %v1598_v56 }
 0x504   :  { %6470 = vmatpush3.msra.mxu1 %v1598_v56 }
 0x505   :  { %6471 = vmatprep.subr.mxu1 %v1597_v57 }
 0x506   :  { %6472 = vmatpush3.msra.mxu1 %v1597_v57 }
 0x507   :  { %6473 = vmatprep.subr.mxu1 %v1596_v58 }
 0x508   :  { %6474 = vmatpush3.msra.mxu1 %v1596_v58 }
 0x509   :  { %6476 = vmatmul.mubr.msk.f32.vlgmr.msra.gmra.mxu1 %vm1073_vm14, %v7471_v39  ;;  %6478 = vmatprep.subr.mxu1 %v1599_v53  ;;  %v1863_v39 = vld [vmem:[%s8724_s1 + $0xf8] sm:$0xff] }
 0x50a   :  { %6479 = vmatpush3.msra.mxu1 %v1599_v53  ;;  %6486 = vmatprep.mubr.msk.f32.mxu1 %vm1073_vm14, %v7454_v23 }
 0x50b   :  { %6480 = vmatprep.subr.mxu1 %v1598_v56  ;;  %6498 = vmatprep.subr.mxu0 %v1863_v39 }
 0x50c   :  { %6481 = vmatpush3.msra.mxu1 %v1598_v56  ;;  %6499 = vmatpush3.msra.mxu0 %v1863_v39  ;;  %v2436_v39 = vld [vmem:[%s8724_s1 + $0x150] sm:$0xff] }
 0x50d   :  { %6482 = vmatprep.subr.mxu1 %v1597_v57  ;;  %6500 = vmatprep.subr.mxu0 %v1862_v60 }
 0x50e   :  { %6483 = vmatpush3.msra.mxu1 %v1597_v57  ;;  %6501 = vmatpush3.msra.mxu0 %v1862_v60 }
 0x50f   :  { %6484 = vmatprep.subr.mxu1 %v1596_v58 }
 0x510   :  { %6485 = vmatpush3.msra.mxu1 %v1596_v58 }
 0x511   :  { %6487 = vmatmul.mubr.msk.f32.vlgmr.msra.gmra.mxu1 %vm1073_vm14, %v7474_v51  ;;  %v1861_v51 = vld [vmem:[%s8724_s1 + $0xe8] sm:$0xff] }
 0x512   :  { %6502 = vmatprep.subr.mxu0 %v1861_v51  ;;  %6493 = vmatprep.mubr.msk.f32.mxu1 %vm1779_vm10, %v5648_v62 }
 0x513   :  { %6503 = vmatpush3.msra.mxu0 %v1861_v51  ;;  %v5683_v51 = vld [vmem:[%s8724_s1 + $0x198] ss:$0 sm:$0xff] }
 0x5c9   :  { %v6477_v63 = vpop.f32.mrf.mxu1 }
 0x5cb   :  { %v1670_v0 = vpop.f32.mrf.mxu1 }
 0x5d1   :  { %v6488_v11 = vpop.f32.mrf.mxu1 }
 0x5d2   :  { %v1759_v21 = vmax.f32 %v6477_v63, %v6488_v11 }
 0x5d3   :  { %v1749_v25 = vpop.f32.mrf.mxu1 }
 0x5d4   :  { %v1761_v24 = vmax.f32 %v1759_v21, 0.0  ;;  %v1758_v18 = vmax.f32 %v1670_v0, %v1749_v25  ;;  %v2355_v21 = vld [vmem:[%s8724_s1 + $0x168] sm:$0xff]  ;;  %v2354_v25 = vld [vmem:[%s8724_s1 + $0x160] sm:$0xff] }
 0x5d6   :  { %v1760_v15 = vmax.f32 %v1758_v18, 0.0  ;;  %6489 = vmatprep.subr.mxu1 %v1761_v24  ;;  %6518 = vmatprep.subr.mxu0 %v1761_v24  ;;  %v5669_v18 = vsel %vm2584_vm1, 1.0, %v7107_v16 }
 0x5d7   :  { %6490 = vmatpush3.msra.mxu1 %v1761_v24 }
 0x5d8   :  { %6491 = vmatprep.subr.mxu1 %v1760_v15 }
 0x5d9   :  { %6492 = vmatpush3.msra.mxu1 %v1760_v15 }
 0x5da   :  { %6494 = vmatmul.mubr.msk.f32.vlgmr.msra.gmra.mxu1 %vm1779_vm10, %v5649_v5  ;;  %6507 = vmatprep.subr.mxu1 %v1765_v1 }
 0x5db   :  { %6508 = vmatpush3.msra.mxu1 %v1765_v1  ;;  %6515 = vmatprep.mubr.msk.f32.mxu1 %vm1073_vm14, %v1760_v15  ;;  %v2661_v1 = vld [vmem:[%s8724_s1 + $0x178] sm:$0xff] }
 0x5dc   :  { %6509 = vmatprep.subr.mxu1 %v1764_v2 }
 0x5dd   :  { %6510 = vmatpush3.msra.mxu1 %v1764_v2  ;;  %v2660_v2 = vld [vmem:[%s8724_s1 + $0x170] sm:$0xff] }
 0x5de   :  { %6511 = vmatprep.subr.mxu1 %v1763_v12 }
 0x5df   :  { %6512 = vmatpush3.msra.mxu1 %v1763_v12 }
 0x5e0   :  { %6513 = vmatprep.subr.mxu1 %v1762_v31 }
 0x5e1   :  { %6514 = vmatpush3.msra.mxu1 %v1762_v31 }
 0x5e2   :  { %6516 = vmatmul.mubr.msk.f32.vlgmr.msra.gmra.mxu1 %vm1073_vm14, %v1761_v24  ;;  %6536 = vmatprep.subr.mxu1 %v7107_v16 }
 0x5e3   :  { %6540 = vmatprep.mubr.msk.f32.mxu1 %vm7108_vm11, %v7107_v16 }
 0x69a   :  { %v6495_v32 = vpop.f32.mrf.mxu1 }
 0x69c   :  { %v1852_v33 = vpop.f32.mrf.mxu1 }
 0x69d   :  { %6504 = vmatprep.mubr.msk.f32.mxu0 %vm1073_vm14, %v1852_v33 }
 0x69e   :  { %6505 = vmatmul.mubr.msk.f32.vlgmr.msra.gmra.mxu0 %vm1073_vm14, %v6495_v32 }
 0x69f   :  { %6519 = vmatpush3.msra.mxu0 %v1761_v24  ;;  %6522 = vmatprep.mubr.msk.f32.mxu0 %vm1779_vm10, %v5656_v29 }
 0x6a0   :  { %6520 = vmatprep.subr.mxu0 %v1760_v15 }
 0x6a1   :  { %6521 = vmatpush3.msra.mxu0 %v1760_v15 }
 0x6a2   :  { %6523 = vmatmul.mubr.msk.f32.vlgmr.msra.gmra.mxu0 %vm1779_vm10, %v5657_v34  ;;  %6525 = vmatprep.subr.mxu0 %v2117_v42  ;;  %v6517_v27 = vpop.f32.mrf.mxu1 }
 0x6a3   :  { %6526 = vmatpush3.msra.mxu0 %v2117_v42  ;;  %v5672_v42 = vld [vmem:[%s8724_s1 + $0x180] ss:$0 sm:$0xff] }
 0x6a4   :  { %6527 = vmatprep.subr.mxu0 %v2116_v46  ;;  %v2018_v28 = vpop.f32.mrf.mxu1 }
 0x6a5   :  { %6528 = vmatpush3.msra.mxu0 %v2116_v46 }
 0x6a6   :  { %6529 = vmatprep.subr.mxu0 %v2115_v47 }
 0x6a7   :  { %6530 = vmatpush3.msra.mxu0 %v2115_v47 }
 0x6a8   :  { %6531 = vmatprep.subr.mxu0 %v2114_v30 }
 0x6a9   :  { %6532 = vmatpush3.msra.mxu0 %v2114_v30 }
 0x6aa   :  { %6550 = vmatprep.subr.mxu0 %v7107_v16 }
 0x75e   :  { %v6506_v43 = vpop.f32.mrf.mxu0 }
 0x75f   :  { %v2024_v19 = vadd.f32 %v6517_v27, %v6506_v43  ;;  %v2889_v43 = vld [vmem:[%s8724_s1 + $0x188] sm:$0xff] }
 0x760   :  { %v1937_v49 = vpop.f32.mrf.mxu0 }
 0x761   :  { %v2019_v53 = vadd.f32 %v2018_v28, %v1937_v49  ;;  %v7873_v28 = vmul.u32 2, %v7138_v4 }
 0x762   :  { %v6524_v13 = vpop.f32.mrf.mxu0 }
 0x763   :  { %vm2963_vm15 = vcmp.eq.s32.totalorder %v7136_v3, %v7873_v28 }
 0x764   :  { %v2105_v50 = vpop.f32.mrf.mxu0 }
 0x765   :  { %6533 = vmatprep.mubr.msk.f32.mxu0 %vm1073_vm14, %v2105_v50 }
 0x766   :  { %6534 = vmatmul.mubr.msk.f32.vlgmr.msra.gmra.mxu0 %vm1073_vm14, %v6524_v13 }
 0x767   :  { %6552 = vmatprep.mubr.msk.f32.mxu0 %vm7108_vm11, %v7107_v16 }
 0x826   :  { %v6535_v38 = vpop.f32.mrf.mxu0 }
 0x827   :  { %v2200_v54 = vadd.f32 %v6535_v38, %v2024_v19  ;;  %v7876_v38 = vadd.s32 1, %v7873_v28 }
 0x828   :  { %v2190_v55 = vpop.f32.mrf.mxu0 }
 0x829   :  { %v2207_v56 = vadd.f32 %v5662_v52, %v2200_v54  ;;  %v2199_v57 = vadd.f32 %v2190_v55, %v2019_v53  ;;  %vm3038_vm4 = vcmp.eq.s32.totalorder %v7136_v3, %v7876_v38  ;;  %v7886_v53 = vsel %vm2963_vm15, 1.0, %v7107_v16 }
 0x82b   :  { %v2206_v58 = vadd.f32 %v5662_v52, %v2199_v57  ;;  %6537 = vmatpush3.msra.mxu1 %v2207_v56  ;;  %v7883_v52 = vsel %vm3038_vm4, 1.0, %v7107_v16 }
 0x82c   :  { %6538 = vmatprep.subr.mxu1 %v7107_v16 }
 0x82d   :  { %6539 = vmatpush3.msra.mxu1 %v2206_v58 }
 0x82e   :  { %6541 = vmatmul.mubr.msk.f32.vlgmr.msra.gmra.mxu1 %vm1779_vm10, %v7451_v9  ;;  %6543 = vmatprep.subr.mxu1 %v7107_v16 }
 0x82f   :  { %6544 = vmatpush3.msra.mxu1 %v2207_v56  ;;  %6547 = vmatprep.mubr.msk.f32.mxu1 %vm7108_vm11, %v7107_v16 }
 0x830   :  { %6545 = vmatprep.subr.mxu1 %v7107_v16 }
 0x831   :  { %6546 = vmatpush3.msra.mxu1 %v2206_v58  ;;  %v3205_v58 = vld [vmem:[%s8724_s1 + $0x1a0] sm:$0xff] }
 0x832   :  { %6548 = vmatmul.mubr.msk.f32.vlgmr.msra.gmra.mxu1 %vm1779_vm10, %v7454_v23  ;;  %6555 = vmatprep.subr.mxu1 %v7107_v16 }
 0x833   :  { %6559 = vmatprep.mubr.msk.f32.mxu1 %vm7108_vm11, %v7107_v16  ;;  %6556 = vmatpush3.msra.mxu1 %v2437_v59  ;;  %v3288_v59 = vld [vmem:[%s8724_s1 + $0x1a8] sm:$0xff] }
 0x834   :  { %6557 = vmatprep.subr.mxu1 %v7107_v16 }
 0x835   :  { %6558 = vmatpush3.msra.mxu1 %v2436_v39 }
 0x836   :  { %6569 = vmatprep.subr.mxu1 %v7107_v16 }
 0x8ee   :  { %v2276_v60 = vpop.f32.mrf.mxu1 }
 0x8f0   :  { %v6542_v61 = vpop.f32.mrf.mxu1 }
 0x8f2   :  { %v2348_v62 = vpop.f32.mrf.mxu1 }
 0x8f3   :  { %v2352_v63 = vmax.f32 %v2276_v60, %v2348_v62 }
 0x8f4   :  { %v6549_v0 = vpop.f32.mrf.mxu1 }
 0x8f5   :  { %v2353_v11 = vmax.f32 %v2352_v63, 0.0 }
 0x8f7   :  { %6551 = vmatpush3.msra.mxu0 %v2353_v11 }
 0x8f8   :  { %6553 = vmatmul.mubr.msk.f32.vlgmr.msra.gmra.mxu0 %vm227_vm13, %v5665_v17  ;;  %6562 = vmatprep.subr.mxu0 %v7107_v16  ;;  %v3547_v17 = vld [vmem:[%s8724_s1 + $0x1b0] sm:$0xff] }
 0x8f9   :  { %6563 = vmatpush3.msra.mxu0 %v2355_v21  ;;  %6566 = vmatprep.mubr.msk.f32.mxu0 %vm7108_vm11, %v7107_v16  ;;  %v7109_v21 = vmov 0  }
 0x8fa   :  { %6564 = vmatprep.subr.mxu0 %v7107_v16 }
 0x8fb   :  { %6565 = vmatpush3.msra.mxu0 %v2354_v25  ;;  %v3203_v25 = vsel %vm3202_vm5, 1, %v7109_v21 }
 0x8fc   :  { %6567 = vmatmul.mubr.msk.f32.vlgmr.msra.gmra.mxu0 %vm1779_vm10, %v2353_v11  ;;  %6574 = vmatprep.subr.mxu0 %v7107_v16 }
 0x8fd   :  { %6578 = vmatprep.mubr.msk.f32.mxu0 %vm7108_vm11, %v7107_v16  ;;  %6575 = vmatpush3.msra.mxu0 %v2661_v1 }
 0x8fe   :  { %6576 = vmatprep.subr.mxu0 %v7107_v16 }
 0x8ff   :  { %6577 = vmatpush3.msra.mxu0 %v2660_v2 }
 0x900   :  { %6586 = vmatprep.subr.mxu0 %v7107_v16 }
 0x9b8   :  { %v2432_v6 = vpop.f32.mrf.mxu0 }
 0x9b9   :  { %6560 = vmatmul.mubr.msk.f32.vlgmr.msra.gmra.mxu1 %vm1779_vm10, %v2432_v6  ;;  %v3204_v6 = vadd.s32 %v3203_v25, %v7873_v28 }
 0x9ba   :  { %6570 = vmatpush3.msra.mxu1 %v2353_v11  ;;  %v6554_v24 = vpop.f32.mrf.mxu0  ;;  %6571 = vmatprep.mubr.msk.f32.mxu1 %vm7108_vm11, %v7107_v16 }
 0x9bb   :  { %6581 = vmatprep.subr.mxu1 %v7107_v16  ;;  %v3359_v24 = vadd.s32 1, %v3204_v6  ;;  %vm3279_vm4 = vcmp.eq.s32.totalorder %v7136_v3, %v3204_v6  ;;  %vm3280_vm15 = vcmp.eq.s32.totalorder %v7152_v7, %v3204_v6 }
 0x9bc   :  { %v2580_v15 = vpop.f32.mrf.mxu0 }
 0x9bd   :  { %6572 = vmatmul.mubr.msk.f32.vlgmr.msra.gmra.mxu1 %vm227_vm13, %v5669_v18  ;;  %vm3360_vm8 = vcmp.eq.s32.totalorder %v7136_v3, %v3359_v24  ;;  %vm3361_vm7 = vcmp.eq.s32.totalorder %v7152_v7, %v3359_v24  ;;  %vm3362_vm1 = vcmp.eq.s32.totalorder %v7155_v8, %v3359_v24 }
 0x9be   :  { %v6568_v5 = vpop.f32.mrf.mxu0  ;;  %6583 = vmatprep.mubr.msk.f32.mxu1 %vm7108_vm11, %v7107_v16  ;;  %v5689_v18 = vsel %vm3360_vm8, 1.0, %v7107_v16 }
 0xa79   :  { %v2507_v12 = vpop.f32.mrf.mxu1 }
 0xa7a   :  { %v2581_v29 = vadd.f32 %v2580_v15, %v2507_v12  ;;  %v5690_v12 = vsel %vm3361_vm7, 1.0, %v7107_v16 }
 0xa7b   :  { %v6561_v31 = vpop.f32.mrf.mxu1 }
 0xa7d   :  { %v2656_v32 = vpop.f32.mrf.mxu1 }
 0xa7e   :  { %6579 = vmatmul.mubr.msk.f32.vlgmr.msra.gmra.mxu0 %vm1779_vm10, %v2656_v32 }
 0xa7f   :  { %v6573_v33 = vpop.f32.mrf.mxu1  ;;  %6588 = vmatprep.mubr.msk.f32.mxu0 %vm7108_vm11, %v7107_v16 }
 0xa80   :  { %v5691_v33 = vsel %vm3362_vm1, 1.0, %v7107_v16  ;;  %vm3943_vm1 = vcmask 1041408  }
 0xb3e   :  { %v2731_v34 = vpop.f32.mrf.mxu0 }
 0xb3f   :  { %v2735_v46 = vadd.f32 %v2731_v34, %v2581_v29  ;;  %v5685_v29 = vsel %vm3279_vm4, 1.0, %v7107_v16  ;;  %v5686_v34 = vsel %vm3280_vm15, 1.0, %v7107_v16  ;;  %vm3916_vm4 = vcmp.eq.s32.totalorder %v7152_v7, %v7876_v38 }
 0xb40   :  { %v6580_v47 = vpop.f32.mrf.mxu0  ;;  %vm3822_vm15 = vcmp.eq.s32.totalorder %v7152_v7, %v7873_v28 }
 0xb41   :  { %v2741_v30 = vadd.f32 %v5672_v42, %v2735_v46  ;;  %v3618_v42 = vadd.s32 2, %v3204_v6 }
 0xb43   :  { %6582 = vmatpush3.msra.mxu1 %v2741_v30  ;;  %6587 = vmatpush3.msra.mxu0 %v2741_v30  ;;  %vm3619_vm5 = vcmp.eq.s32.totalorder %v7136_v3, %v3618_v42  ;;  %vm3620_vm8 = vcmp.eq.s32.totalorder %v7152_v7, %v3618_v42  ;;  %vm3621_vm7 = vcmp.eq.s32.totalorder %v7155_v8, %v3618_v42 }
 0xb44   :  { %6584 = vmatmul.mubr.msk.f32.vlgmr.msra.gmra.mxu1 %vm227_vm13, %v7451_v9  ;;  %6589 = vmatmul.mubr.msk.f32.vlgmr.msra.gmra.mxu0 %vm227_vm13, %v7454_v23  ;;  %v2966_v9 = vld [vmem:[%s8724_s1 + $0x190] sm:$0xff]  ;;  %v5699_v47 = vsel %vm3619_vm5, 1.0, %v7107_v16  ;;  %v5700_v30 = vsel %vm3620_vm8, 1.0, %v7107_v16  ;;  %vm3823_vm5 = vcmp.eq.s32.totalorder %v7155_v8, %v7873_v28  ;;  %vm3918_vm8 = vcmp.eq.s32.totalorder %v7167_v10, %v7876_v38 }
 0xb45   :  { %6591 = vmatprep.subr.mxu1 %v7107_v16  ;;  %6596 = vmatprep.subr.mxu0 %v7107_v16 }
 0xb46   :  { %6593 = vmatprep.mubr.msk.f32.mxu1 %vm7108_vm11, %v7107_v16  ;;  %6598 = vmatprep.mubr.msk.f32.mxu0 %vm7108_vm11, %v7107_v16 }
 0xb47   :  { %6592 = vmatpush3.msra.mxu1 %v2889_v43  ;;  %6597 = vmatpush3.msra.mxu0 %v2966_v9  ;;  %v5701_v43 = vsel %vm3621_vm7, 1.0, %v7107_v16  ;;  %v3732_v9 = vld [vmem:[%s8724_s1 + $0x1c8] sm:$0xff]  ;;  %vm3824_vm7 = vcmp.eq.s32.totalorder %v7167_v10, %v7873_v28 }
 0xb48   :  { %6601 = vmatprep.subr.mxu1 %v7107_v16  ;;  %6606 = vmatprep.subr.mxu0 %v7107_v16 }
 0xc04   :  { %v2810_v23 = vpop.f32.mrf.mxu1  ;;  %v2882_v49 = vpop.f32.mrf.mxu0 }
 0xc05   :  { %v2886_v13 = vmax.f32 %v2810_v23, %v2882_v49  ;;  %v3835_v23 = vld [vmem:[%s8724_s1 + $0x1d8] sm:$0xff]  ;;  %v3731_v49 = vld [vmem:[%s8724_s1 + $0x1c0] sm:$0xff] }
 0xc06   :  { %v6585_v50 = vpop.f32.mrf.mxu1  ;;  %v6590_v27 = vpop.f32.mrf.mxu0 }
 0xc07   :  { %v2887_v19 = vmax.f32 %v2886_v13, 0.0  ;;  %v3834_v13 = vld [vmem:[%s8724_s1 + $0x1d0] sm:$0xff] }
 0xc09   :  { %6594 = vmatmul.mubr.msk.f32.vlgmr.msra.gmra.mxu1 %vm227_vm13, %v2887_v19  ;;  %6599 = vmatmul.mubr.msk.f32.vlgmr.msra.gmra.mxu0 %vm227_vm13, %v2887_v19 }
 0xc0a   :  { %6603 = vmatprep.mubr.msk.f32.mxu1 %vm7108_vm11, %v7107_v16  ;;  %6608 = vmatprep.mubr.msk.f32.mxu0 %vm7108_vm11, %v7107_v16 }
 0xcc9   :  { %v2959_v54 = vpop.f32.mrf.mxu1  ;;  %v3033_v55 = vpop.f32.mrf.mxu0 }
 0xcca   :  { %6602 = vmatpush3.msk.msra.mxu1 %vm3045_vm2, %v3033_v55  ;;  %6607 = vmatpush3.msk.msra.mxu0 %vm3045_vm2, %v2959_v54 }
 0xccb   :  { %v6595_v56 = vpop.f32.mrf.mxu1  ;;  %v6600_v57 = vpop.f32.mrf.mxu0  ;;  %6604 = vmatmul.mubr.msk.f32.vlgmr.msra.gmra.mxu1 %vm3041_vm9, %v7883_v52  ;;  %6609 = vmatmul.mubr.msk.f32.vlgmr.msra.gmra.mxu0 %vm3041_vm9, %v7886_v53  ;;  %vm3281_vm9 = vcmp.eq.s32.totalorder %v7155_v8, %v3204_v6 }
 0xccc   :  { %6611 = vmatprep.subr.mxu1 %v7107_v16  ;;  %6616 = vmatprep.subr.mxu0 %v7107_v16  ;;  %v5687_v46 = vsel %vm3281_vm9, 1.0, %v7107_v16  ;;  %vm3917_vm9 = vcmp.eq.s32.totalorder %v7155_v8, %v7876_v38 }
 0xccd   :  { %6613 = vmatprep.mubr.msk.f32.mxu1 %vm7108_vm11, %v7107_v16  ;;  %6618 = vmatprep.mubr.msk.f32.mxu0 %vm7108_vm11, %v7107_v16 }
 0xcce   :  { %6612 = vmatpush3.msra.mxu1 %v3205_v58  ;;  %6617 = vmatpush3.msra.mxu0 %v3288_v59 }
 0xccf   :  { %6643 = vmatprep.subr.mxu1 %v7107_v16  ;;  %6621 = vmatprep.subr.mxu0 %v7107_v16 }
 0xd8b   :  { %v3115_v39 = vpop.f32.mrf.mxu1  ;;  %v3191_v60 = vpop.f32.mrf.mxu0 }
 0xd8c   :  { %v3192_v61 = vadd.f32 %v3191_v60, %v3115_v39 }
 0xd8d   :  { %v6605_v62 = vpop.f32.mrf.mxu1  ;;  %v6610_v63 = vpop.f32.mrf.mxu0 }
 0xd8e   :  { %v3200_v0 = vadd.f32 %v5683_v51, %v3192_v61  ;;  %v5705_v63 = vld [vmem:[%s8724_s1 + $0x1b8] ss:$0 sm:$0xff] }
 0xd90   :  { %v3201_v11 = vmax.f32 %v3200_v0, 0.0 }
 0xd92   :  { %6614 = vmatmul.mubr.msk.f32.vlgmr.msra.gmra.mxu1 %vm227_vm13, %v3201_v11  ;;  %6619 = vmatmul.mubr.msk.f32.vlgmr.msra.gmra.mxu0 %vm227_vm13, %v3201_v11 }
 0xd93   :  { %6644 = vmatpush3.msra.mxu1 %v3547_v17  ;;  %6645 = vmatprep.mubr.msk.f32.mxu1 %vm7108_vm11, %v7107_v16 }
 0xd94   :  { %6623 = vmatprep.mubr.msk.f32.mxu0 %vm7108_vm11, %v7107_v16  ;;  %6659 = vmatprep.subr.mxu1 %v7107_v16 }
 0xd96   :  { %6646 = vmatmul.mubr.msk.f32.vlgmr.msra.gmra.mxu1 %vm227_vm13, %v3201_v11 }
 0xd97   :  { %6663 = vmatprep.mubr.msk.f32.mxu1 %vm7108_vm11, %v7107_v16  ;;  %6660 = vmatpush3.msra.mxu1 %v3732_v9 }
 0xd98   :  { %6661 = vmatprep.subr.mxu1 %v7107_v16 }
 0xd99   :  { %6662 = vmatpush3.msra.mxu1 %v3731_v49 }
 0xd9a   :  { %6685 = vmatprep.subr.mxu1 %v7107_v16 }
 0xe52   :  { %v3275_v15 = vpop.f32.mrf.mxu1  ;;  %v3355_v5 = vpop.f32.mrf.mxu0 }
 0xe53   :  { %6622 = vmatpush3.msra.mxu0 %v3355_v5 }
 0xe54   :  { %v6615_v1 = vpop.f32.mrf.mxu1  ;;  %v6620_v2 = vpop.f32.mrf.mxu0  ;;  %6624 = vmatmul.mubr.msk.f32.vlgmr.msra.gmra.mxu0 %vm227_vm13, %v5689_v18  ;;  %6632 = vmatprep.subr.mxu0 %v7107_v16 }
 0xe55   :  { %6633 = vmatpush3.msra.mxu0 %v3275_v15  ;;  %6626 = vmatprep.mubr.msk.f32.mxu0 %vm7108_vm11, %v7107_v16 }
 0xe56   :  { %v3614_v31 = vpop.f32.mrf.mxu1  ;;  %6648 = vmatprep.subr.mxu0 %v7107_v16 }
 0xe58   :  { %6627 = vmatmul.mubr.msk.f32.gmra.mxu0 %vm227_vm13, %v5690_v12  ;;  %v6647_v32 = vpop.f32.mrf.mxu1 }
 0xe59   :  { %6629 = vmatprep.mubr.msk.f32.mxu0 %vm7108_vm11, %v7107_v16 }
 0xe5c   :  { %6630 = vmatmul.mubr.msk.f32.gmra.mxu0 %vm227_vm13, %v5691_v33 }
 0xe5d   :  { %6634 = vmatprep.mubr.msk.f32.mxu0 %vm7108_vm11, %v7107_v16 }
 0xe60   :  { %6635 = vmatmul.mubr.msk.f32.vlgmr.msra.gmra.mxu0 %vm227_vm13, %v5685_v29 }
 0xe61   :  { %6649 = vmatpush3.msra.mxu0 %v3614_v31  ;;  %6637 = vmatprep.mubr.msk.f32.mxu0 %vm7108_vm11, %v7107_v16 }
 0xe62   :  { %6672 = vmatprep.subr.mxu0 %v7107_v16 }
 0xe64   :  { %6638 = vmatmul.mubr.msk.f32.gmra.mxu0 %vm227_vm13, %v5686_v34 }
 0xe65   :  { %6640 = vmatprep.mubr.msk.f32.mxu0 %vm7108_vm11, %v7107_v16 }
 0xe68   :  { %6641 = vmatmul.mubr.msk.f32.gmra.mxu0 %vm227_vm13, %v5687_v46 }
 0xe69   :  { %6650 = vmatprep.mubr.msk.f32.mxu0 %vm7108_vm11, %v7107_v16 }
 0xe6c   :  { %6651 = vmatmul.mubr.msk.f32.vlgmr.msra.gmra.mxu0 %vm227_vm13, %v5699_v47 }
 0xe6d   :  { %6653 = vmatprep.mubr.msk.f32.mxu0 %vm7108_vm11, %v7107_v16  ;;  %6673 = vmatpush3.msra.mxu0 %v3835_v23 }
 0xe6e   :  { %6674 = vmatprep.subr.mxu0 %v7107_v16 }
 0xe6f   :  { %6675 = vmatpush3.msra.mxu0 %v3834_v13 }
 0xe70   :  { %6654 = vmatmul.mubr.msk.f32.gmra.mxu0 %vm227_vm13, %v5700_v30  ;;  %6706 = vmatprep.subr.mxu0 %v7107_v16 }
 0xe71   :  { %6656 = vmatprep.mubr.msk.f32.mxu0 %vm7108_vm11, %v7107_v16 }
 0xe74   :  { %6657 = vmatmul.mubr.msk.f32.gmra.mxu0 %vm227_vm13, %v5701_v43 }
 0xe75   :  { %6676 = vmatprep.mubr.msk.f32.mxu0 %vm7108_vm11, %v7107_v16 }
 0xf14   :  { %v3444_v50 = vpop.f32.mrf.mxu0 }
 0xf16   :  { %v6625_v27 = vpop.f32.mrf.mxu0 }
 0xf17   :  { %v8026_v27 = vsel %vm3916_vm4, 1.0, %v7107_v16  ;;  %vm3825_vm4 = vcmp.eq.s32.totalorder %v7184_v14, %v7873_v28 }
 0xf18   :  { %v3449_v19 = vpop.f32.mrf.mxu0 }
 0xf1a   :  { %v6628_v54 = vpop.f32.mrf.mxu0 }
 0xf1b   :  { %v8046_v54 = vsel %vm3917_vm9, 1.0, %v7107_v16  ;;  %vm4270_vm9 = vcmp.eq.s32.totalorder %v7219_v22, %v7873_v28 }
 0xf1c   :  { %v3454_v55 = vpop.f32.mrf.mxu0 }
 0xf1e   :  { %v6631_v56 = vpop.f32.mrf.mxu0 }
 0xf1f   :  { %v8064_v56 = vsel %vm3918_vm8, 1.0, %v7107_v16  ;;  %vm4271_vm8 = vcmp.eq.s32.totalorder %v7248_v26, %v7873_v28 }
 0xf20   :  { %v3533_v57 = vpop.f32.mrf.mxu0 }
 0xf21   :  { %v3534_v61 = vadd.f32 %v3533_v57, %v3444_v50  ;;  %v8067_v57 = vsel %vm3824_vm7, 1.0, %v7107_v16 }
 0xf22   :  { %v6636_v58 = vpop.f32.mrf.mxu0 }
 0xf24   :  { %v3538_v59 = vpop.f32.mrf.mxu0 }
 0xf25   :  { %v3539_v17 = vadd.f32 %v3538_v59, %v3449_v19  ;;  %v8029_v19 = vsel %vm3822_vm15, 1.0, %v7107_v16  ;;  %v8085_v59 = vsel %vm3825_vm4, 1.0, %v7107_v16  ;;  %vm4376_vm15 = vcmp.eq.s32.totalorder %v7219_v22, %v7876_v38 }
 0xf26   :  { %v6639_v39 = vpop.f32.mrf.mxu0  ;;  %vm4709_vm4 = vcmask 588800  }
 0xf27   :  { %v4163_v39 = vld [vmem:[%s8724_s1 + $0x200] sm:$0xff] }
 0xf28   :  { %v3543_v60 = vpop.f32.mrf.mxu0 }
 0xf29   :  { %v3544_v15 = vadd.f32 %v3543_v60, %v3454_v55  ;;  %v8049_v55 = vsel %vm3823_vm5, 1.0, %v7107_v16  ;;  %v4284_v60 = vld [vmem:[%s8724_s1 + $0x220] sm:$0xff]  ;;  %vm4377_vm5 = vcmp.eq.s32.totalorder %v7248_v26, %v7876_v38 }
 0xf2a   :  { %v6642_v51 = vpop.f32.mrf.mxu0 }
 0xf2b   :  { %v4162_v51 = vld [vmem:[%s8724_s1 + $0x1f8] sm:$0xff] }
 0xf2c   :  { %v3703_v62 = vpop.f32.mrf.mxu0 }
 0xf2d   :  { %v3717_v0 = vadd.f32 %v3703_v62, %v3534_v61  ;;  %v4283_v61 = vld [vmem:[%s8724_s1 + $0x218] sm:$0xff]  ;;  %v4161_v62 = vld [vmem:[%s8724_s1 + $0x1f0] sm:$0xff] }
 0xf2e   :  { %v6652_v11 = vpop.f32.mrf.mxu0 }
 0xf2f   :  { %v3725_v21 = vadd.f32 %v5705_v63, %v3717_v0  ;;  %v4160_v0 = vld [vmem:[%s8724_s1 + $0x1e8] sm:$0xff] }
 0xf30   :  { %v3708_v25 = vpop.f32.mrf.mxu0  ;;  %v4281_v11 = vld [vmem:[%s8724_s1 + $0x208] sm:$0xff] }
 0xf31   :  { %v3728_v6 = vmax.f32 %v3725_v21, 0.0  ;;  %v3718_v24 = vadd.f32 %v3708_v25, %v3539_v17  ;;  %v5732_v25 = vld [vmem:[%s8724_s1 + $0x1e0] ss:$0 sm:$0xff] }
 0xf32   :  { %v6655_v18 = vpop.f32.mrf.mxu0 }
 0xf33   :  { %v3726_v5 = vadd.f32 %v5705_v63, %v3718_v24  ;;  %6664 = vmatmul.mubr.msk.f32.vlgmr.msra.gmra.mxu1 %vm1779_vm10, %v3728_v6  ;;  %6677 = vmatmul.mubr.msk.f32.vlgmr.msra.gmra.mxu0 %vm1779_vm10, %v3728_v6 }
 0xf34   :  { %v3713_v1 = vpop.f32.mrf.mxu0  ;;  %6666 = vmatprep.mubr.msk.f32.mxu1 %vm7108_vm11, %v7107_v16  ;;  %6679 = vmatprep.mubr.msk.f32.mxu0 %vm7108_vm11, %v7107_v16 }
 0xf35   :  { %v3729_v2 = vmax.f32 %v3726_v5, 0.0  ;;  %v3719_v12 = vadd.f32 %v3713_v1, %v3544_v15 }
 0xf36   :  { %v6658_v31 = vpop.f32.mrf.mxu0 }
 0xf37   :  { %v3727_v32 = vadd.f32 %v5705_v63, %v3719_v12  ;;  %6667 = vmatmul.mubr.msk.f32.gmra.mxu1 %vm1779_vm10, %v3729_v2  ;;  %6680 = vmatmul.mubr.msk.f32.gmra.mxu0 %vm1779_vm10, %v3729_v2  ;;  %v4282_v63 = vld [vmem:[%s8724_s1 + $0x210] sm:$0xff] }
 0xf38   :  { %6669 = vmatprep.mubr.msk.f32.mxu1 %vm7108_vm11, %v7107_v16  ;;  %6682 = vmatprep.mubr.msk.f32.mxu0 %vm7108_vm11, %v7107_v16 }
 0xf39   :  { %v3730_v33 = vmax.f32 %v3727_v32, 0.0 }
 0xf3b   :  { %6670 = vmatmul.mubr.msk.f32.gmra.mxu1 %vm1779_vm10, %v3730_v33  ;;  %6683 = vmatmul.mubr.msk.f32.gmra.mxu0 %vm1779_vm10, %v3730_v33  ;;  %vm3928_vm10 = vcmask 146432  }
 0xf3c   :  { %6691 = vmatprep.mubr.msk.f32.mxu1 %vm7108_vm11, %v7107_v16  ;;  %6712 = vmatprep.mubr.msk.f32.mxu0 %vm7108_vm11, %v7107_v16 }
 0xff3   :  { %v3808_v29 = vpop.f32.mrf.mxu1  ;;  %v3902_v34 = vpop.f32.mrf.mxu0 }
 0xff5   :  { %v6665_v42 = vpop.f32.mrf.mxu1  ;;  %v6678_v46 = vpop.f32.mrf.mxu0 }
 0xff7   :  { %v3813_v47 = vpop.f32.mrf.mxu1  ;;  %v3907_v30 = vpop.f32.mrf.mxu0 }
 0xff9   :  { %v6668_v43 = vpop.f32.mrf.mxu1  ;;  %v6681_v9 = vpop.f32.mrf.mxu0 }
 0xffb   :  { %v3818_v23 = vpop.f32.mrf.mxu1  ;;  %v3912_v49 = vpop.f32.mrf.mxu0 }
 0xffc   :  { %6686 = vmatpush3.msk.msra.mxu1 %vm3943_vm1, %v3912_v49  ;;  %6707 = vmatpush3.msk.msra.mxu0 %vm3943_vm1, %v3818_v23  ;;  %vm3919_vm1 = vcmp.eq.s32.totalorder %v7184_v14, %v7876_v38 }
 0xffd   :  { %v6671_v13 = vpop.f32.mrf.mxu1  ;;  %v6684_v50 = vpop.f32.mrf.mxu0  ;;  %6687 = vmatprep.subr.mxu1 %v7107_v16  ;;  %6708 = vmatprep.subr.mxu0 %v7107_v16  ;;  %v8082_v58 = vsel %vm3919_vm1, 1.0, %v7107_v16 }
 0xffe   :  { %6688 = vmatpush3.msra.mxu1 %v3907_v30  ;;  %6709 = vmatpush3.msra.mxu0 %v3813_v47 }
 0xfff   :  { %6689 = vmatprep.subr.mxu1 %v7107_v16  ;;  %6710 = vmatprep.subr.mxu0 %v7107_v16 }
0x1000   :  { %6690 = vmatpush3.msra.mxu1 %v3902_v34  ;;  %6711 = vmatpush3.msra.mxu0 %v3808_v29 }
0x1001   :  { %6692 = vmatmul.mubr.msk.f32.vlgmr.msra.gmra.mxu1 %vm3928_vm10, %v7883_v52  ;;  %6713 = vmatmul.mubr.msk.f32.vlgmr.msra.gmra.mxu0 %vm3928_vm10, %v7886_v53 }
0x1002   :  { %6694 = vmatprep.mubr.msk.f32.mxu1 %vm7108_vm11, %v7107_v16  ;;  %6715 = vmatprep.mubr.msk.f32.mxu0 %vm7108_vm11, %v7107_v16 }
0x1003   :  { %6727 = vmatprep.subr.mxu1 %v7107_v16  ;;  %6750 = vmatprep.subr.mxu0 %v7107_v16 }
0x1004   :  { %6728 = vmatpush3.msra.mxu1 %v4163_v39  ;;  %6751 = vmatpush3.msra.mxu0 %v4284_v60 }
0x1005   :  { %6695 = vmatmul.mubr.msk.f32.gmra.mxu1 %vm3928_vm10, %v8026_v27  ;;  %6716 = vmatmul.mubr.msk.f32.gmra.mxu0 %vm3928_vm10, %v8029_v19 }
0x1006   :  { %6697 = vmatprep.mubr.msk.f32.mxu1 %vm7108_vm11, %v7107_v16  ;;  %6718 = vmatprep.mubr.msk.f32.mxu0 %vm7108_vm11, %v7107_v16 }
0x1007   :  { %6729 = vmatprep.subr.mxu1 %v7107_v16  ;;  %6752 = vmatprep.subr.mxu0 %v7107_v16 }
0x1008   :  { %6730 = vmatpush3.msra.mxu1 %v4162_v51  ;;  %6753 = vmatpush3.msra.mxu0 %v4283_v61 }
0x1009   :  { %6698 = vmatmul.mubr.msk.f32.gmra.mxu1 %vm3928_vm10, %v8046_v54  ;;  %6719 = vmatmul.mubr.msk.f32.gmra.mxu0 %vm3928_vm10, %v8049_v55 }
0x100a   :  { %6700 = vmatprep.mubr.msk.f32.mxu1 %vm7108_vm11, %v7107_v16  ;;  %6721 = vmatprep.mubr.msk.f32.mxu0 %vm7108_vm11, %v7107_v16 }
0x100b   :  { %6731 = vmatprep.subr.mxu1 %v7107_v16  ;;  %6754 = vmatprep.subr.mxu0 %v7107_v16 }
0x100c   :  { %6732 = vmatpush3.msra.mxu1 %v4161_v62  ;;  %6755 = vmatpush3.msra.mxu0 %v4282_v63 }
0x100d   :  { %6701 = vmatmul.mubr.msk.f32.gmra.mxu1 %vm3928_vm10, %v8064_v56  ;;  %6722 = vmatmul.mubr.msk.f32.gmra.mxu0 %vm3928_vm10, %v8067_v57 }
0x100e   :  { %6703 = vmatprep.mubr.msk.f32.mxu1 %vm7108_vm11, %v7107_v16  ;;  %6724 = vmatprep.mubr.msk.f32.mxu0 %vm7108_vm11, %v7107_v16 }
0x100f   :  { %6733 = vmatprep.subr.mxu1 %v7107_v16  ;;  %6756 = vmatprep.subr.mxu0 %v7107_v16 }
0x1010   :  { %6734 = vmatpush3.msra.mxu1 %v4160_v0  ;;  %6757 = vmatpush3.msra.mxu0 %v4281_v11 }
0x1011   :  { %6704 = vmatmul.mubr.msk.f32.gmra.mxu1 %vm3928_vm10, %v8082_v58  ;;  %6725 = vmatmul.mubr.msk.f32.gmra.mxu0 %vm3928_vm10, %v8085_v59  ;;  %vm4269_vm10 = vcmp.eq.s32.totalorder %v7212_v20, %v7873_v28 }
0x1012   :  { %6735 = vmatprep.mubr.msk.f32.mxu1 %vm7108_vm11, %v7107_v16  ;;  %6758 = vmatprep.mubr.msk.f32.mxu0 %vm7108_vm11, %v7107_v16 }
0x1013   :  { %6773 = vmatprep.subr.mxu1 %v7107_v16  ;;  %6810 = vmatprep.subr.mxu0 %v7107_v16 }
0x10c1   :  { %v4013_v17 = vpop.f32.mrf.mxu1  ;;  %v4120_v21 = vpop.f32.mrf.mxu0 }
0x10c2   :  { %v4121_v6 = vadd.f32 %v4120_v21, %v4013_v17 }
0x10c3   :  { %v6693_v24 = vpop.f32.mrf.mxu1  ;;  %v6714_v18 = vpop.f32.mrf.mxu0 }
0x10c4   :  { %v4149_v15 = vadd.f32 %v5732_v25, %v4121_v6 }
0x10c5   :  { %v4018_v5 = vpop.f32.mrf.mxu1  ;;  %v4125_v1 = vpop.f32.mrf.mxu0 }
0x10c6   :  { %v4154_v2 = vmax.f32 %v4149_v15, 0.0  ;;  %v4126_v12 = vadd.f32 %v4125_v1, %v4018_v5 }
0x10c7   :  { %v6696_v31 = vpop.f32.mrf.mxu1  ;;  %v6717_v32 = vpop.f32.mrf.mxu0 }
0x10c8   :  { %v4150_v33 = vadd.f32 %v5732_v25, %v4126_v12  ;;  %6736 = vmatmul.mubr.msk.f32.vlgmr.msra.gmra.mxu1 %vm1073_vm14, %v4154_v2  ;;  %6759 = vmatmul.mubr.msk.f32.vlgmr.msra.gmra.mxu0 %vm1073_vm14, %v4154_v2 }
0x10c9   :  { %v4023_v29 = vpop.f32.mrf.mxu1  ;;  %v4130_v34 = vpop.f32.mrf.mxu0  ;;  %6738 = vmatprep.mubr.msk.f32.mxu1 %vm7108_vm11, %v7107_v16  ;;  %6761 = vmatprep.mubr.msk.f32.mxu0 %vm7108_vm11, %v7107_v16 }
0x10ca   :  { %v4155_v42 = vmax.f32 %v4150_v33, 0.0  ;;  %v4131_v46 = vadd.f32 %v4130_v34, %v4023_v29 }
0x10cb   :  { %v6699_v47 = vpop.f32.mrf.mxu1  ;;  %v6720_v30 = vpop.f32.mrf.mxu0 }
0x10cc   :  { %v4151_v43 = vadd.f32 %v5732_v25, %v4131_v46  ;;  %6739 = vmatmul.mubr.msk.f32.gmra.mxu1 %vm1073_vm14, %v4155_v42  ;;  %6762 = vmatmul.mubr.msk.f32.gmra.mxu0 %vm1073_vm14, %v4155_v42 }
0x10cd   :  { %v4028_v9 = vpop.f32.mrf.mxu1  ;;  %v4135_v23 = vpop.f32.mrf.mxu0  ;;  %6741 = vmatprep.mubr.msk.f32.mxu1 %vm7108_vm11, %v7107_v16  ;;  %6764 = vmatprep.mubr.msk.f32.mxu0 %vm7108_vm11, %v7107_v16 }
0x10ce   :  { %v4156_v49 = vmax.f32 %v4151_v43, 0.0  ;;  %v4136_v13 = vadd.f32 %v4135_v23, %v4028_v9 }
0x10cf   :  { %v6702_v50 = vpop.f32.mrf.mxu1  ;;  %v6723_v39 = vpop.f32.mrf.mxu0 }
0x10d0   :  { %v4152_v60 = vadd.f32 %v5732_v25, %v4136_v13  ;;  %6742 = vmatmul.mubr.msk.f32.gmra.mxu1 %vm1073_vm14, %v4156_v49  ;;  %6765 = vmatmul.mubr.msk.f32.gmra.mxu0 %vm1073_vm14, %v4156_v49  ;;  %v4851_v13 = vld [vmem:[%s8724_s1 + $0x290] sm:$0xff] }
0x10d1   :  { %v4033_v51 = vpop.f32.mrf.mxu1  ;;  %v4140_v61 = vpop.f32.mrf.mxu0  ;;  %6744 = vmatprep.mubr.msk.f32.mxu1 %vm7108_vm11, %v7107_v16  ;;  %6767 = vmatprep.mubr.msk.f32.mxu0 %vm7108_vm11, %v7107_v16 }
0x10d2   :  { %v4157_v62 = vmax.f32 %v4152_v60, 0.0  ;;  %v4141_v63 = vadd.f32 %v4140_v61, %v4033_v51  ;;  %v4850_v60 = vld [vmem:[%s8724_s1 + $0x288] sm:$0xff] }
0x10d3   :  { %v6705_v0 = vpop.f32.mrf.mxu1  ;;  %v6726_v11 = vpop.f32.mrf.mxu0 }
0x10d4   :  { %v4153_v17 = vadd.f32 %v5732_v25, %v4141_v63  ;;  %6745 = vmatmul.mubr.msk.f32.gmra.mxu1 %vm1073_vm14, %v4157_v62  ;;  %6768 = vmatmul.mubr.msk.f32.gmra.mxu0 %vm1073_vm14, %v4157_v62  ;;  %v4849_v62 = vld [vmem:[%s8724_s1 + $0x280] sm:$0xff]  ;;  %v4848_v11 = vld [vmem:[%s8724_s1 + $0x278] sm:$0xff] }
0x10d5   :  { %6747 = vmatprep.mubr.msk.f32.mxu1 %vm7108_vm11, %v7107_v16  ;;  %6770 = vmatprep.mubr.msk.f32.mxu0 %vm7108_vm11, %v7107_v16 }
0x10d6   :  { %v4158_v21 = vmax.f32 %v4153_v17, 0.0 }
0x10d8   :  { %6748 = vmatmul.mubr.msk.f32.gmra.mxu1 %vm1073_vm14, %v4158_v21  ;;  %6771 = vmatmul.mubr.msk.f32.gmra.mxu0 %vm1073_vm14, %v4158_v21  ;;  %vm4387_vm14 = vcmask 293888  }
0x10d9   :  { %6783 = vmatprep.mubr.msk.f32.mxu1 %vm7108_vm11, %v7107_v16  ;;  %6820 = vmatprep.mubr.msk.f32.mxu0 %vm7108_vm11, %v7107_v16 }
0x1188   :  { %v4245_v25 = vpop.f32.mrf.mxu1  ;;  %v4351_v6 = vpop.f32.mrf.mxu0 }
0x118a   :  { %v6737_v24 = vpop.f32.mrf.mxu1  ;;  %v6760_v18 = vpop.f32.mrf.mxu0 }
0x118c   :  { %v4250_v15 = vpop.f32.mrf.mxu1  ;;  %v4356_v5 = vpop.f32.mrf.mxu0 }
0x118e   :  { %v6740_v1 = vpop.f32.mrf.mxu1  ;;  %v6763_v2 = vpop.f32.mrf.mxu0 }
0x1190   :  { %v4255_v12 = vpop.f32.mrf.mxu1  ;;  %v4361_v31 = vpop.f32.mrf.mxu0 }
0x1192   :  { %v6743_v32 = vpop.f32.mrf.mxu1  ;;  %v6766_v33 = vpop.f32.mrf.mxu0 }
0x1194   :  { %v4260_v29 = vpop.f32.mrf.mxu1  ;;  %v4366_v34 = vpop.f32.mrf.mxu0 }
0x1196   :  { %v6746_v42 = vpop.f32.mrf.mxu1  ;;  %v6769_v46 = vpop.f32.mrf.mxu0 }
0x1198   :  { %v4265_v47 = vpop.f32.mrf.mxu1  ;;  %v4371_v30 = vpop.f32.mrf.mxu0 }
0x1199   :  { %6774 = vmatpush3.msk.msra.mxu1 %vm3045_vm2, %v4371_v30  ;;  %6811 = vmatpush3.msk.msra.mxu0 %vm3045_vm2, %v4265_v47  ;;  %vm4375_vm2 = vcmp.eq.s32.totalorder %v7212_v20, %v7876_v38 }
0x119a   :  { %v6749_v43 = vpop.f32.mrf.mxu1  ;;  %v6772_v9 = vpop.f32.mrf.mxu0  ;;  %6775 = vmatprep.subr.mxu1 %v7107_v16  ;;  %6812 = vmatprep.subr.mxu0 %v7107_v16 }
0x119b   :  { %6776 = vmatpush3.msra.mxu1 %v4366_v34  ;;  %6813 = vmatpush3.msra.mxu0 %v4260_v29 }
0x119c   :  { %6777 = vmatprep.subr.mxu1 %v7107_v16  ;;  %6814 = vmatprep.subr.mxu0 %v7107_v16 }
0x119d   :  { %6778 = vmatpush3.msra.mxu1 %v4361_v31  ;;  %6815 = vmatpush3.msra.mxu0 %v4255_v12 }
0x119e   :  { %6779 = vmatprep.subr.mxu1 %v7107_v16  ;;  %6816 = vmatprep.subr.mxu0 %v7107_v16 }
0x119f   :  { %6780 = vmatpush3.msra.mxu1 %v4356_v5  ;;  %6817 = vmatpush3.msra.mxu0 %v4250_v15 }
0x11a0   :  { %6781 = vmatprep.subr.mxu1 %v7107_v16  ;;  %6818 = vmatprep.subr.mxu0 %v7107_v16 }
0x11a1   :  { %6782 = vmatpush3.msra.mxu1 %v4351_v6  ;;  %6819 = vmatpush3.msra.mxu0 %v4245_v25  ;;  %v4847_v25 = vld [vmem:[%s8724_s1 + $0x270] sm:$0xff] }
0x11a2   :  { %6784 = vmatmul.mubr.msk.f32.vlgmr.msra.gmra.mxu1 %vm4387_vm14, %v7883_v52  ;;  %6821 = vmatmul.mubr.msk.f32.vlgmr.msra.gmra.mxu0 %vm4387_vm14, %v7886_v53  ;;  %v5747_v52 = vsel %vm4375_vm2, 1.0, %v7107_v16  ;;  %v5738_v53 = vsel %vm4269_vm10, 1.0, %v7107_v16  ;;  %vm8752_vm2 = vcmp.eq.s32.totalorder %v7138_v4, %v7352_v45 }
0x11a3   :  { %6786 = vmatprep.mubr.msk.f32.mxu1 %vm7108_vm11, %v7107_v16  ;;  %6823 = vmatprep.mubr.msk.f32.mxu0 %vm7108_vm11, %v7107_v16 }
0x11a4   :  { %6847 = vmatprep.subr.mxu1 %v7107_v16  ;;  %6892 = vmatprep.subr.mxu0 %v7107_v16 }
0x11a6   :  { %6787 = vmatmul.mubr.msk.f32.gmra.mxu1 %vm4387_vm14, %v8026_v27  ;;  %6824 = vmatmul.mubr.msk.f32.gmra.mxu0 %vm4387_vm14, %v8029_v19  ;;  %v5748_v27 = vsel %vm4376_vm15, 1.0, %v7107_v16  ;;  %v5739_v19 = vsel %vm4270_vm9, 1.0, %v7107_v16 }
0x11a7   :  { %6789 = vmatprep.mubr.msk.f32.mxu1 %vm7108_vm11, %v7107_v16  ;;  %6826 = vmatprep.mubr.msk.f32.mxu0 %vm7108_vm11, %v7107_v16 }
0x11aa   :  { %6790 = vmatmul.mubr.msk.f32.gmra.mxu1 %vm4387_vm14, %v8046_v54  ;;  %6827 = vmatmul.mubr.msk.f32.gmra.mxu0 %vm4387_vm14, %v8049_v55  ;;  %v8235_v54 = vadd.s32 64, %v7136_v3  ;;  %v5749_v55 = vsel %vm4377_vm5, 1.0, %v7107_v16 }
0x11ab   :  { %6792 = vmatprep.mubr.msk.f32.mxu1 %vm7108_vm11, %v7107_v16  ;;  %6829 = vmatprep.mubr.msk.f32.mxu0 %vm7108_vm11, %v7107_v16 }
0x11ac   :  { %vm4378_vm7 = vcmp.eq.s32.totalorder %v8235_v54, %v7876_v38  ;;  %vm4272_vm1 = vcmp.eq.s32.totalorder %v8235_v54, %v7873_v28  ;;  %v4854_v28 = vld [vmem:[%s8724_s1 + $0x2a8] sm:$0xff]  ;;  %v4853_v38 = vld [vmem:[%s8724_s1 + $0x2a0] sm:$0xff] }
0x11ad   :  { %6893 = vmatpush3.msra.mxu0 %v4854_v28  ;;  %v5771_v28 = vld [vmem:[%s8724_s1 + $0x228] ss:$0 sm:$0xff] }
0x11ae   :  { %6793 = vmatmul.mubr.msk.f32.gmra.mxu1 %vm4387_vm14, %v8064_v56  ;;  %6830 = vmatmul.mubr.msk.f32.gmra.mxu0 %vm4387_vm14, %v8067_v57  ;;  %v5740_v56 = vsel %vm4271_vm8, 1.0, %v7107_v16  ;;  %v5750_v57 = vsel %vm4378_vm7, 1.0, %v7107_v16 }
0x11af   :  { %6795 = vmatprep.mubr.msk.f32.mxu1 %vm7108_vm11, %v7107_v16  ;;  %6832 = vmatprep.mubr.msk.f32.mxu0 %vm7108_vm11, %v7107_v16 }
0x11b0   :  { %6894 = vmatprep.subr.mxu0 %v7107_v16 }
0x11b1   :  { %6895 = vmatpush3.msra.mxu0 %v4853_v38 }
0x11b2   :  { %6796 = vmatmul.mubr.msk.f32.gmra.mxu1 %vm4387_vm14, %v8082_v58  ;;  %6833 = vmatmul.mubr.msk.f32.gmra.mxu0 %vm4387_vm14, %v8085_v59  ;;  %v5741_v58 = vsel %vm4272_vm1, 1.0, %v7107_v16  ;;  %v4852_v59 = vld [vmem:[%s8724_s1 + $0x298] sm:$0xff] }
0x11b3   :  { %6798 = vmatprep.mubr.msk.f32.mxu1 %vm7108_vm11, %v7107_v16  ;;  %6835 = vmatprep.mubr.msk.f32.mxu0 %vm7108_vm11, %v7107_v16 }
0x11b4   :  { %6896 = vmatprep.subr.mxu0 %v7107_v16 }
0x11b5   :  { %6897 = vmatpush3.msra.mxu0 %v4852_v59 }
0x11b6   :  { %6799 = vmatmul.mubr.msk.f32.gmra.mxu1 %vm4387_vm14, %v5747_v52  ;;  %6836 = vmatmul.mubr.msk.f32.gmra.mxu0 %vm4387_vm14, %v5738_v53 }
0x11b7   :  { %6801 = vmatprep.mubr.msk.f32.mxu1 %vm7108_vm11, %v7107_v16  ;;  %6838 = vmatprep.mubr.msk.f32.mxu0 %vm7108_vm11, %v7107_v16 }
0x11b8   :  { %6898 = vmatprep.subr.mxu0 %v7107_v16 }
0x11b9   :  { %6899 = vmatpush3.msra.mxu0 %v4851_v13 }
0x11ba   :  { %6802 = vmatmul.mubr.msk.f32.gmra.mxu1 %vm4387_vm14, %v5748_v27  ;;  %6839 = vmatmul.mubr.msk.f32.gmra.mxu0 %vm4387_vm14, %v5739_v19 }
0x11bb   :  { %6804 = vmatprep.mubr.msk.f32.mxu1 %vm7108_vm11, %v7107_v16  ;;  %6841 = vmatprep.mubr.msk.f32.mxu0 %vm7108_vm11, %v7107_v16 }
0x11bc   :  { %6900 = vmatprep.subr.mxu0 %v7107_v16 }
0x11bd   :  { %6901 = vmatpush3.msra.mxu0 %v4850_v60 }
0x11be   :  { %6805 = vmatmul.mubr.msk.f32.gmra.mxu1 %vm4387_vm14, %v5749_v55  ;;  %6842 = vmatmul.mubr.msk.f32.gmra.mxu0 %vm4387_vm14, %v5740_v56 }
0x11bf   :  { %6807 = vmatprep.mubr.msk.f32.mxu1 %vm7108_vm11, %v7107_v16  ;;  %6844 = vmatprep.mubr.msk.f32.mxu0 %vm7108_vm11, %v7107_v16 }
0x11c0   :  { %6902 = vmatprep.subr.mxu0 %v7107_v16 }
0x11c1   :  { %6903 = vmatpush3.msra.mxu0 %v4849_v62 }
0x11c2   :  { %6808 = vmatmul.mubr.msk.f32.gmra.mxu1 %vm4387_vm14, %v5750_v57  ;;  %6845 = vmatmul.mubr.msk.f32.gmra.mxu0 %vm4387_vm14, %v5741_v58  ;;  %vm8751_vm14 = vcmp.eq.s32.totalorder %v7138_v4, %v7324_v41  ;;  %v5778_v41 = vsel %vm8752_vm2, 1.0, %v7107_v16 }
0x11c3   :  { %6865 = vmatprep.mubr.msk.f32.mxu1 %vm7108_vm11, %v7107_v16  ;;  %6908 = vmatprep.mubr.msk.f32.mxu0 %vm7108_vm11, %v7107_v16  ;;  %v5776_v40 = vsel %vm8751_vm14, 1.0, %v7107_v16 }
0x11c4   :  { %6904 = vmatprep.subr.mxu0 %v7107_v16 }
0x11c5   :  { %6905 = vmatpush3.msra.mxu0 %v4848_v11 }
0x11c6   :  { %6906 = vmatprep.subr.mxu0 %v7107_v16 }
0x11c7   :  { %6907 = vmatpush3.msra.mxu0 %v4847_v25 }
0x11c8   :  { %6978 = vmatprep.subr.mxu0 %v7107_v16 }
0x1262   :  { %v8273_v23 = vpop.f32.mrf.mxu1  ;;  %v8275_v49 = vpop.f32.mrf.mxu0 }
0x1264   :  { %v6785_v50 = vpop.f32.mrf.mxu1  ;;  %v6822_v39 = vpop.f32.mrf.mxu0 }
0x1266   :  { %v8285_v51 = vpop.f32.mrf.mxu1  ;;  %v8287_v61 = vpop.f32.mrf.mxu0 }
0x1268   :  { %v6788_v63 = vpop.f32.mrf.mxu1  ;;  %v6825_v0 = vpop.f32.mrf.mxu0 }
0x126a   :  { %v4489_v17 = vpop.f32.mrf.mxu1  ;;  %v4624_v21 = vpop.f32.mrf.mxu0 }
0x126c   :  { %v6791_v6 = vpop.f32.mrf.mxu1  ;;  %v6828_v24 = vpop.f32.mrf.mxu0 }
0x126d   :  { %v4625_v6 = vadd.f32 %v4624_v21, %v4489_v17  ;;  %v4615_v17 = vadd.f32 %v8275_v49, %v8273_v23 }
0x126e   :  { %v4494_v18 = vpop.f32.mrf.mxu1  ;;  %v4629_v15 = vpop.f32.mrf.mxu0 }
0x126f   :  { %v4630_v0 = vadd.f32 %v4629_v15, %v4494_v18  ;;  %v4665_v21 = vadd.f32 %v5771_v28, %v4625_v6  ;;  %v5131_v6 = vadd.s32 2, %v7155_v8 }
0x1270   :  { %v6794_v5 = vpop.f32.mrf.mxu1  ;;  %v6831_v1 = vpop.f32.mrf.mxu0 }
0x1271   :  { %v4620_v1 = vadd.f32 %v8287_v61, %v8285_v51  ;;  %v4663_v51 = vadd.f32 %v5771_v28, %v4615_v17  ;;  %v8332_v61 = vmax.f32 %v4665_v21, 0.0  ;;  %vm5140_vm5 = vcmp.eq.s32.totalorder %v7138_v4, %v5131_v6 }
0x1272   :  { %v4499_v2 = vpop.f32.mrf.mxu1  ;;  %v4634_v12 = vpop.f32.mrf.mxu0  ;;  %v5810_v8 = vsel %vm5140_vm5, 1.0, %v7107_v16  ;;  %v5133_v17 = vadd.s32 2, %v7184_v14 }
0x1273   :  { %v4635_v60 = vadd.f32 %v4634_v12, %v4499_v2  ;;  %v4666_v2 = vadd.f32 %v5771_v28, %v4630_v0  ;;  %v4664_v12 = vadd.f32 %v5771_v28, %v4620_v1  ;;  %v8340_v49 = vmax.f32 %v4663_v51, 0.0 }
0x1274   :  { %v6797_v31 = vpop.f32.mrf.mxu1  ;;  %v6834_v32 = vpop.f32.mrf.mxu0  ;;  %v5130_v0 = vadd.s32 2, %v7152_v7  ;;  %v5132_v1 = vadd.s32 2, %v7167_v10  ;;  %vm5142_vm7 = vcmp.eq.s32.totalorder %v7138_v4, %v5133_v17 }
0x1275   :  { %v4667_v24 = vadd.f32 %v5771_v28, %v4635_v60  ;;  %v8328_v31 = vmax.f32 %v4666_v2, 0.0  ;;  %v8336_v23 = vmax.f32 %v4664_v12, 0.0  ;;  %v5772_v32 = vsel %vm7295_vm12, 1.0, %v7107_v16 }
0x1276   :  { %v4504_v33 = vpop.f32.mrf.mxu1  ;;  %v4639_v29 = vpop.f32.mrf.mxu0  ;;  %vm8749_vm12 = vcmp.eq.s32.totalorder %v7138_v4, %v7300_v37  ;;  %v5775_v37 = vsel %vm8750_vm0, 1.0, %v7107_v16  ;;  %v5129_v60 = vadd.s32 2, %v7136_v3  ;;  %vm5139_vm9 = vcmp.eq.s32.totalorder %v7138_v4, %v5130_v0 }
0x1277   :  { %v4640_v13 = vadd.f32 %v4639_v29, %v4504_v33  ;;  %v8324_v15 = vmax.f32 %v4667_v24, 0.0  ;;  %v4688_v33 = vld [vmem:[%s8724_s1 + $0x268] sm:$0xff]  ;;  %v4687_v29 = vld [vmem:[%s8724_s1 + $0x260] sm:$0xff]  ;;  %v5774_v35 = vsel %vm8749_vm12, 1.0, %v7107_v16  ;;  %v5809_v7 = vsel %vm5139_vm9, 1.0, %v7107_v16 }
0x1278   :  { %v6800_v34 = vpop.f32.mrf.mxu1  ;;  %v6837_v42 = vpop.f32.mrf.mxu0  ;;  %vm5138_vm15 = vcmp.eq.s32.totalorder %v7138_v4, %v5129_v60  ;;  %vm5141_vm8 = vcmp.eq.s32.totalorder %v7138_v4, %v5132_v1  ;;  %v5134_v12 = vadd.s32 2, %v7212_v20  ;;  %v5812_v14 = vsel %vm5142_vm7, 1.0, %v7107_v16 }
0x1279   :  { %v4668_v11 = vadd.f32 %v5771_v28, %v4640_v13  ;;  %v4686_v34 = vld [vmem:[%s8724_s1 + $0x258] sm:$0xff]  ;;  %v4685_v42 = vld [vmem:[%s8724_s1 + $0x250] sm:$0xff]  ;;  %v5808_v3 = vsel %vm5138_vm15, 1.0, %v7107_v16  ;;  %v5811_v10 = vsel %vm5141_vm8, 1.0, %v7107_v16 }
0x127a   :  { %v4509_v46 = vpop.f32.mrf.mxu1  ;;  %v4644_v47 = vpop.f32.mrf.mxu0  ;;  %vm5143_vm1 = vcmp.eq.s32.totalorder %v7138_v4, %v5134_v12 }
0x127b   :  { %v4645_v57 = vadd.f32 %v4644_v47, %v4509_v46  ;;  %v8318_v18 = vmax.f32 %v4668_v11, 0.0  ;;  %v4684_v46 = vld [vmem:[%s8724_s1 + $0x248] sm:$0xff]  ;;  %v4683_v47 = vld [vmem:[%s8724_s1 + $0x240] sm:$0xff]  ;;  %v5813_v20 = vsel %vm5143_vm1, 1.0, %v7107_v16 }
0x127c   :  { %v6803_v30 = vpop.f32.mrf.mxu1  ;;  %v6840_v43 = vpop.f32.mrf.mxu0 }
0x127d   :  { %v4669_v62 = vadd.f32 %v5771_v28, %v4645_v57  ;;  %v4682_v30 = vld [vmem:[%s8724_s1 + $0x238] sm:$0xff]  ;;  %v4681_v43 = vld [vmem:[%s8724_s1 + $0x230] sm:$0xff] }
0x127e   :  { %v4514_v9 = vpop.f32.mrf.mxu1  ;;  %v4649_v52 = vpop.f32.mrf.mxu0 }
0x127f   :  { %v4650_v19 = vadd.f32 %v4649_v52, %v4514_v9  ;;  %v8312_v5 = vmax.f32 %v4669_v62, 0.0  ;;  %v5777_v9 = vsel %vm499_vm6, 1.0, %v7107_v16  ;;  %v4689_v52 = vadd.s32 1, %v8235_v54 }
0x1280   :  { %v6806_v53 = vpop.f32.mrf.mxu1  ;;  %v6843_v27 = vpop.f32.mrf.mxu0  ;;  %vm8753_vm6 = vcmp.eq.s32.totalorder %v7138_v4, %v7373_v48 }
0x1281   :  { %v4670_v50 = vadd.f32 %v5771_v28, %v4650_v19  ;;  %v5779_v44 = vsel %vm8753_vm6, 1.0, %v7107_v16  ;;  %vm4690_vm10 = vcmp.eq.s32.totalorder %v7138_v4, %v4689_v52  ;;  %v5303_v52 = vld [vmem:[%s8724_s1 + $0x2b8] sm:$0xff] }
0x1282   :  { %v4519_v55 = vpop.f32.mrf.mxu1  ;;  %v4654_v56 = vpop.f32.mrf.mxu0  ;;  %v5780_v45 = vsel %vm4690_vm10, 1.0, %v7107_v16 }
0x1283   :  { %v4655_v58 = vadd.f32 %v4654_v56, %v4519_v55  ;;  %v8308_v25 = vmax.f32 %v4670_v50, 0.0 }
0x1284   :  { %v6809_v38 = vpop.f32.mrf.mxu1  ;;  %v6846_v59 = vpop.f32.mrf.mxu0 }
0x1285   :  { %v4671_v39 = vadd.f32 %v5771_v28, %v4655_v58 }
0x1287   :  { %v8306_v63 = vmax.f32 %v4671_v39, 0.0 }
0x1289   :  { %6848 = vmatpush3.msra.mxu1 %v8306_v63 }
0x128a   :  { %6849 = vmatprep.subr.mxu1 %v7107_v16 }
0x128b   :  { %6850 = vmatpush3.msra.mxu1 %v8308_v25 }
0x128c   :  { %6851 = vmatprep.subr.mxu1 %v7107_v16 }
0x128d   :  { %6852 = vmatpush3.msra.mxu1 %v8312_v5 }
0x128e   :  { %6853 = vmatprep.subr.mxu1 %v7107_v16 }
0x128f   :  { %6854 = vmatpush3.msra.mxu1 %v8318_v18 }
0x1290   :  { %6855 = vmatprep.subr.mxu1 %v7107_v16 }
0x1291   :  { %6856 = vmatpush3.msra.mxu1 %v8324_v15 }
0x1292   :  { %6857 = vmatprep.subr.mxu1 %v7107_v16 }
0x1293   :  { %6858 = vmatpush3.msra.mxu1 %v8328_v31 }
0x1294   :  { %6859 = vmatprep.subr.mxu1 %v7107_v16 }
0x1295   :  { %6860 = vmatpush3.msra.mxu1 %v8332_v61 }
0x1296   :  { %6861 = vmatprep.subr.mxu1 %v7107_v16 }
0x1297   :  { %6862 = vmatpush3.msra.mxu1 %v8336_v23 }
0x1298   :  { %6863 = vmatprep.subr.mxu1 %v7107_v16 }
0x1299   :  { %6864 = vmatpush3.msra.mxu1 %v8340_v49 }
0x129a   :  { %6866 = vmatmul.mubr.msk.f32.vlgmr.msra.gmra.mxu1 %vm4709_vm4, %v5772_v32  ;;  %6935 = vmatprep.subr.mxu1 %v7107_v16  ;;  %v5136_v32 = vadd.s32 2, %v7248_v26 }
0x129b   :  { %6868 = vmatprep.mubr.msk.f32.mxu1 %vm7108_vm11, %v7107_v16  ;;  %6936 = vmatpush3.msra.mxu1 %v4688_v33 }
0x129c   :  { %6937 = vmatprep.subr.mxu1 %v7107_v16  ;;  %vm5145_vm0 = vcmp.eq.s32.totalorder %v7138_v4, %v5136_v32 }
0x129d   :  { %6938 = vmatpush3.msra.mxu1 %v4687_v29  ;;  %v5815_v26 = vsel %vm5145_vm0, 1.0, %v7107_v16 }
0x129e   :  { %6869 = vmatmul.mubr.msk.f32.gmra.mxu1 %vm4709_vm4, %v5773_v36  ;;  %6939 = vmatprep.subr.mxu1 %v7107_v16  ;;  %v5137_v36 = vadd.s32 2, %v8235_v54 }
0x129f   :  { %6871 = vmatprep.mubr.msk.f32.mxu1 %vm7108_vm11, %v7107_v16  ;;  %6940 = vmatpush3.msra.mxu1 %v4686_v34 }
0x12a0   :  { %6941 = vmatprep.subr.mxu1 %v7107_v16  ;;  %vm5146_vm14 = vcmp.eq.s32.totalorder %v7138_v4, %v5137_v36 }
0x12a1   :  { %6942 = vmatpush3.msra.mxu1 %v4685_v42  ;;  %v5816_v54 = vsel %vm5146_vm14, 1.0, %v7107_v16 }
0x12a2   :  { %6872 = vmatmul.mubr.msk.f32.gmra.mxu1 %vm4709_vm4, %v5774_v35  ;;  %6943 = vmatprep.subr.mxu1 %v7107_v16 }
0x12a3   :  { %6874 = vmatprep.mubr.msk.f32.mxu1 %vm7108_vm11, %v7107_v16  ;;  %6944 = vmatpush3.msra.mxu1 %v4684_v46 }
0x12a4   :  { %6945 = vmatprep.subr.mxu1 %v7107_v16 }
0x12a5   :  { %6946 = vmatpush3.msra.mxu1 %v4683_v47 }
0x12a6   :  { %6875 = vmatmul.mubr.msk.f32.gmra.mxu1 %vm4709_vm4, %v5775_v37  ;;  %6947 = vmatprep.subr.mxu1 %v7107_v16 }
0x12a7   :  { %6877 = vmatprep.mubr.msk.f32.mxu1 %vm7108_vm11, %v7107_v16  ;;  %6948 = vmatpush3.msra.mxu1 %v4682_v30  ;;  %v5309_v30 = vld [vmem:[%s8724_s1 + $0x2e8] sm:$0xff] }
0x12a8   :  { %6949 = vmatprep.subr.mxu1 %v7107_v16 }
0x12a9   :  { %6950 = vmatpush3.msra.mxu1 %v4681_v43  ;;  %v5307_v43 = vld [vmem:[%s8724_s1 + $0x2d8] sm:$0xff] }
0x12aa   :  { %6878 = vmatmul.mubr.msk.f32.gmra.mxu1 %vm4709_vm4, %v5776_v40  ;;  %7023 = vmatprep.subr.mxu1 %v7107_v16  ;;  %v5306_v40 = vld [vmem:[%s8724_s1 + $0x2d0] sm:$0xff] }
0x12ab   :  { %6880 = vmatprep.mubr.msk.f32.mxu1 %vm7108_vm11, %v7107_v16 }
0x12ae   :  { %6881 = vmatmul.mubr.msk.f32.gmra.mxu1 %vm4709_vm4, %v5777_v9  ;;  %v5305_v9 = vld [vmem:[%s8724_s1 + $0x2c8] sm:$0xff] }
0x12af   :  { %6883 = vmatprep.mubr.msk.f32.mxu1 %vm7108_vm11, %v7107_v16 }
0x12b2   :  { %6884 = vmatmul.mubr.msk.f32.gmra.mxu1 %vm4709_vm4, %v5778_v41  ;;  %v5304_v41 = vld [vmem:[%s8724_s1 + $0x2c0] sm:$0xff] }
0x12b3   :  { %6886 = vmatprep.mubr.msk.f32.mxu1 %vm7108_vm11, %v7107_v16 }
0x12b6   :  { %6887 = vmatmul.mubr.msk.f32.gmra.mxu1 %vm4709_vm4, %v5779_v44  ;;  %v5302_v44 = vld [vmem:[%s8724_s1 + $0x2b0] sm:$0xff] }
0x12b7   :  { %6889 = vmatprep.mubr.msk.f32.mxu1 %vm7108_vm11, %v7107_v16 }
0x12ba   :  { %6890 = vmatmul.mubr.msk.f32.gmra.mxu1 %vm4709_vm4, %v5780_v45 }
0x12bb   :  { %6951 = vmatprep.mubr.msk.f32.mxu1 %vm7108_vm11, %v7107_v16 }
0x12be   :  { %6952 = vmatmul.mubr.msk.f32.vlgmr.msra.gmra.mxu1 %vm96_vm3, %v8340_v49 }
0x12bf   :  { %6954 = vmatprep.mubr.msk.f32.mxu1 %vm7108_vm11, %v7107_v16  ;;  %7024 = vmatpush3.msra.mxu1 %v5309_v30 }
0x12c0   :  { %7025 = vmatprep.subr.mxu1 %v7107_v16 }
0x12c2   :  { %6955 = vmatmul.mubr.msk.f32.gmra.mxu1 %vm96_vm3, %v8336_v23 }
0x12c3   :  { %6957 = vmatprep.mubr.msk.f32.mxu1 %vm7108_vm11, %v7107_v16 }
0x12c6   :  { %6958 = vmatmul.mubr.msk.f32.gmra.mxu1 %vm96_vm3, %v8332_v61 }
0x12c7   :  { %6960 = vmatprep.mubr.msk.f32.mxu1 %vm7108_vm11, %v7107_v16 }
0x12ca   :  { %6961 = vmatmul.mubr.msk.f32.gmra.mxu1 %vm96_vm3, %v8328_v31 }
0x12cb   :  { %6963 = vmatprep.mubr.msk.f32.mxu1 %vm7108_vm11, %v7107_v16 }
0x12ce   :  { %6964 = vmatmul.mubr.msk.f32.gmra.mxu1 %vm96_vm3, %v8324_v15 }
0x12cf   :  { %6966 = vmatprep.mubr.msk.f32.mxu1 %vm7108_vm11, %v7107_v16 }
0x12d2   :  { %6967 = vmatmul.mubr.msk.f32.gmra.mxu1 %vm96_vm3, %v8318_v18 }
0x12d3   :  { %6969 = vmatprep.mubr.msk.f32.mxu1 %vm7108_vm11, %v7107_v16 }
0x12d6   :  { %6970 = vmatmul.mubr.msk.f32.gmra.mxu1 %vm96_vm3, %v8312_v5 }
0x12d7   :  { %6972 = vmatprep.mubr.msk.f32.mxu1 %vm7108_vm11, %v7107_v16 }
0x12da   :  { %6973 = vmatmul.mubr.msk.f32.gmra.mxu1 %vm96_vm3, %v8308_v25 }
0x12db   :  { %6975 = vmatprep.mubr.msk.f32.mxu1 %vm7108_vm11, %v7107_v16 }
0x12de   :  { %6976 = vmatmul.mubr.msk.f32.gmra.mxu1 %vm96_vm3, %v8306_v63 }
0x12df   :  { %7039 = vmatprep.mubr.msk.f32.mxu1 %vm7108_vm11, %v7107_v16 }
0x135a   :  { %v4803_v48 = vpop.f32.mrf.mxu1 }
0x135b   :  { %6909 = vmatmul.mubr.msk.f32.vlgmr.msra.gmra.mxu0 %vm96_vm3, %v4803_v48 }
0x135c   :  { %6979 = vmatpush3.msra.mxu0 %v8306_v63  ;;  %v6867_v53 = vpop.f32.mrf.mxu1  ;;  %6911 = vmatprep.mubr.msk.f32.mxu0 %vm7108_vm11, %v7107_v16 }
0x135d   :  { %6980 = vmatprep.subr.mxu0 %v7107_v16 }
0x135e   :  { %6981 = vmatpush3.msra.mxu0 %v8308_v25  ;;  %v4808_v27 = vpop.f32.mrf.mxu1 }
0x135f   :  { %6982 = vmatprep.subr.mxu0 %v7107_v16  ;;  %6912 = vmatmul.mubr.msk.f32.gmra.mxu0 %vm96_vm3, %v4808_v27 }
0x1360   :  { %6983 = vmatpush3.msra.mxu0 %v8312_v5  ;;  %v6870_v19 = vpop.f32.mrf.mxu1  ;;  %6914 = vmatprep.mubr.msk.f32.mxu0 %vm7108_vm11, %v7107_v16 }
0x1361   :  { %6984 = vmatprep.subr.mxu0 %v7107_v16 }
0x1362   :  { %6985 = vmatpush3.msra.mxu0 %v8318_v18  ;;  %v4813_v55 = vpop.f32.mrf.mxu1 }
0x1363   :  { %6986 = vmatprep.subr.mxu0 %v7107_v16  ;;  %6915 = vmatmul.mubr.msk.f32.gmra.mxu0 %vm96_vm3, %v4813_v55 }
0x1364   :  { %6987 = vmatpush3.msra.mxu0 %v8324_v15  ;;  %v6873_v56 = vpop.f32.mrf.mxu1  ;;  %6917 = vmatprep.mubr.msk.f32.mxu0 %vm7108_vm11, %v7107_v16 }
0x1365   :  { %6988 = vmatprep.subr.mxu0 %v7107_v16 }
0x1366   :  { %6989 = vmatpush3.msra.mxu0 %v8328_v31  ;;  %v4818_v57 = vpop.f32.mrf.mxu1 }
0x1367   :  { %6990 = vmatprep.subr.mxu0 %v7107_v16  ;;  %6918 = vmatmul.mubr.msk.f32.gmra.mxu0 %vm96_vm3, %v4818_v57 }
0x1368   :  { %6991 = vmatpush3.msra.mxu0 %v8332_v61  ;;  %v6876_v58 = vpop.f32.mrf.mxu1  ;;  %6920 = vmatprep.mubr.msk.f32.mxu0 %vm7108_vm11, %v7107_v16  ;;  %v5135_v61 = vadd.s32 2, %v7219_v22 }
0x1369   :  { %6992 = vmatprep.subr.mxu0 %v7107_v16 }
0x136a   :  { %6993 = vmatpush3.msra.mxu0 %v8336_v23  ;;  %v4823_v28 = vpop.f32.mrf.mxu1  ;;  %vm5144_vm12 = vcmp.eq.s32.totalorder %v7138_v4, %v5135_v61  ;;  %v5308_v4 = vld [vmem:[%s8724_s1 + $0x2e0] sm:$0xff] }
0x136b   :  { %6994 = vmatprep.subr.mxu0 %v7107_v16  ;;  %6921 = vmatmul.mubr.msk.f32.gmra.mxu0 %vm96_vm3, %v4823_v28  ;;  %v5814_v22 = vsel %vm5144_vm12, 1.0, %v7107_v16 }
0x136c   :  { %6995 = vmatpush3.msra.mxu0 %v8340_v49  ;;  %v6879_v38 = vpop.f32.mrf.mxu1  ;;  %6923 = vmatprep.mubr.msk.f32.mxu0 %vm7108_vm11, %v7107_v16 }
0x136d   :  { %7026 = vmatpush3.msra.mxu1 %v5308_v4 }
0x136e   :  { %v4828_v59 = vpop.f32.mrf.mxu1  ;;  %7027 = vmatprep.subr.mxu1 %v7107_v16 }
0x136f   :  { %6924 = vmatmul.mubr.msk.f32.gmra.mxu0 %vm96_vm3, %v4828_v59  ;;  %7028 = vmatpush3.msra.mxu1 %v5307_v43 }
0x1370   :  { %v6882_v13 = vpop.f32.mrf.mxu1  ;;  %6926 = vmatprep.mubr.msk.f32.mxu0 %vm7108_vm11, %v7107_v16  ;;  %7029 = vmatprep.subr.mxu1 %v7107_v16 }
0x1371   :  { %7030 = vmatpush3.msra.mxu1 %v5306_v40 }
0x1372   :  { %v4833_v50 = vpop.f32.mrf.mxu1  ;;  %7031 = vmatprep.subr.mxu1 %v7107_v16 }
0x1373   :  { %6927 = vmatmul.mubr.msk.f32.gmra.mxu0 %vm96_vm3, %v4833_v50  ;;  %7032 = vmatpush3.msra.mxu1 %v5305_v9 }
0x1374   :  { %v6885_v39 = vpop.f32.mrf.mxu1  ;;  %6929 = vmatprep.mubr.msk.f32.mxu0 %vm7108_vm11, %v7107_v16  ;;  %7033 = vmatprep.subr.mxu1 %v7107_v16 }
0x1375   :  { %7034 = vmatpush3.msra.mxu1 %v5304_v41 }
0x1376   :  { %v4838_v62 = vpop.f32.mrf.mxu1  ;;  %7035 = vmatprep.subr.mxu1 %v7107_v16 }
0x1377   :  { %6930 = vmatmul.mubr.msk.f32.gmra.mxu0 %vm96_vm3, %v4838_v62  ;;  %7036 = vmatpush3.msra.mxu1 %v5303_v52 }
0x1378   :  { %v6888_v63 = vpop.f32.mrf.mxu1  ;;  %6932 = vmatprep.mubr.msk.f32.mxu0 %vm7108_vm11, %v7107_v16  ;;  %7037 = vmatprep.subr.mxu1 %v7107_v16 }
0x1379   :  { %7038 = vmatpush3.msra.mxu1 %v5302_v44 }
0x137a   :  { %v4843_v11 = vpop.f32.mrf.mxu1 }
0x137b   :  { %6933 = vmatmul.mubr.msk.f32.gmra.mxu0 %vm96_vm3, %v4843_v11 }
0x137c   :  { %v6891_v25 = vpop.f32.mrf.mxu1  ;;  %6996 = vmatprep.mubr.msk.f32.mxu0 %vm7108_vm11, %v7107_v16 }
0x137e   :  { %v8525_v24 = vpop.f32.mrf.mxu1 }
0x137f   :  { %6997 = vmatmul.mubr.msk.f32.vlgmr.msra.gmra.mxu0 %vm4709_vm4, %v5808_v3 }
0x1380   :  { %v6953_v5 = vpop.f32.mrf.mxu1  ;;  %6999 = vmatprep.mubr.msk.f32.mxu0 %vm7108_vm11, %v7107_v16 }
0x1382   :  { %v8533_v2 = vpop.f32.mrf.mxu1 }
0x1383   :  { %7000 = vmatmul.mubr.msk.f32.gmra.mxu0 %vm4709_vm4, %v5809_v7 }
0x1384   :  { %v6956_v18 = vpop.f32.mrf.mxu1  ;;  %7002 = vmatprep.mubr.msk.f32.mxu0 %vm7108_vm11, %v7107_v16 }
0x1386   :  { %v8541_v21 = vpop.f32.mrf.mxu1 }
0x1387   :  { %7003 = vmatmul.mubr.msk.f32.gmra.mxu0 %vm4709_vm4, %v5810_v8 }
0x1388   :  { %v6959_v15 = vpop.f32.mrf.mxu1  ;;  %7005 = vmatprep.mubr.msk.f32.mxu0 %vm7108_vm11, %v7107_v16 }
0x138a   :  { %v8549_v31 = vpop.f32.mrf.mxu1 }
0x138b   :  { %7006 = vmatmul.mubr.msk.f32.gmra.mxu0 %vm4709_vm4, %v5811_v10 }
0x138c   :  { %v6962_v51 = vpop.f32.mrf.mxu1  ;;  %7008 = vmatprep.mubr.msk.f32.mxu0 %vm7108_vm11, %v7107_v16 }
0x138e   :  { %v8557_v23 = vpop.f32.mrf.mxu1 }
0x138f   :  { %7009 = vmatmul.mubr.msk.f32.gmra.mxu0 %vm4709_vm4, %v5812_v14 }
0x1390   :  { %v6965_v49 = vpop.f32.mrf.mxu1  ;;  %7011 = vmatprep.mubr.msk.f32.mxu0 %vm7108_vm11, %v7107_v16 }
0x1392   :  { %v8565_v33 = vpop.f32.mrf.mxu1 }
0x1393   :  { %7012 = vmatmul.mubr.msk.f32.gmra.mxu0 %vm4709_vm4, %v5813_v20 }
0x1394   :  { %v6968_v29 = vpop.f32.mrf.mxu1  ;;  %7014 = vmatprep.mubr.msk.f32.mxu0 %vm7108_vm11, %v7107_v16 }
0x1395   :  { %v8661_v29 = vld [vmem:[%s8724_s1 + $0x2f0] ss:$0 sm:$0xff] }
0x1396   :  { %v8573_v34 = vpop.f32.mrf.mxu1 }
0x1397   :  { %7015 = vmatmul.mubr.msk.f32.gmra.mxu0 %vm4709_vm4, %v5814_v22 }
0x1398   :  { %v6971_v42 = vpop.f32.mrf.mxu1  ;;  %7017 = vmatprep.mubr.msk.f32.mxu0 %vm7108_vm11, %v7107_v16 }
0x139a   :  { %v8580_v35 = vpop.f32.mrf.mxu1 }
0x139b   :  { %7018 = vmatmul.mubr.msk.f32.gmra.mxu0 %vm4709_vm4, %v5815_v26 }
0x139c   :  { %v6974_v46 = vpop.f32.mrf.mxu1  ;;  %7020 = vmatprep.mubr.msk.f32.mxu0 %vm7108_vm11, %v7107_v16 }
0x139e   :  { %v8586_v47 = vpop.f32.mrf.mxu1 }
0x139f   :  { %7021 = vmatmul.mubr.msk.f32.gmra.mxu0 %vm4709_vm4, %v5816_v54  ;;  %vm5536_vm4 = vcmask 62464  }
0x13a0   :  { %v6977_v37 = vpop.f32.mrf.mxu1 }
0x141b   :  { %v4948_v45 = vpop.f32.mrf.mxu0 }
0x141c   :  { %v5086_v20 = vadd.f32 %v8525_v24, %v4948_v45 }
0x141d   :  { %v6910_v48 = vpop.f32.mrf.mxu0 }
0x141f   :  { %v4953_v53 = vpop.f32.mrf.mxu0 }
0x1420   :  { %v5091_v42 = vadd.f32 %v8533_v2, %v4953_v53 }
0x1421   :  { %v6913_v27 = vpop.f32.mrf.mxu0 }
0x1423   :  { %v4958_v19 = vpop.f32.mrf.mxu0 }
0x1424   :  { %v5096_v30 = vadd.f32 %v8541_v21, %v4958_v19 }
0x1425   :  { %v6916_v55 = vpop.f32.mrf.mxu0 }
0x1427   :  { %v8620_v56 = vpop.f32.mrf.mxu0 }
0x1428   :  { %v5101_v41 = vadd.f32 %v8549_v31, %v8620_v56 }
0x1429   :  { %v6919_v57 = vpop.f32.mrf.mxu0 }
0x142b   :  { %v8622_v58 = vpop.f32.mrf.mxu0 }
0x142c   :  { %v5106_v21 = vadd.f32 %v8557_v23, %v8622_v58 }
0x142d   :  { %v6922_v28 = vpop.f32.mrf.mxu0 }
0x142f   :  { %v8624_v38 = vpop.f32.mrf.mxu0 }
0x1430   :  { %v5111_v31 = vadd.f32 %v8565_v33, %v8624_v38 }
0x1431   :  { %v6925_v59 = vpop.f32.mrf.mxu0 }
0x1433   :  { %v8626_v13 = vpop.f32.mrf.mxu0 }
0x1434   :  { %v5116_v23 = vadd.f32 %v8573_v34, %v8626_v13 }
0x1435   :  { %v6928_v50 = vpop.f32.mrf.mxu0 }
0x1437   :  { %v8628_v39 = vpop.f32.mrf.mxu0 }
0x1439   :  { %v6931_v60 = vpop.f32.mrf.mxu0 }
0x143b   :  { %v8630_v62 = vpop.f32.mrf.mxu0 }
0x143d   :  { %v6934_v63 = vpop.f32.mrf.mxu0 }
0x143f   :  { %v5258_v0 = vpop.f32.mrf.mxu0 }
0x1440   :  { %7040 = vmatmul.mubr.msk.f32.vlgmr.msra.gmra.mxu1 %vm96_vm3, %v5258_v0 }
0x1441   :  { %v6998_v11 = vpop.f32.mrf.mxu0  ;;  %7042 = vmatprep.mubr.msk.f32.mxu1 %vm7108_vm11, %v7107_v16 }
0x1443   :  { %v5263_v25 = vpop.f32.mrf.mxu0 }
0x1444   :  { %7043 = vmatmul.mubr.msk.f32.gmra.mxu1 %vm96_vm3, %v5263_v25 }
0x1445   :  { %v7001_v3 = vpop.f32.mrf.mxu0  ;;  %7045 = vmatprep.mubr.msk.f32.mxu1 %vm7108_vm11, %v7107_v16 }
0x1447   :  { %v5268_v6 = vpop.f32.mrf.mxu0 }
0x1448   :  { %7046 = vmatmul.mubr.msk.f32.gmra.mxu1 %vm96_vm3, %v5268_v6 }
0x1449   :  { %v7004_v5 = vpop.f32.mrf.mxu0  ;;  %7048 = vmatprep.mubr.msk.f32.mxu1 %vm7108_vm11, %v7107_v16 }
0x144a   :  { %v5121_v5 = vadd.f32 %v8580_v35, %v8628_v39 }
0x144b   :  { %v5273_v7 = vpop.f32.mrf.mxu0 }
0x144c   :  { %7049 = vmatmul.mubr.msk.f32.gmra.mxu1 %vm96_vm3, %v5273_v7 }
0x144d   :  { %v7007_v1 = vpop.f32.mrf.mxu0  ;;  %7051 = vmatprep.mubr.msk.f32.mxu1 %vm7108_vm11, %v7107_v16 }
0x144f   :  { %v5278_v18 = vpop.f32.mrf.mxu0 }
0x1450   :  { %7052 = vmatmul.mubr.msk.f32.gmra.mxu1 %vm96_vm3, %v5278_v18 }
0x1451   :  { %v7010_v8 = vpop.f32.mrf.mxu0  ;;  %7054 = vmatprep.mubr.msk.f32.mxu1 %vm7108_vm11, %v7107_v16 }
0x1453   :  { %v5283_v17 = vpop.f32.mrf.mxu0 }
0x1454   :  { %7055 = vmatmul.mubr.msk.f32.gmra.mxu1 %vm96_vm3, %v5283_v17 }
0x1455   :  { %v7013_v15 = vpop.f32.mrf.mxu0  ;;  %7057 = vmatprep.mubr.msk.f32.mxu1 %vm7108_vm11, %v7107_v16 }
0x1456   :  { %v5126_v15 = vadd.f32 %v8586_v47, %v8630_v62 }
0x1457   :  { %v5288_v10 = vpop.f32.mrf.mxu0 }
0x1458   :  { %7058 = vmatmul.mubr.msk.f32.gmra.mxu1 %vm96_vm3, %v5288_v10 }
0x1459   :  { %v7016_v12 = vpop.f32.mrf.mxu0  ;;  %7060 = vmatprep.mubr.msk.f32.mxu1 %vm7108_vm11, %v7107_v16 }
0x145b   :  { %v5293_v51 = vpop.f32.mrf.mxu0 }
0x145c   :  { %7061 = vmatmul.mubr.msk.f32.gmra.mxu1 %vm96_vm3, %v5293_v51 }
0x145d   :  { %v7019_v14 = vpop.f32.mrf.mxu0  ;;  %7063 = vmatprep.mubr.msk.f32.mxu1 %vm7108_vm11, %v7107_v16  ;;  %vm5531_vm11 = vcmask 64516  }
0x145f   :  { %v5298_v61 = vpop.f32.mrf.mxu0 }
0x1460   :  { %7064 = vmatmul.mubr.msk.f32.gmra.mxu1 %vm96_vm3, %v5298_v61  ;;  %vm5528_vm3 = vcmask 58368  }
0x1461   :  { %v7022_v49 = vpop.f32.mrf.mxu0 }
0x1500   :  { %v5403_v32 = vpop.f32.mrf.mxu1 }
0x1501   :  { %v5447_v22 = vadd.f32 %v5403_v32, %v5086_v20 }
0x1502   :  { %v7041_v36 = vpop.f32.mrf.mxu1 }
0x1503   :  { %v5461_v26 = vadd.f32 %v8661_v29, %v5447_v22 }
0x1504   :  { %v5408_v46 = vpop.f32.mrf.mxu1 }
0x1505   :  { %v5836_v16 = vmul.f32 -1.442695, %v5461_v26  ;;  %v5448_v54 = vadd.f32 %v5408_v46, %v5091_v42 }
0x1506   :  { %v7044_v37 = vpop.f32.mrf.mxu1 }
0x1507   :  { %7070 = vpow2.f32 %v5836_v16  ;;  %v5462_v24 = vadd.f32 %v8661_v29, %v5448_v54 }
0x1508   :  { %v5413_v4 = vpop.f32.mrf.mxu1 }
0x1509   :  { %v5837_v43 = vmul.f32 -1.442695, %v5462_v24  ;;  %v5449_v40 = vadd.f32 %v5413_v4, %v5096_v30 }
0x150a   :  { %v7047_v9 = vpop.f32.mrf.mxu1 }
0x150b   :  { %7072 = vpow2.f32 %v5837_v43  ;;  %v5463_v2 = vadd.f32 %v8661_v29, %v5449_v40 }
0x150c   :  { %v5418_v52 = vpop.f32.mrf.mxu1 }
0x150d   :  { %v5838_v44 = vmul.f32 -1.442695, %v5463_v2  ;;  %v5450_v45 = vadd.f32 %v5418_v52, %v5101_v41 }
0x150e   :  { %v7050_v48 = vpop.f32.mrf.mxu1 }
0x150f   :  { %7074 = vpow2.f32 %v5838_v44  ;;  %v5464_v53 = vadd.f32 %v8661_v29, %v5450_v45 }
0x1510   :  { %v5423_v27 = vpop.f32.mrf.mxu1 }
0x1511   :  { %v5839_v19 = vmul.f32 -1.442695, %v5464_v53  ;;  %v5451_v55 = vadd.f32 %v5423_v27, %v5106_v21 }
0x1512   :  { %v7053_v57 = vpop.f32.mrf.mxu1 }
0x1513   :  { %7076 = vpow2.f32 %v5839_v19  ;;  %v5465_v56 = vadd.f32 %v8661_v29, %v5451_v55 }
0x1514   :  { %v7071_v28 = vpop.eup %7070  ;;  %v5428_v59 = vpop.f32.mrf.mxu1 }
0x1515   :  { %v5497_v50 = vadd.f32 1.0, %v7071_v28  ;;  %v5840_v60 = vmul.f32 -1.442695, %v5465_v56  ;;  %v5452_v63 = vadd.f32 %v5428_v59, %v5111_v31 }
0x1516   :  { %v7056_v0 = vpop.f32.mrf.mxu1 }
0x1517   :  { %7078 = vrcp.f32 %v5497_v50  ;;  %v5466_v58 = vadd.f32 %v8661_v29, %v5452_v63 }
0x1518   :  { %v7073_v11 = vpop.eup %7072  ;;  %7080 = vpow2.f32 %v5840_v60  ;;  %v5433_v25 = vpop.f32.mrf.mxu1 }
0x1519   :  { %v5498_v3 = vadd.f32 1.0, %v7073_v11  ;;  %v5841_v33 = vmul.f32 -1.442695, %v5466_v58  ;;  %v5453_v38 = vadd.f32 %v5433_v25, %v5116_v23 }
0x151a   :  { %v7059_v6 = vpop.f32.mrf.mxu1 }
0x151b   :  { %7082 = vrcp.f32 %v5498_v3  ;;  %v5467_v7 = vadd.f32 %v8661_v29, %v5453_v38 }
0x151c   :  { %v7075_v1 = vpop.eup %7074  ;;  %7084 = vpow2.f32 %v5841_v33  ;;  %v5438_v18 = vpop.f32.mrf.mxu1 }
0x151d   :  { %v5499_v34 = vadd.f32 1.0, %v7075_v1  ;;  %v5842_v13 = vmul.f32 -1.442695, %v5467_v7  ;;  %v5454_v8 = vadd.f32 %v5438_v18, %v5121_v5 }
0x151e   :  { %v7062_v17 = vpop.f32.mrf.mxu1 }
0x151f   :  { %7086 = vrcp.f32 %v5499_v34  ;;  %v5468_v10 = vadd.f32 %v8661_v29, %v5454_v8 }
0x1520   :  { %v7077_v12 = vpop.eup %7076  ;;  %7088 = vpow2.f32 %v5842_v13  ;;  %v5443_v51 = vpop.f32.mrf.mxu1 }
0x1521   :  { %v5500_v35 = vadd.f32 1.0, %v7077_v12  ;;  %v5843_v39 = vmul.f32 -1.442695, %v5468_v10  ;;  %v5455_v14 = vadd.f32 %v5443_v51, %v5126_v15 }
0x1522   :  { %v7065_v61 = vpop.f32.mrf.mxu1 }
0x1523   :  { %7090 = vrcp.f32 %v5500_v35  ;;  %v5469_v49 = vadd.f32 %v8661_v29, %v5455_v14 }
0x1524   :  { %v7079_v20 = vpop.eup %7078  ;;  %7092 = vpow2.f32 %v5843_v39 }
0x1525   :  { %v7081_v32 = vpop.eup %7080  ;;  %5524 = vst.msk [vmem:[%s8725_s2] sm:$0xff] %vm227_vm13, %v7079_v20  ;;  %v5844_v47 = vmul.f32 -1.442695, %v5469_v49 }
0x1526   :  { %v5501_v62 = vadd.f32 1.0, %v7081_v32 }
0x1527   :  { %7094 = vpow2.f32 %v5844_v47 }
0x1528   :  { %v7083_v22 = vpop.eup %7082  ;;  %7096 = vrcp.f32 %v5501_v62 }
0x1529   :  { %v7085_v36 = vpop.eup %7084  ;;  %5525 = vst.msk [vmem:[%s8725_s2 + $0x8] sm:$0xff] %vm227_vm13, %v7083_v22 }
0x152a   :  { %v5502_v29 = vadd.f32 1.0, %v7085_v36 }
0x152c   :  { %v7087_v42 = vpop.eup %7086  ;;  %7098 = vrcp.f32 %v5502_v29 }
0x152d   :  { %v7089_v26 = vpop.eup %7088  ;;  %5526 = vst.msk [vmem:[%s8725_s2 + $0x10] sm:$0xff] %vm227_vm13, %v7087_v42 }
0x152e   :  { %v5503_v46 = vadd.f32 1.0, %v7089_v26 }
0x1530   :  { %v7091_v16 = vpop.eup %7090  ;;  %7100 = vrcp.f32 %v5503_v46 }
0x1531   :  { %v7093_v54 = vpop.eup %7092  ;;  %5527 = vst.msk [vmem:[%s8725_s2 + $0x18] sm:$0xff] %vm227_vm13, %v7091_v16 }
0x1532   :  { %v5504_v37 = vadd.f32 1.0, %v7093_v54 }
0x1534   :  { %v7095_v30 = vpop.eup %7094  ;;  %7102 = vrcp.f32 %v5504_v37 }
0x1535   :  { %v7097_v24 = vpop.eup %7096  ;;  %v5505_v4 = vadd.f32 1.0, %v7095_v30 }
0x1536   :  { %5529 = vst.msk [vmem:[%s8725_s2 + $0x20] sm:$0x3] %vm5528_vm3, %v7097_v24 }
0x1537   :  { %5845 = vst.msk [vmem:[%s8725_s2 + $0x24] sm:$0xf0] %vm5531_vm11, %v7097_v24  ;;  %7104 = vrcp.f32 %v5505_v4 }
0x1539   :  { %v7099_v43 = vpop.eup %7098 }
0x153a   :  { %5846 = vst.msk [vmem:[%s8725_s2 + $0x2c] sm:$0xff] %vm227_vm13, %v7099_v43 }
0x153d   :  { %v7101_v40 = vpop.eup %7100 }
0x153e   :  { %5847 = vst.msk [vmem:[%s8725_s2 + $0x34] sm:$0xff] %vm227_vm13, %v7101_v40 }
0x1541   :  { %v7103_v9 = vpop.eup %7102 }
0x1542   :  { %5848 = vst.msk [vmem:[%s8725_s2 + $0x3c] sm:$0xff] %vm227_vm13, %v7103_v9 }
0x1544   :  { %v7105_v41 = vpop.eup %7104 }
0x1545   :  { %5849 = vst.msk [vmem:[%s8725_s2 + $0x44] sm:$0x3f] %vm5536_vm4, %v7105_v41 }

</bundles_post_ra>
